<compile_context>
chip_gen: v5e
topology: v5e:2x2
jax: 0.10.0
libtpu: 0.0.40
codegen_flags: <defaults>
</compile_context>

<pallas_src>
import functools

import jax
import jax.numpy as jnp
import numpy as np
from jax.experimental import pallas as pl
from jax.experimental.pallas import tpu as pltpu


def _rq_kernel(x_ref, cbt_ref, cb_ref, cn_ref,
               codes_ref, quant_ref, loss_ref, *, depth, bf16_distance):
    """Quantize a (TN, E) tile of rows through `depth` codebooks.

    x_ref:     (TN, E)               f32 input rows (code-shape features)
    cbt_ref:   (depth, E, n_pad)     codebooks, transposed, for the distance matmul
    cb_ref:    (depth, n_pad, E)     f32 codebooks for the one-hot gather
    cn_ref:    (depth, 1, n_pad)     f32 0.5*||c||^2 (sentinel rows = huge)
    codes_ref: (TN, depth)           i32 selected code indices
    quant_ref: (TN, E)               f32 final aggregated quantized features
    loss_ref:  (TN, 1)               f32 per-row SSE summed over all depths
    """
    x = x_ref[...].astype(jnp.float32)
    residual = x
    row_sse = jnp.zeros((x.shape[0], 1), jnp.float32)
    code_cols = []

    for level in range(depth):  # static unrolled loop over codebook depth
        cbt = cbt_ref[level]                       # (E, n_pad)
        cn_half = cn_ref[level]                    # (1, n_pad)

        lhs = residual.astype(cbt.dtype) if bf16_distance else residual
        # score = 0.5*||c||^2 - r.c ; same argmin as the true squared distance
        # (the dropped ||r||^2 term is constant per row).  Not a true distance.
        score = cn_half - jnp.dot(lhs, cbt, preferred_element_type=jnp.float32)

        # argmin with first-index tie-breaking (matches torch.argmin);
        # sentinel (padded) columns have huge score and can never win.
        min_val = jnp.min(score, axis=-1, keepdims=True)
        lane_iota = jax.lax.broadcasted_iota(jnp.int32, score.shape, 1)
        idx = jnp.min(
            jnp.where(score == min_val, lane_iota, jnp.int32(score.shape[-1])),
            axis=-1, keepdims=True)                # (TN, 1)

        # gather codebook rows via one-hot matmul (MXU friendly)
        onehot = (lane_iota == idx).astype(jnp.float32)                   # (TN, n_pad)
        quant = jnp.dot(onehot, cb_ref[level],
                        preferred_element_type=jnp.float32)               # (TN, E)

        residual = residual - quant
        # residual == x - aggregated_quants at this depth -> commitment term
        row_sse = row_sse + jnp.sum(residual * residual, axis=-1, keepdims=True)

        code_cols.append(idx)

    codes_ref[...] = jnp.concatenate(code_cols, axis=-1)
    quant_ref[...] = (x - residual).astype(quant_ref.dtype)
    loss_ref[...] = row_sse


def _pick_tile_n(n, cap=1024):
    """Largest multiple-of-8 divisor of n, capped (amortizes per-step overhead)."""
    best = 8
    c = 8
    while c <= min(n, cap):
        if n % c == 0:
            best = c
        c += 8
    return best


def rq_bottleneck_forward(x, codebooks, code_shape, tile_n=None,
                          bf16_distance=False):
    """Forward pass of RQBottleneck.

    x:          (B, H, W, D) float
    codebooks:  (d, n_embed, embed_dim) float  (VQEmbedding padding row omitted)
    code_shape: (h, w, d)
    Returns (quants_trunc, commitment_loss, codes) matching the PyTorch module.
    """
    B, H, W, D = x.shape
    h, w, d = code_shape
    rH, rW = H // h, W // w
    E = rH * rW * D
    n_embed = codebooks.shape[1]
    assert codebooks.shape[0] == d and codebooks.shape[2] == E

    # ---- to_code_shape (reshape/transpose glue; fused under the caller's jit)
    xc = x.reshape(B, h, rH, w, rW, D).transpose(0, 1, 3, 2, 4, 5).reshape(B, h, w, E)
    xf = xc.reshape(-1, E).astype(jnp.float32)
    N = xf.shape[0]
    assert N % 8 == 0
    if tile_n is None:
        tile_n = _pick_tile_n(N)
    assert N % tile_n == 0 and tile_n % 8 == 0

    # ---- codebook prep: pad n_embed to a lane-dense multiple of 128 ----------
    n_pad = max(128, ((n_embed + 127) // 128) * 128)
    pad = n_pad - n_embed
    cb_p = codebooks.astype(jnp.float32)
    if pad:
        cb_p = jnp.pad(cb_p, ((0, 0), (0, pad), (0, 0)))          # zero code rows

    # 0.5*||c||^2, hoisted out of the kernel; sentinel rows get a huge norm so
    # they can never be selected by the argmin (emitted indices stay < n_embed).
    c_norm_half = 0.5 * jnp.sum(cb_p * cb_p, axis=-1)             # (d, n_pad)
    if pad:
        sentinel = jnp.full((d, pad), 1e30, dtype=jnp.float32)
        c_norm_half = jnp.concatenate([c_norm_half[:, :n_embed], sentinel], axis=1)
    c_norm_half = c_norm_half.reshape(d, 1, n_pad)

    cb_t = jnp.transpose(cb_p, (0, 2, 1))                         # (d, E, n_pad)
    if bf16_distance:
        # v6e/v7x option: bf16 distance matmul only (gather/accumulate stay f32).
        # Keep f32 on v5e; may flip near-tie argmin results -> validate first.
        cb_t = cb_t.astype(jnp.bfloat16)

    kernel = functools.partial(_rq_kernel, depth=d, bf16_distance=bf16_distance)

    codes_f, quants_f, row_sse = pl.pallas_call(
        kernel,
        out_shape=(
            jax.ShapeDtypeStruct((N, d), jnp.int32),
            jax.ShapeDtypeStruct((N, E), jnp.float32),
            jax.ShapeDtypeStruct((N, 1), jnp.float32),
        ),
        grid_spec=pltpu.PrefetchScalarGridSpec(
            num_scalar_prefetch=0,
            grid=(N // tile_n,),
            in_specs=[
                pl.BlockSpec((tile_n, E), lambda i: (i, 0)),
                pl.BlockSpec((d, E, n_pad), lambda i: (0, 0, 0)),
                pl.BlockSpec((d, n_pad, E), lambda i: (0, 0, 0)),
                pl.BlockSpec((d, 1, n_pad), lambda i: (0, 0, 0)),
            ],
            out_specs=[
                pl.BlockSpec((tile_n, d), lambda i: (i, 0)),
                pl.BlockSpec((tile_n, E), lambda i: (i, 0)),
                pl.BlockSpec((tile_n, 1), lambda i: (i, 0)),
            ],
        ),
        compiler_params=pltpu.CompilerParams(
            dimension_semantics=("parallel",)),   # rows are independent (2 TCs on v7x)
    )(xf, cb_t, cb_p, c_norm_half)

    # commitment_loss = mean over depths of mean((x - agg_i)^2)
    commitment_loss = jnp.sum(row_sse) / jnp.float32(d * N * E)

    # ---- to_latent_shape (glue) + straight-through estimator -----------------
    quants_code = quants_f.reshape(B, h, w, E)
    q_latent = (quants_code.reshape(B, h, w, rH, rW, D)
                .transpose(0, 1, 3, 2, 4, 5)
                .reshape(B, H, W, D)).astype(x.dtype)
    quants_trunc = x + jax.lax.stop_gradient(q_latent - x)

    codes = codes_f.reshape(B, h, w, d)
    return quants_trunc, commitment_loss, codes


def _reference_forward(x, codebooks, code_shape):
    """Pure JAX reference of the PyTorch module for verification."""
    B, H, W, D = x.shape
    h, w, d = code_shape
    rH, rW = H // h, W // w
    E = rH * rW * D
    xc = x.reshape(B, h, rH, w, rW, D).transpose(0, 1, 3, 2, 4, 5).reshape(B, h, w, E)
    xf = xc.reshape(-1, E)
    residual = xf
    agg = jnp.zeros_like(xf)
    losses, codes = [], []
    for i in range(d):
        cb = codebooks[i]
        dist = (jnp.sum(residual**2, -1, keepdims=True)
                + jnp.sum(cb**2, -1)[None, :]
                - 2.0 * residual @ cb.T)
        idx = jnp.argmin(dist, axis=-1)
        quant = cb[idx]
        residual = residual - quant
        agg = agg + quant
        losses.append(jnp.mean((xf - agg) ** 2))
        codes.append(idx)
    loss = jnp.mean(jnp.stack(losses))
    codes = jnp.stack(codes, axis=-1).reshape(B, h, w, d)
    q_latent = (agg.reshape(B, h, w, rH, rW, D)
                .transpose(0, 1, 3, 2, 4, 5).reshape(B, H, W, D))
    return q_latent, loss, codes


if __name__ == "__main__":
    # Module config: latent_shape = (16, 16, 8), code_shape = (8, 8, 4),
    # n_embed = 64  ->  embed_dim = (16*16)/(8*8) * 8 = 32
    latent_shape = (16, 16, 8)
    code_shape = (8, 8, 4)
    n_embed = 64
    B = 2
    H, W, D = latent_shape
    h, w, d = code_shape
    E = (H // h) * (W // w) * D

    key = jax.random.PRNGKey(0)
    kx, kc = jax.random.split(key)
    x = jax.random.normal(kx, (B, H, W, D), dtype=jnp.float32)
    # deterministic synthetic codebooks (padding row of VQEmbedding unused in forward)
    codebooks = 0.02 * jax.random.normal(kc, (d, n_embed, E), dtype=jnp.float32)

    # jit the whole forward so the to_code_shape / to_latent_shape relayouts
    # fuse with their producers / consumers instead of standing alone in HBM.
    fwd = jax.jit(functools.partial(rq_bottleneck_forward, code_shape=code_shape))
    quants, loss, codes = fwd(x, codebooks)
    jax.block_until_ready((quants, loss, codes))

    # verify against pure-JAX reference
    q_ref, loss_ref, codes_ref = _reference_forward(x, codebooks, code_shape)
    np.testing.assert_allclose(np.asarray(quants), np.asarray(q_ref), rtol=1e-5, atol=1e-5)
    np.testing.assert_allclose(np.asarray(loss), np.asarray(loss_ref), rtol=1e-5, atol=1e-6)
    np.testing.assert_array_equal(np.asarray(codes), np.asarray(codes_ref))

    print("KERNEL_OK")
</pallas_src>

<mosaic_0001>
module attributes {stable_mosaic.version = 11 : i64} {
  func.func @_rq_kernel(%arg0: i32, %arg1: memref<128x32xf32, #tpu.memory_space<vmem>>, %arg2: memref<4x32x128xf32, #tpu.memory_space<vmem>>, %arg3: memref<4x128x32xf32, #tpu.memory_space<vmem>>, %arg4: memref<4x1x128xf32, #tpu.memory_space<vmem>>, %arg5: memref<128x4xi32, #tpu.memory_space<vmem>>, %arg6: memref<128x32xf32, #tpu.memory_space<vmem>>, %arg7: memref<128x1xf32, #tpu.memory_space<vmem>>) attributes {dimension_semantics = [#tpu.dimension_semantics<parallel>], iteration_bounds = array<i64: 1>, scalar_prefetch = 0 : i64, scratch_operands = 0 : i64, tpu.core_type = #tpu.core_type<tc>, window_params = [{transform_indices = @transform_0, window_bounds = array<i64: 128, 32>}, {pipeline_mode = #tpu.pipeline_mode<synchronous>, transform_indices = @transform_1, window_bounds = array<i64: 4, 32, 128>}, {pipeline_mode = #tpu.pipeline_mode<synchronous>, transform_indices = @transform_2, window_bounds = array<i64: 4, 128, 32>}, {pipeline_mode = #tpu.pipeline_mode<synchronous>, transform_indices = @transform_3, window_bounds = array<i64: 4, 1, 128>}, {transform_indices = @transform_4, window_bounds = array<i64: 128, 4>}, {transform_indices = @transform_5, window_bounds = array<i64: 128, 32>}, {transform_indices = @transform_6, window_bounds = array<i64: 128, 1>}]} {
    %c0 = arith.constant 0 : index
    %c0_0 = arith.constant 0 : index
    %0 = vector.load %arg1[%c0, %c0_0] : memref<128x32xf32, #tpu.memory_space<vmem>>, vector<128x32xf32>
    %cst = arith.constant 0.000000e+00 : f32
    %1 = vector.broadcast %cst : f32 to vector<128x1xf32>
    %c0_1 = arith.constant 0 : index
    %c0_2 = arith.constant 0 : index
    %c0_3 = arith.constant 0 : index
    %2 = vector.load %arg2[%c0_1, %c0_2, %c0_3] : memref<4x32x128xf32, #tpu.memory_space<vmem>>, vector<1x32x128xf32>
    %3 = vector.shape_cast %2 : vector<1x32x128xf32> to vector<32x128xf32>
    %c0_4 = arith.constant 0 : index
    %c0_5 = arith.constant 0 : index
    %c0_6 = arith.constant 0 : index
    %4 = vector.load %arg4[%c0_4, %c0_5, %c0_6] : memref<4x1x128xf32, #tpu.memory_space<vmem>>, vector<1x1x128xf32>
    %5 = vector.shape_cast %4 : vector<1x1x128xf32> to vector<1x128xf32>
    %cst_7 = arith.constant dense<0.000000e+00> : vector<128x128xf32>
    %6 = tpu.matmul %0, %3, %cst_7 {dimension_numbers = #tpu.dot_dimension_numbers<[1], [0], [0], [1], [0, 0, 1, 1], [], []>} : vector<128x32xf32>, vector<32x128xf32>, vector<128x128xf32> -> vector<128x128xf32>
    %7 = vector.broadcast %5 : vector<1x128xf32> to vector<128x128xf32>
    %8 = arith.subf %7, %6 : vector<128x128xf32>
    %cst_8 = arith.constant dense<0x7F800000> : vector<128xf32>
    %9 = vector.multi_reduction <minimumf>, %8, %cst_8 [1] : vector<128x128xf32> to vector<128xf32>
    %10 = vector.shape_cast %9 : vector<128xf32> to vector<128x1xf32>
    %11 = tpu.iota {dimensions = array<i32: 1>} : vector<128x128xi32>
    %12 = vector.broadcast %10 : vector<128x1xf32> to vector<128x128xf32>
    %13 = arith.cmpf oeq, %8, %12 : vector<128x128xf32>
    %c128_i32 = arith.constant 128 : i32
    %14 = vector.broadcast %c128_i32 : i32 to vector<128x128xi32>
    %15 = arith.select %13, %11, %14 : vector<128x128xi1>, vector<128x128xi32>
    %cst_9 = arith.constant dense<2147483647> : vector<128xi32>
    %16 = vector.multi_reduction <minsi>, %15, %cst_9 [1] : vector<128x128xi32> to vector<128xi32>
    %17 = vector.shape_cast %16 : vector<128xi32> to vector<128x1xi32>
    %18 = vector.broadcast %17 : vector<128x1xi32> to vector<128x128xi32>
    %19 = arith.cmpi eq, %11, %18 : vector<128x128xi32>
    %20 = arith.extui %19 : vector<128x128xi1> to vector<128x128xi32>
    %21 = arith.sitofp %20 : vector<128x128xi32> to vector<128x128xf32>
    %c0_10 = arith.constant 0 : index
    %c0_11 = arith.constant 0 : index
    %c0_12 = arith.constant 0 : index
    %22 = vector.load %arg3[%c0_10, %c0_11, %c0_12] : memref<4x128x32xf32, #tpu.memory_space<vmem>>, vector<1x128x32xf32>
    %23 = vector.shape_cast %22 : vector<1x128x32xf32> to vector<128x32xf32>
    %cst_13 = arith.constant dense<0.000000e+00> : vector<128x32xf32>
    %24 = tpu.matmul %21, %23, %cst_13 {dimension_numbers = #tpu.dot_dimension_numbers<[1], [0], [0], [1], [0, 0, 1, 1], [], []>} : vector<128x128xf32>, vector<128x32xf32>, vector<128x32xf32> -> vector<128x32xf32>
    %25 = arith.subf %0, %24 : vector<128x32xf32>
    %26 = arith.mulf %25, %25 : vector<128x32xf32>
    %cst_14 = arith.constant dense<0.000000e+00> : vector<128xf32>
    %27 = vector.multi_reduction <add>, %26, %cst_14 [1] : vector<128x32xf32> to vector<128xf32>
    %28 = vector.shape_cast %27 : vector<128xf32> to vector<128x1xf32>
    %29 = arith.addf %1, %28 : vector<128x1xf32>
    %c1 = arith.constant 1 : index
    %c0_15 = arith.constant 0 : index
    %c0_16 = arith.constant 0 : index
    %30 = vector.load %arg2[%c1, %c0_15, %c0_16] : memref<4x32x128xf32, #tpu.memory_space<vmem>>, vector<1x32x128xf32>
    %31 = vector.shape_cast %30 : vector<1x32x128xf32> to vector<32x128xf32>
    %c1_17 = arith.constant 1 : index
    %c0_18 = arith.constant 0 : index
    %c0_19 = arith.constant 0 : index
    %32 = vector.load %arg4[%c1_17, %c0_18, %c0_19] : memref<4x1x128xf32, #tpu.memory_space<vmem>>, vector<1x1x128xf32>
    %33 = vector.shape_cast %32 : vector<1x1x128xf32> to vector<1x128xf32>
    %cst_20 = arith.constant dense<0.000000e+00> : vector<128x128xf32>
    %34 = tpu.matmul %25, %31, %cst_20 {dimension_numbers = #tpu.dot_dimension_numbers<[1], [0], [0], [1], [0, 0, 1, 1], [], []>} : vector<128x32xf32>, vector<32x128xf32>, vector<128x128xf32> -> vector<128x128xf32>
    %35 = vector.broadcast %33 : vector<1x128xf32> to vector<128x128xf32>
    %36 = arith.subf %35, %34 : vector<128x128xf32>
    %cst_21 = arith.constant dense<0x7F800000> : vector<128xf32>
    %37 = vector.multi_reduction <minimumf>, %36, %cst_21 [1] : vector<128x128xf32> to vector<128xf32>
    %38 = vector.shape_cast %37 : vector<128xf32> to vector<128x1xf32>
    %39 = tpu.iota {dimensions = array<i32: 1>} : vector<128x128xi32>
    %40 = vector.broadcast %38 : vector<128x1xf32> to vector<128x128xf32>
    %41 = arith.cmpf oeq, %36, %40 : vector<128x128xf32>
    %c128_i32_22 = arith.constant 128 : i32
    %42 = vector.broadcast %c128_i32_22 : i32 to vector<128x128xi32>
    %43 = arith.select %41, %39, %42 : vector<128x128xi1>, vector<128x128xi32>
    %cst_23 = arith.constant dense<2147483647> : vector<128xi32>
    %44 = vector.multi_reduction <minsi>, %43, %cst_23 [1] : vector<128x128xi32> to vector<128xi32>
    %45 = vector.shape_cast %44 : vector<128xi32> to vector<128x1xi32>
    %46 = vector.broadcast %45 : vector<128x1xi32> to vector<128x128xi32>
    %47 = arith.cmpi eq, %39, %46 : vector<128x128xi32>
    %48 = arith.extui %47 : vector<128x128xi1> to vector<128x128xi32>
    %49 = arith.sitofp %48 : vector<128x128xi32> to vector<128x128xf32>
    %c1_24 = arith.constant 1 : index
    %c0_25 = arith.constant 0 : index
    %c0_26 = arith.constant 0 : index
    %50 = vector.load %arg3[%c1_24, %c0_25, %c0_26] : memref<4x128x32xf32, #tpu.memory_space<vmem>>, vector<1x128x32xf32>
    %51 = vector.shape_cast %50 : vector<1x128x32xf32> to vector<128x32xf32>
    %cst_27 = arith.constant dense<0.000000e+00> : vector<128x32xf32>
    %52 = tpu.matmul %49, %51, %cst_27 {dimension_numbers = #tpu.dot_dimension_numbers<[1], [0], [0], [1], [0, 0, 1, 1], [], []>} : vector<128x128xf32>, vector<128x32xf32>, vector<128x32xf32> -> vector<128x32xf32>
    %53 = arith.subf %25, %52 : vector<128x32xf32>
    %54 = arith.mulf %53, %53 : vector<128x32xf32>
    %cst_28 = arith.constant dense<0.000000e+00> : vector<128xf32>
    %55 = vector.multi_reduction <add>, %54, %cst_28 [1] : vector<128x32xf32> to vector<128xf32>
    %56 = vector.shape_cast %55 : vector<128xf32> to vector<128x1xf32>
    %57 = arith.addf %29, %56 : vector<128x1xf32>
    %c2 = arith.constant 2 : index
    %c0_29 = arith.constant 0 : index
    %c0_30 = arith.constant 0 : index
    %58 = vector.load %arg2[%c2, %c0_29, %c0_30] : memref<4x32x128xf32, #tpu.memory_space<vmem>>, vector<1x32x128xf32>
    %59 = vector.shape_cast %58 : vector<1x32x128xf32> to vector<32x128xf32>
    %c2_31 = arith.constant 2 : index
    %c0_32 = arith.constant 0 : index
    %c0_33 = arith.constant 0 : index
    %60 = vector.load %arg4[%c2_31, %c0_32, %c0_33] : memref<4x1x128xf32, #tpu.memory_space<vmem>>, vector<1x1x128xf32>
    %61 = vector.shape_cast %60 : vector<1x1x128xf32> to vector<1x128xf32>
    %cst_34 = arith.constant dense<0.000000e+00> : vector<128x128xf32>
    %62 = tpu.matmul %53, %59, %cst_34 {dimension_numbers = #tpu.dot_dimension_numbers<[1], [0], [0], [1], [0, 0, 1, 1], [], []>} : vector<128x32xf32>, vector<32x128xf32>, vector<128x128xf32> -> vector<128x128xf32>
    %63 = vector.broadcast %61 : vector<1x128xf32> to vector<128x128xf32>
    %64 = arith.subf %63, %62 : vector<128x128xf32>
    %cst_35 = arith.constant dense<0x7F800000> : vector<128xf32>
    %65 = vector.multi_reduction <minimumf>, %64, %cst_35 [1] : vector<128x128xf32> to vector<128xf32>
    %66 = vector.shape_cast %65 : vector<128xf32> to vector<128x1xf32>
    %67 = tpu.iota {dimensions = array<i32: 1>} : vector<128x128xi32>
    %68 = vector.broadcast %66 : vector<128x1xf32> to vector<128x128xf32>
    %69 = arith.cmpf oeq, %64, %68 : vector<128x128xf32>
    %c128_i32_36 = arith.constant 128 : i32
    %70 = vector.broadcast %c128_i32_36 : i32 to vector<128x128xi32>
    %71 = arith.select %69, %67, %70 : vector<128x128xi1>, vector<128x128xi32>
    %cst_37 = arith.constant dense<2147483647> : vector<128xi32>
    %72 = vector.multi_reduction <minsi>, %71, %cst_37 [1] : vector<128x128xi32> to vector<128xi32>
    %73 = vector.shape_cast %72 : vector<128xi32> to vector<128x1xi32>
    %74 = vector.broadcast %73 : vector<128x1xi32> to vector<128x128xi32>
    %75 = arith.cmpi eq, %67, %74 : vector<128x128xi32>
    %76 = arith.extui %75 : vector<128x128xi1> to vector<128x128xi32>
    %77 = arith.sitofp %76 : vector<128x128xi32> to vector<128x128xf32>
    %c2_38 = arith.constant 2 : index
    %c0_39 = arith.constant 0 : index
    %c0_40 = arith.constant 0 : index
    %78 = vector.load %arg3[%c2_38, %c0_39, %c0_40] : memref<4x128x32xf32, #tpu.memory_space<vmem>>, vector<1x128x32xf32>
    %79 = vector.shape_cast %78 : vector<1x128x32xf32> to vector<128x32xf32>
    %cst_41 = arith.constant dense<0.000000e+00> : vector<128x32xf32>
    %80 = tpu.matmul %77, %79, %cst_41 {dimension_numbers = #tpu.dot_dimension_numbers<[1], [0], [0], [1], [0, 0, 1, 1], [], []>} : vector<128x128xf32>, vector<128x32xf32>, vector<128x32xf32> -> vector<128x32xf32>
    %81 = arith.subf %53, %80 : vector<128x32xf32>
    %82 = arith.mulf %81, %81 : vector<128x32xf32>
    %cst_42 = arith.constant dense<0.000000e+00> : vector<128xf32>
    %83 = vector.multi_reduction <add>, %82, %cst_42 [1] : vector<128x32xf32> to vector<128xf32>
    %84 = vector.shape_cast %83 : vector<128xf32> to vector<128x1xf32>
    %85 = arith.addf %57, %84 : vector<128x1xf32>
    %c3 = arith.constant 3 : index
    %c0_43 = arith.constant 0 : index
    %c0_44 = arith.constant 0 : index
    %86 = vector.load %arg2[%c3, %c0_43, %c0_44] : memref<4x32x128xf32, #tpu.memory_space<vmem>>, vector<1x32x128xf32>
    %87 = vector.shape_cast %86 : vector<1x32x128xf32> to vector<32x128xf32>
    %c3_45 = arith.constant 3 : index
    %c0_46 = arith.constant 0 : index
    %c0_47 = arith.constant 0 : index
    %88 = vector.load %arg4[%c3_45, %c0_46, %c0_47] : memref<4x1x128xf32, #tpu.memory_space<vmem>>, vector<1x1x128xf32>
    %89 = vector.shape_cast %88 : vector<1x1x128xf32> to vector<1x128xf32>
    %cst_48 = arith.constant dense<0.000000e+00> : vector<128x128xf32>
    %90 = tpu.matmul %81, %87, %cst_48 {dimension_numbers = #tpu.dot_dimension_numbers<[1], [0], [0], [1], [0, 0, 1, 1], [], []>} : vector<128x32xf32>, vector<32x128xf32>, vector<128x128xf32> -> vector<128x128xf32>
    %91 = vector.broadcast %89 : vector<1x128xf32> to vector<128x128xf32>
    %92 = arith.subf %91, %90 : vector<128x128xf32>
    %cst_49 = arith.constant dense<0x7F800000> : vector<128xf32>
    %93 = vector.multi_reduction <minimumf>, %92, %cst_49 [1] : vector<128x128xf32> to vector<128xf32>
    %94 = vector.shape_cast %93 : vector<128xf32> to vector<128x1xf32>
    %95 = tpu.iota {dimensions = array<i32: 1>} : vector<128x128xi32>
    %96 = vector.broadcast %94 : vector<128x1xf32> to vector<128x128xf32>
    %97 = arith.cmpf oeq, %92, %96 : vector<128x128xf32>
    %c128_i32_50 = arith.constant 128 : i32
    %98 = vector.broadcast %c128_i32_50 : i32 to vector<128x128xi32>
    %99 = arith.select %97, %95, %98 : vector<128x128xi1>, vector<128x128xi32>
    %cst_51 = arith.constant dense<2147483647> : vector<128xi32>
    %100 = vector.multi_reduction <minsi>, %99, %cst_51 [1] : vector<128x128xi32> to vector<128xi32>
    %101 = vector.shape_cast %100 : vector<128xi32> to vector<128x1xi32>
    %102 = vector.broadcast %101 : vector<128x1xi32> to vector<128x128xi32>
    %103 = arith.cmpi eq, %95, %102 : vector<128x128xi32>
    %104 = arith.extui %103 : vector<128x128xi1> to vector<128x128xi32>
    %105 = arith.sitofp %104 : vector<128x128xi32> to vector<128x128xf32>
    %c3_52 = arith.constant 3 : index
    %c0_53 = arith.constant 0 : index
    %c0_54 = arith.constant 0 : index
    %106 = vector.load %arg3[%c3_52, %c0_53, %c0_54] : memref<4x128x32xf32, #tpu.memory_space<vmem>>, vector<1x128x32xf32>
    %107 = vector.shape_cast %106 : vector<1x128x32xf32> to vector<128x32xf32>
    %cst_55 = arith.constant dense<0.000000e+00> : vector<128x32xf32>
    %108 = tpu.matmul %105, %107, %cst_55 {dimension_numbers = #tpu.dot_dimension_numbers<[1], [0], [0], [1], [0, 0, 1, 1], [], []>} : vector<128x128xf32>, vector<128x32xf32>, vector<128x32xf32> -> vector<128x32xf32>
    %109 = arith.subf %81, %108 : vector<128x32xf32>
    %110 = arith.mulf %109, %109 : vector<128x32xf32>
    %cst_56 = arith.constant dense<0.000000e+00> : vector<128xf32>
    %111 = vector.multi_reduction <add>, %110, %cst_56 [1] : vector<128x32xf32> to vector<128xf32>
    %112 = vector.shape_cast %111 : vector<128xf32> to vector<128x1xf32>
    %113 = arith.addf %85, %112 : vector<128x1xf32>
    %114 = tpu.concatenate %17, %45, %73, %101 in 1 : vector<128x1xi32>, vector<128x1xi32>, vector<128x1xi32>, vector<128x1xi32> -> vector<128x4xi32>
    %c0_57 = arith.constant 0 : index
    %c0_58 = arith.constant 0 : index
    %115 = vector.load %arg5[%c0_57, %c0_58] : memref<128x4xi32, #tpu.memory_space<vmem>>, vector<128x4xi32>
    tpu.vector_store %arg5[%c0_57, %c0_58], %114 {strides = array<i32>} : memref<128x4xi32, #tpu.memory_space<vmem>>, vector<128x4xi32>,
    %116 = arith.subf %0, %109 : vector<128x32xf32>
    %c0_59 = arith.constant 0 : index
    %c0_60 = arith.constant 0 : index
    %117 = vector.load %arg6[%c0_59, %c0_60] : memref<128x32xf32, #tpu.memory_space<vmem>>, vector<128x32xf32>
    tpu.vector_store %arg6[%c0_59, %c0_60], %116 {strides = array<i32>} : memref<128x32xf32, #tpu.memory_space<vmem>>, vector<128x32xf32>,
    %c0_61 = arith.constant 0 : index
    %c0_62 = arith.constant 0 : index
    %118 = vector.load %arg7[%c0_61, %c0_62] : memref<128x1xf32, #tpu.memory_space<vmem>>, vector<128x1xf32>
    tpu.vector_store %arg7[%c0_61, %c0_62], %113 {strides = array<i32>} : memref<128x1xf32, #tpu.memory_space<vmem>>, vector<128x1xf32>,
    return
  }
  func.func @transform_0(%arg0: i32) -> (i32, i32) {
    %c0_i32 = arith.constant 0 : i32
    %c0_i32_0 = arith.constant 0 : i32
    return %arg0, %c0_i32 : i32, i32
  }
  func.func @transform_1(%arg0: i32) -> (i32, i32, i32) {
    %c0_i32 = arith.constant 0 : i32
    %c0_i32_0 = arith.constant 0 : i32
    %c0_i32_1 = arith.constant 0 : i32
    %c0_i32_2 = arith.constant 0 : i32
    return %c0_i32, %c0_i32_0, %c0_i32_1 : i32, i32, i32
  }
  func.func @transform_2(%arg0: i32) -> (i32, i32, i32) {
    %c0_i32 = arith.constant 0 : i32
    %c0_i32_0 = arith.constant 0 : i32
    %c0_i32_1 = arith.constant 0 : i32
    %c0_i32_2 = arith.constant 0 : i32
    return %c0_i32, %c0_i32_0, %c0_i32_1 : i32, i32, i32
  }
  func.func @transform_3(%arg0: i32) -> (i32, i32, i32) {
    %c0_i32 = arith.constant 0 : i32
    %c0_i32_0 = arith.constant 0 : i32
    %c0_i32_1 = arith.constant 0 : i32
    %c0_i32_2 = arith.constant 0 : i32
    return %c0_i32, %c0_i32_0, %c0_i32_1 : i32, i32, i32
  }
  func.func @transform_4(%arg0: i32) -> (i32, i32) {
    %c0_i32 = arith.constant 0 : i32
    %c0_i32_0 = arith.constant 0 : i32
    return %arg0, %c0_i32 : i32, i32
  }
  func.func @transform_5(%arg0: i32) -> (i32, i32) {
    %c0_i32 = arith.constant 0 : i32
    %c0_i32_0 = arith.constant 0 : i32
    return %arg0, %c0_i32 : i32, i32
  }
  func.func @transform_6(%arg0: i32) -> (i32, i32) {
    %c0_i32 = arith.constant 0 : i32
    %c0_i32_0 = arith.constant 0 : i32
    return %arg0, %c0_i32 : i32, i32
  }
}

</mosaic_0001>

<bundles_post_ra>
// kernel: rq_bottleneck_forward.1
= control target key start
LH: loop header
LB: loop body
LE: loop exit
PB: predicated region body
PF: predicated region fallthrough
CT: control target
= control target key end

     0   :  { %vm41_vm0 = vcmask 261120   ;;  %v206_v36 = vlaneseq  ;;  %s5678_s1 = inlined_call_operand.vmem [shape: f32[4,32,128], index: 1, kind: input, shape index: {}]   ;;  %s5679_s0 = inlined_call_operand.vmem [shape: f32[128,32], index: 0, kind: input, shape index: {}]   ;;  %s5680_s3 = inlined_call_operand.vmem [shape: f32[4,1,128], index: 3, kind: input, shape index: {}]   ;;  %s5681_s2 = inlined_call_operand.vmem [shape: f32[4,128,32], index: 2, kind: input, shape index: {}]   ;;  %s5682_s4 = inlined_call_operand.vmem [shape: s32[128,4], index: 4, kind: output, shape index: {0}]   ;;  %s5683_s5 = inlined_call_operand.vmem [shape: f32[128,32], index: 5, kind: output, shape index: {1}]   ;;  %s5684_s6 = inlined_call_operand.vmem [shape: f32[128,1], index: 6, kind: output, shape index: {2}]  }
   0x1   :  { %v39_v0 = vld [vmem:[%s5678_s1 + $0x18] sm:$0xff]  ;;  %v38_v1 = vld [vmem:[%s5678_s1 + $0x10] sm:$0xff]  ;;  %v37_v2 = vld [vmem:[%s5678_s1 + $0x8] sm:$0xff] }
   0x2   :  { %102 = vmatpush.msra.mxu0 %v39_v0  ;;  %v36_v3 = vld [vmem:[%s5678_s1] sm:$0xff]  ;;  %v3142_v5 = vld [vmem:[%s5679_s0 + $0x8] sm:$0xff]  ;;  %v3149_v6 = vld [vmem:[%s5679_s0 + $0x10] sm:$0xff]  ;;  %v3259_v37 = vand.u32 127, %v206_v36 }
   0x3   :  { %v3135_v4 = vld [vmem:[%s5679_s0] sm:$0xff]  ;;  %v3156_v7 = vld [vmem:[%s5679_s0 + $0x18] sm:$0xff]  ;;  %v3170_v9 = vld [vmem:[%s5679_s0 + $0x28] sm:$0xff] }
   0x4   :  { %103 = vmatpush.msra.mxu0 %v38_v1  ;;  %v3163_v8 = vld [vmem:[%s5679_s0 + $0x20] sm:$0xff]  ;;  %v3177_v10 = vld [vmem:[%s5679_s0 + $0x30] sm:$0xff]  ;;  %v3184_v11 = vld [vmem:[%s5679_s0 + $0x38] sm:$0xff] }
   0x5   :  { %v3191_v12 = vld [vmem:[%s5679_s0 + $0x40] sm:$0xff]  ;;  %v3198_v13 = vld [vmem:[%s5679_s0 + $0x48] sm:$0xff]  ;;  %v3205_v14 = vld [vmem:[%s5679_s0 + $0x50] sm:$0xff] }
   0x6   :  { %104 = vmatpush.msra.mxu0 %v37_v2  ;;  %v3212_v15 = vld [vmem:[%s5680_s3] ss:$0 sm:$0xff]  ;;  %v3218_v18 = vld [vmem:[%s5679_s0 + $0x58] sm:$0xff]  ;;  %v3234_v24 = vld [vmem:[%s5679_s0 + $0x68] sm:$0xff] }
   0x7   :  { %v3226_v21 = vld [vmem:[%s5679_s0 + $0x60] sm:$0xff]  ;;  %v3242_v27 = vld [vmem:[%s5679_s0 + $0x70] sm:$0xff]  ;;  %v3250_v30 = vld [vmem:[%s5679_s0 + $0x78] sm:$0xff] }
   0x8   :  { %105 = vmatpush.msra.mxu0 %v36_v3 }
   0x9   :  { %2776 = vmatmul.msk.f32.vlgmr.msra.gmra.mxu0 %vm41_vm0, %v3135_v4 }
  0x11   :  { %2777 = vmatmul.msk.f32.gmra.mxu0 %vm41_vm0, %v3142_v5 }
  0x19   :  { %2778 = vmatmul.msk.f32.gmra.mxu0 %vm41_vm0, %v3149_v6 }
  0x21   :  { %2779 = vmatmul.msk.f32.gmra.mxu0 %vm41_vm0, %v3156_v7 }
  0x29   :  { %2780 = vmatmul.msk.f32.gmra.mxu0 %vm41_vm0, %v3163_v8 }
  0x31   :  { %2781 = vmatmul.msk.f32.gmra.mxu0 %vm41_vm0, %v3170_v9 }
  0x39   :  { %2782 = vmatmul.msk.f32.gmra.mxu0 %vm41_vm0, %v3177_v10 }
  0x41   :  { %2783 = vmatmul.msk.f32.gmra.mxu0 %vm41_vm0, %v3184_v11 }
  0x49   :  { %2784 = vmatmul.msk.f32.gmra.mxu0 %vm41_vm0, %v3191_v12 }
  0x51   :  { %2785 = vmatmul.msk.f32.gmra.mxu0 %vm41_vm0, %v3198_v13 }
  0x59   :  { %2786 = vmatmul.msk.f32.gmra.mxu0 %vm41_vm0, %v3205_v14 }
  0x61   :  { %2787 = vmatmul.msk.f32.gmra.mxu0 %vm41_vm0, %v3218_v18 }
  0x69   :  { %2788 = vmatmul.msk.f32.gmra.mxu0 %vm41_vm0, %v3226_v21 }
  0x71   :  { %2789 = vmatmul.msk.f32.gmra.mxu0 %vm41_vm0, %v3234_v24 }
  0x79   :  { %2790 = vmatmul.msk.f32.gmra.mxu0 %vm41_vm0, %v3242_v27 }
  0x81   :  { %2791 = vmatmul.msk.f32.gmra.mxu0 %vm41_vm0, %v3250_v30 }
  0x86   :  { %v107_v16 = vpop.f32.mrf.mxu0 }
  0x87   :  { %v158_v17 = vsub.f32 %v3212_v15, %v107_v16 }
  0x89   :  { %174 = vmin.xlane.f32.xlu0 %v158_v17 }
  0x8e   :  { %v110_v19 = vpop.f32.mrf.mxu0 }
  0x8f   :  { %v159_v20 = vsub.f32 %v3212_v15, %v110_v19 }
  0x91   :  { %176 = vmin.xlane.f32.xlu0 %v159_v20 }
  0x96   :  { %v113_v22 = vpop.f32.mrf.mxu0 }
  0x97   :  { %v160_v23 = vsub.f32 %v3212_v15, %v113_v22  ;;  %v527_v22 = vld [vmem:[%s5681_s2 + $0x78] sm:$0xff] }
  0x98   :  { %528 = vmatpush.msrb.mxu0 %v527_v22  ;;  %3031 = vmatpush.msra.mxu1 %v527_v22 }
  0x99   :  { %178 = vmin.xlane.f32.xlu1 %v160_v23 }
  0x9e   :  { %v116_v25 = vpop.f32.mrf.mxu0 }
  0x9f   :  { %v161_v26 = vsub.f32 %v3212_v15, %v116_v25 }
  0xa1   :  { %180 = vmin.xlane.f32.xlu1 %v161_v26 }
  0xa6   :  { %v119_v28 = vpop.f32.mrf.mxu0 }
  0xa7   :  { %v162_v29 = vsub.f32 %v3212_v15, %v119_v28 }
  0xa9   :  { %182 = vmin.xlane.f32.xlu2 %v162_v29 }
  0xae   :  { %v122_v31 = vpop.f32.mrf.mxu0 }
  0xaf   :  { %v163_v32 = vsub.f32 %v3212_v15, %v122_v31 }
  0xb1   :  { %184 = vmin.xlane.f32.xlu2 %v163_v32 }
  0xb6   :  { %v125_v33 = vpop.f32.mrf.mxu0 }
  0xb7   :  { %v3256_v34 = vsub.f32 %v3212_v15, %v125_v33 }
  0xb9   :  { %186 = vmin.xlane.f32.xlu1 %v3256_v34 }
  0xbe   :  { %v128_v35 = vpop.f32.mrf.mxu0 }
  0xbf   :  { %v3273_v46 = vsub.f32 %v3212_v15, %v128_v35 }
  0xc6   :  { %v131_v40 = vpop.f32.mrf.mxu0 }
  0xc7   :  { %v3284_v52 = vsub.f32 %v3212_v15, %v131_v40  ;;  %v525_v40 = vld [vmem:[%s5681_s2 + $0x68] sm:$0xff] }
  0xce   :  { %v134_v47 = vpop.f32.mrf.mxu0 }
  0xcf   :  { %v3294_v57 = vsub.f32 %v3212_v15, %v134_v47 }
  0xd6   :  { %v137_v54 = vpop.f32.mrf.mxu0 }
  0xd7   :  { %v3305_v63 = vsub.f32 %v3212_v15, %v137_v54 }
  0xde   :  { %v140_v61 = vpop.f32.mrf.mxu0 }
  0xe6   :  { %v143_v16 = vpop.f32.mrf.mxu0 }
  0xfc   :  { %v175_v38 = vpop.xlane.xlu0 %174 }
  0xfd   :  { %vm208_vm1 = vcmp.eq.f32.partialorder %v158_v17, %v175_v38  ;;  %v3316_v17 = vsub.f32 %v3212_v15, %v140_v61  ;;  %v526_v38 = vld [vmem:[%s5681_s2 + $0x70] sm:$0xff] }
  0xfe   :  { %v3262_v39 = vsel %vm208_vm1, %v3259_v37, 128  ;;  %529 = vmatpush.msrb.mxu0 %v526_v38  ;;  %3032 = vmatpush.msra.mxu1 %v526_v38 }
  0xff   :  { %v241_v41 = vshra.s32 %v3262_v39, 16 }
 0x100   :  { %530 = vmatpush.msrb.mxu0 %v525_v40  ;;  %3033 = vmatpush.msra.mxu1 %v525_v40 }
 0x101   :  { %v3265_v42 = vcvt.s32.f32 %v241_v41  ;;  %v524_v41 = vld [vmem:[%s5681_s2 + $0x60] sm:$0xff] }
 0x102   :  { %531 = vmatpush.msrb.mxu0 %v524_v41  ;;  %3034 = vmatpush.msra.mxu1 %v524_v41 }
 0x103   :  { %244 = vmin.xlane.f32.xlu0 %v3265_v42 }
 0x104   :  { %v177_v43 = vpop.xlane.xlu0 %176 }
 0x105   :  { %vm209_vm2 = vcmp.eq.f32.partialorder %v159_v20, %v177_v43  ;;  %v240_v43 = vand.u32 65535, %v3262_v39 }
 0x106   :  { %v3269_v44 = vsel %vm209_vm2, %v3259_v37, 128 }
 0x107   :  { %v255_v45 = vshra.s32 %v3269_v44, 16  ;;  %v242_v47 = vcvt.s32.f32 %v240_v43  ;;  %v254_v54 = vand.u32 65535, %v3269_v44  ;;  %v521_v44 = vld [vmem:[%s5681_s2 + $0x48] sm:$0xff] }
 0x109   :  { %v3275_v48 = vcvt.s32.f32 %v255_v45 }
 0x10b   :  { %258 = vmin.xlane.f32.xlu2 %v3275_v48  ;;  %188 = vmin.xlane.f32.xlu0 %v3273_v46 }
 0x10c   :  { %v179_v49 = vpop.xlane.xlu1 %178 }
 0x10d   :  { %vm210_vm3 = vcmp.eq.f32.partialorder %v160_v23, %v179_v49 }
 0x10e   :  { %v3280_v50 = vsel %vm210_vm3, %v3259_v37, 128 }
 0x10f   :  { %v269_v51 = vshra.s32 %v3280_v50, 16 }
 0x111   :  { %v3286_v53 = vcvt.s32.f32 %v269_v51  ;;  %v522_v51 = vld [vmem:[%s5681_s2 + $0x50] sm:$0xff] }
 0x113   :  { %272 = vmin.xlane.f32.xlu1 %v3286_v53  ;;  %190 = vmin.xlane.f32.xlu2 %v3284_v52 }
 0x114   :  { %v181_v55 = vpop.xlane.xlu1 %180 }
 0x115   :  { %vm211_vm4 = vcmp.eq.f32.partialorder %v161_v26, %v181_v55  ;;  %v3331_v26 = vsub.f32 %v3212_v15, %v143_v16 }
 0x116   :  { %v3291_v56 = vsel %vm211_vm4, %v3259_v37, 128 }
 0x117   :  { %v283_v58 = vshra.s32 %v3291_v56, 16 }
 0x119   :  { %v3297_v59 = vcvt.s32.f32 %v283_v58  ;;  %v256_v58 = vcvt.s32.f32 %v254_v54 }
 0x11b   :  { %286 = vmin.xlane.f32.xlu0 %v3297_v59  ;;  %192 = vmin.xlane.f32.xlu1 %v3294_v57 }
 0x11c   :  { %v183_v60 = vpop.xlane.xlu2 %182 }
 0x11d   :  { %vm212_vm5 = vcmp.eq.f32.partialorder %v162_v29, %v183_v60  ;;  %v146_v29 = vpop.f32.mrf.mxu0 }
 0x11e   :  { %v3302_v62 = vsel %vm212_vm5, %v3259_v37, 128 }
 0x11f   :  { %v297_v0 = vshra.s32 %v3302_v62, 16  ;;  %v296_v41 = vand.u32 65535, %v3302_v62  ;;  %v518_v62 = vld [vmem:[%s5681_s2 + $0x30] sm:$0xff] }
 0x121   :  { %v3308_v1 = vcvt.s32.f32 %v297_v0  ;;  %v268_v0 = vand.u32 65535, %v3280_v50  ;;  %v298_v43 = vcvt.s32.f32 %v296_v41 }
 0x123   :  { %300 = vmin.xlane.f32.xlu2 %v3308_v1  ;;  %194 = vmin.xlane.f32.xlu0 %v3305_v63  ;;  %v270_v16 = vcvt.s32.f32 %v268_v0 }
 0x124   :  { %v185_v2 = vpop.xlane.xlu2 %184 }
 0x125   :  { %vm213_vm6 = vcmp.eq.f32.partialorder %v163_v32, %v185_v2  ;;  %v3339_v32 = vsub.f32 %v3212_v15, %v146_v29  ;;  %v149_v33 = vpop.f32.mrf.mxu0 }
 0x126   :  { %v3313_v3 = vsel %vm213_vm6, %v3259_v37, 128 }
 0x127   :  { %v311_v19 = vshra.s32 %v3313_v3, 16  ;;  %v310_v54 = vand.u32 65535, %v3313_v3  ;;  %v517_v3 = vld [vmem:[%s5681_s2 + $0x28] sm:$0xff] }
 0x129   :  { %v3319_v20 = vcvt.s32.f32 %v311_v19 }
 0x12b   :  { %314 = vmin.xlane.f32.xlu1 %v3319_v20  ;;  %196 = vmin.xlane.f32.xlu2 %v3316_v17 }
 0x12c   :  { %v187_v23 = vpop.xlane.xlu1 %186 }
 0x12d   :  { %vm214_vm7 = vcmp.eq.f32.partialorder %v3256_v34, %v187_v23  ;;  %v3343_v34 = vsub.f32 %v3212_v15, %v149_v33  ;;  %v152_v35 = vpop.f32.mrf.mxu0  ;;  %v520_v23 = vld [vmem:[%s5681_s2 + $0x40] sm:$0xff] }
 0x12e   :  { %v3328_v25 = vsel %vm214_vm7, %v3259_v37, 128  ;;  %v3347_v36 = vsub.f32 %v3212_v15, %v152_v35  ;;  %v523_v15 = vld [vmem:[%s5681_s2 + $0x58] sm:$0xff] }
 0x12f   :  { %v325_v28 = vshra.s32 %v3328_v25, 16  ;;  %532 = vmatpush.msrb.mxu0 %v523_v15  ;;  %3035 = vmatpush.msra.mxu1 %v523_v15 }
 0x131   :  { %v3334_v31 = vcvt.s32.f32 %v325_v28  ;;  %533 = vmatpush.msrb.mxu0 %v522_v51  ;;  %3036 = vmatpush.msra.mxu1 %v522_v51  ;;  %v282_v28 = vand.u32 65535, %v3291_v56  ;;  %v519_v56 = vld [vmem:[%s5681_s2 + $0x38] sm:$0xff] }
 0x133   :  { %328 = vmin.xlane.f32.xlu1 %v3334_v31  ;;  %198 = vmin.xlane.f32.xlu2 %v3331_v26  ;;  %v284_v33 = vcvt.s32.f32 %v282_v28 }
 0x134   :  { %534 = vmatpush.msrb.mxu0 %v521_v44  ;;  %3037 = vmatpush.msra.mxu1 %v521_v44  ;;  %v516_v44 = vld [vmem:[%s5681_s2 + $0x20] sm:$0xff] }
 0x136   :  { %535 = vmatpush.msrb.mxu0 %v520_v23  ;;  %3038 = vmatpush.msra.mxu1 %v520_v23  ;;  %v513_v23 = vld [vmem:[%s5681_s2 + $0x8] sm:$0xff] }
 0x138   :  { %536 = vmatpush.msrb.mxu0 %v519_v56  ;;  %3039 = vmatpush.msra.mxu1 %v519_v56 }
 0x13a   :  { %537 = vmatpush.msrb.mxu0 %v518_v62  ;;  %3040 = vmatpush.msra.mxu1 %v518_v62 }
 0x13b   :  { %200 = vmin.xlane.f32.xlu2 %v3339_v32 }
 0x13c   :  { %538 = vmatpush.msrb.mxu0 %v517_v3  ;;  %3041 = vmatpush.msra.mxu1 %v517_v3 }
 0x13e   :  { %539 = vmatpush.msrb.mxu0 %v516_v44  ;;  %3042 = vmatpush.msra.mxu1 %v516_v44 }
 0x143   :  { %202 = vmin.xlane.f32.xlu2 %v3343_v34 }
 0x14b   :  { %204 = vmin.xlane.f32.xlu2 %v3347_v36 }
 0x176   :  { %v3363_v45 = vpop.xlane.xlu0 %244 }
 0x177   :  { %vm246_vm8 = vcmp.eq.f32.partialorder %v3265_v42, %v3363_v45 }
 0x178   :  { %v247_v49 = vsel %vm246_vm8, %v242_v47, inf }
 0x179   :  { %248 = vmin.xlane.f32.xlu0 %v247_v49 }
 0x17e   :  { %v3371_v55 = vpop.xlane.xlu2 %258  ;;  %v189_v39 = vpop.xlane.xlu0 %188 }
 0x17f   :  { %vm215_vm9 = vcmp.eq.f32.partialorder %v3273_v46, %v189_v39  ;;  %vm260_vm10 = vcmp.eq.f32.partialorder %v3275_v48, %v3371_v55 }
 0x180   :  { %v3377_v42 = vsel %vm215_vm9, %v3259_v37, 128  ;;  %v261_v60 = vsel %vm260_vm10, %v256_v58, inf  ;;  %v312_v58 = vcvt.s32.f32 %v310_v54  ;;  %v265_v54 = vcvt.f32.s32 %v3371_v55 }
 0x181   :  { %262 = vmin.xlane.f32.xlu0 %v261_v60  ;;  %v339_v61 = vshra.s32 %v3377_v42, 16 }
 0x182   :  { %v266_v3 = vshll.u32 %v265_v54, 16 }
 0x183   :  { %v3384_v2 = vcvt.s32.f32 %v339_v61 }
 0x185   :  { %342 = vmin.xlane.f32.xlu1 %v3384_v2 }
 0x186   :  { %v3387_v46 = vpop.xlane.xlu1 %272  ;;  %v191_v48 = vpop.xlane.xlu2 %190 }
 0x187   :  { %vm216_vm11 = vcmp.eq.f32.partialorder %v3284_v52, %v191_v48  ;;  %vm274_vm12 = vcmp.eq.f32.partialorder %v3286_v53, %v3387_v46  ;;  %v279_v55 = vcvt.f32.s32 %v3387_v46 }
 0x188   :  { %v3393_v19 = vsel %vm216_vm11, %v3259_v37, 128  ;;  %v275_v22 = vsel %vm274_vm12, %v270_v16, inf  ;;  %v514_v16 = vld [vmem:[%s5681_s2 + $0x10] sm:$0xff] }
 0x189   :  { %276 = vmin.xlane.f32.xlu0 %v275_v22  ;;  %v353_v50 = vshra.s32 %v3393_v19, 16 }
 0x18b   :  { %v3400_v29 = vcvt.s32.f32 %v353_v50 }
 0x18d   :  { %356 = vmin.xlane.f32.xlu1 %v3400_v29 }
 0x18e   :  { %v3403_v52 = vpop.xlane.xlu0 %286  ;;  %v193_v53 = vpop.xlane.xlu1 %192 }
 0x18f   :  { %vm217_vm13 = vcmp.eq.f32.partialorder %v3294_v57, %v193_v53  ;;  %vm288_vm14 = vcmp.eq.f32.partialorder %v3297_v59, %v3403_v52 }
 0x190   :  { %v3409_v35 = vsel %vm217_vm13, %v3259_v37, 128  ;;  %v289_v38 = vsel %vm288_vm14, %v284_v33, inf  ;;  %v512_v33 = vld [vmem:[%s5681_s2] sm:$0xff] }
 0x191   :  { %290 = vmin.xlane.f32.xlu0 %v289_v38  ;;  %v367_v40 = vshra.s32 %v3409_v35, 16 }
 0x193   :  { %v3416_v15 = vcvt.s32.f32 %v367_v40 }
 0x195   :  { %370 = vmin.xlane.f32.xlu1 %v3416_v15 }
 0x196   :  { %v3419_v57 = vpop.xlane.xlu2 %300  ;;  %v195_v59 = vpop.xlane.xlu0 %194 }
 0x197   :  { %vm218_vm15 = vcmp.eq.f32.partialorder %v3305_v63, %v195_v59  ;;  %vm302_vm1 = vcmp.eq.f32.partialorder %v3308_v1, %v3419_v57  ;;  %v251_v59 = vcvt.f32.s32 %v3363_v45 }
 0x198   :  { %v3425_v47 = vsel %vm218_vm15, %v3259_v37, 128  ;;  %v303_v49 = vsel %vm302_vm1, %v298_v43, inf }
 0x199   :  { %304 = vmin.xlane.f32.xlu0 %v303_v49  ;;  %v381_v51 = vshra.s32 %v3425_v47, 16  ;;  %v252_v49 = vshll.u32 %v251_v59, 16 }
 0x19b   :  { %v3432_v39 = vcvt.s32.f32 %v381_v51 }
 0x19d   :  { %384 = vmin.xlane.f32.xlu1 %v3432_v39 }
 0x19e   :  { %v3435_v63 = vpop.xlane.xlu1 %314  ;;  %v197_v1 = vpop.xlane.xlu2 %196 }
 0x19f   :  { %vm219_vm2 = vcmp.eq.f32.partialorder %v3316_v17, %v197_v1  ;;  %vm316_vm3 = vcmp.eq.f32.partialorder %v3319_v20, %v3435_v63  ;;  %v324_v17 = vand.u32 65535, %v3328_v25  ;;  %v515_v20 = vld [vmem:[%s5681_s2 + $0x18] sm:$0xff]  ;;  %v5685_v1 = vmov 1.0  }
 0x1a0   :  { %v3441_v60 = vsel %vm219_vm2, %v3259_v37, 128  ;;  %v317_v61 = vsel %vm316_vm3, %v312_v58, inf  ;;  %540 = vmatpush.msrb.mxu0 %v515_v20  ;;  %3043 = vmatpush.msra.mxu1 %v515_v20 }
 0x1a1   :  { %318 = vmin.xlane.f32.xlu2 %v317_v61  ;;  %v395_v0 = vshra.s32 %v3441_v60, 16  ;;  %v326_v25 = vcvt.s32.f32 %v324_v17  ;;  %v338_v61 = vand.u32 65535, %v3377_v42 }
 0x1a2   :  { %541 = vmatpush.msrb.mxu0 %v514_v16  ;;  %3044 = vmatpush.msra.mxu1 %v514_v16 }
 0x1a3   :  { %v3454_v48 = vcvt.s32.f32 %v395_v0  ;;  %v340_v17 = vcvt.s32.f32 %v338_v61  ;;  %v2827_v61 = vld [vmem:[%s5678_s1 + $0x38] sm:$0xff] }
 0x1a4   :  { %542 = vmatpush.msrb.mxu0 %v513_v23  ;;  %3045 = vmatpush.msra.mxu1 %v513_v23 }
 0x1a5   :  { %398 = vmin.xlane.f32.xlu0 %v3454_v48  ;;  %756 = vmatpush.msra.mxu2 %v2827_v61  ;;  %v2825_v61 = vld [vmem:[%s5678_s1 + $0x28] sm:$0xff] }
 0x1a6   :  { %v3460_v22 = vpop.xlane.xlu1 %328  ;;  %v199_v50 = vpop.xlane.xlu2 %198  ;;  %543 = vmatpush.msrb.mxu0 %v512_v33  ;;  %3046 = vmatpush.msra.mxu1 %v512_v33 }
 0x1a7   :  { %vm220_vm4 = vcmp.eq.f32.partialorder %v3331_v26, %v199_v50  ;;  %vm330_vm5 = vcmp.eq.f32.partialorder %v3334_v31, %v3460_v22  ;;  %v352_v50 = vand.u32 65535, %v3393_v19 }
 0x1a8   :  { %v3469_v28 = vsel %vm220_vm4, %v3259_v37, 128  ;;  %v331_v53 = vsel %vm330_vm5, %v326_v25, inf  ;;  %v280_v25 = vshll.u32 %v279_v55, 16 }
 0x1a9   :  { %332 = vmin.xlane.f32.xlu1 %v331_v53  ;;  %v409_v38 = vshra.s32 %v3469_v28, 16  ;;  %v354_v33 = vcvt.s32.f32 %v352_v50 }
 0x1ab   :  { %v3475_v56 = vcvt.s32.f32 %v409_v38  ;;  %v293_v38 = vcvt.f32.s32 %v3403_v52  ;;  %v366_v52 = vand.u32 65535, %v3409_v35 }
 0x1ad   :  { %412 = vmin.xlane.f32.xlu2 %v3475_v56  ;;  %v294_v59 = vshll.u32 %v293_v38, 16 }
 0x1ae   :  { %v201_v26 = vpop.xlane.xlu2 %200 }
 0x1af   :  { %vm221_vm6 = vcmp.eq.f32.partialorder %v3339_v32, %v201_v26 }
 0x1b0   :  { %v3480_v31 = vsel %vm221_vm6, %v3259_v37, 128 }
 0x1b1   :  { %v423_v40 = vshra.s32 %v3480_v31, 16 }
 0x1b3   :  { %v3483_v41 = vcvt.s32.f32 %v423_v40 }
 0x1b5   :  { %426 = vmin.xlane.f32.xlu1 %v3483_v41 }
 0x1b6   :  { %v203_v32 = vpop.xlane.xlu2 %202 }
 0x1b7   :  { %vm222_vm8 = vcmp.eq.f32.partialorder %v3343_v34, %v203_v32  ;;  %v307_v32 = vcvt.f32.s32 %v3419_v57  ;;  %v2826_v57 = vld [vmem:[%s5678_s1 + $0x30] sm:$0xff] }
 0x1b8   :  { %v3505_v20 = vsel %vm222_vm8, %v3259_v37, 128  ;;  %757 = vmatpush.msra.mxu2 %v2826_v57 }
 0x1b9   :  { %v437_v46 = vshra.s32 %v3505_v20, 16 }
 0x1ba   :  { %758 = vmatpush.msra.mxu2 %v2825_v61 }
 0x1bb   :  { %v3518_v26 = vcvt.s32.f32 %v437_v46 }
 0x1be   :  { %v205_v34 = vpop.xlane.xlu2 %204 }
 0x1bf   :  { %vm223_vm11 = vcmp.eq.f32.partialorder %v3347_v36, %v205_v34 }
 0x1c0   :  { %v3523_v19 = vsel %vm223_vm11, %v3259_v37, 128 }
 0x1ec   :  { %v249_v43 = vpop.xlane.xlu0 %248 }
 0x1ed   :  { %v250_v62 = vcvt.f32.s32 %v249_v43 }
 0x1ef   :  { %v3487_v51 = vadd.s32 %v252_v49, %v250_v62  ;;  %v451_v49 = vshra.s32 %v3523_v19, 16 }
 0x1f1   :  { %vm464_vm7 = vcmp.eq.s32.totalorder %v3259_v37, %v3487_v51 }
 0x1f2   :  { %2808 = vmatmul.msk.f32.vlgmr.msrb.gmra.mxu0 %vm464_vm7, %v5685_v1 }
 0x1f4   :  { %v263_v58 = vpop.xlane.xlu0 %262 }
 0x1f5   :  { %v264_v44 = vcvt.f32.s32 %v263_v58  ;;  %v3538_v58 = vcvt.s32.f32 %v451_v49 }
 0x1f7   :  { %v3495_v45 = vadd.s32 %v266_v3, %v264_v44  ;;  %v380_v44 = vand.u32 65535, %v3425_v47 }
 0x1f8   :  { %v3497_v0 = vpop.xlane.xlu1 %342 }
 0x1f9   :  { %vm465_vm9 = vcmp.eq.s32.totalorder %v3259_v37, %v3495_v45  ;;  %vm344_vm10 = vcmp.eq.f32.partialorder %v3384_v2, %v3497_v0  ;;  %v382_v34 = vcvt.s32.f32 %v380_v44 }
 0x1fa   :  { %2809 = vmatmul.msk.f32.vlgmr.msra.gmra.mxu1 %vm465_vm9, %v5685_v1  ;;  %v345_v42 = vsel %vm344_vm10, %v340_v17, inf }
 0x1fb   :  { %346 = vmin.xlane.f32.xlu0 %v345_v42 }
 0x1fc   :  { %v277_v16 = vpop.xlane.xlu0 %276 }
 0x1fd   :  { %v278_v23 = vcvt.f32.s32 %v277_v16  ;;  %v321_v16 = vcvt.f32.s32 %v3435_v63 }
 0x1ff   :  { %v3511_v53 = vadd.s32 %v280_v25, %v278_v23  ;;  %v394_v25 = vand.u32 65535, %v3441_v60  ;;  %v322_v23 = vshll.u32 %v321_v16, 16 }
 0x200   :  { %v3513_v2 = vpop.xlane.xlu1 %356 }
 0x201   :  { %vm466_vm12 = vcmp.eq.s32.totalorder %v3259_v37, %v3511_v53  ;;  %vm358_vm13 = vcmp.eq.f32.partialorder %v3400_v29, %v3513_v2  ;;  %v368_v29 = vcvt.s32.f32 %v366_v52  ;;  %v396_v63 = vcvt.s32.f32 %v394_v25 }
 0x202   :  { %2810 = vmatmul.msk.f32.gmra.mxu1 %vm466_vm12, %v5685_v1  ;;  %v359_v36 = vsel %vm358_vm13, %v354_v33, inf  ;;  %v363_v16 = vcvt.f32.s32 %v3513_v2 }
 0x203   :  { %440 = vmin.xlane.f32.xlu0 %v3518_v26  ;;  %360 = vmin.xlane.f32.xlu2 %v359_v36  ;;  %v335_v36 = vcvt.f32.s32 %v3460_v22 }
 0x204   :  { %v291_v40 = vpop.xlane.xlu0 %290 }
 0x205   :  { %v292_v43 = vcvt.f32.s32 %v291_v40  ;;  %v408_v40 = vand.u32 65535, %v3469_v28  ;;  %v336_v52 = vshll.u32 %v335_v36, 16 }
 0x207   :  { %v3529_v62 = vadd.s32 %v294_v59, %v292_v43  ;;  %v410_v22 = vcvt.s32.f32 %v408_v40 }
 0x208   :  { %v3531_v54 = vpop.xlane.xlu1 %370 }
 0x209   :  { %vm467_vm14 = vcmp.eq.s32.totalorder %v3259_v37, %v3529_v62  ;;  %vm372_vm15 = vcmp.eq.f32.partialorder %v3416_v15, %v3531_v54  ;;  %v308_v15 = vshll.u32 %v307_v32, 16  ;;  %v377_v36 = vcvt.f32.s32 %v3531_v54 }
 0x20a   :  { %2811 = vmatmul.msk.f32.gmra.mxu1 %vm467_vm14, %v5685_v1  ;;  %v373_v35 = vsel %vm372_vm15, %v368_v29, inf  ;;  %v422_v29 = vand.u32 65535, %v3480_v31  ;;  %v349_v31 = vcvt.f32.s32 %v3497_v0 }
 0x20b   :  { %374 = vmin.xlane.f32.xlu1 %v373_v35  ;;  %454 = vmin.xlane.f32.xlu2 %v3538_v58 }
 0x20c   :  { %v305_v3 = vpop.xlane.xlu0 %304  ;;  %v424_v32 = vcvt.s32.f32 %v422_v29 }
 0x20d   :  { %v306_v17 = vcvt.f32.s32 %v305_v3  ;;  %v350_v3 = vshll.u32 %v349_v31, 16 }
 0x20f   :  { %v3549_v55 = vadd.s32 %v308_v15, %v306_v17 }
 0x210   :  { %v3551_v42 = vpop.xlane.xlu1 %384 }
 0x211   :  { %vm468_vm1 = vcmp.eq.s32.totalorder %v3259_v37, %v3549_v55  ;;  %vm386_vm2 = vcmp.eq.f32.partialorder %v3432_v39, %v3551_v42 }
 0x212   :  { %2812 = vmatmul.msk.f32.gmra.mxu1 %vm468_vm1, %v5685_v1  ;;  %v387_v47 = vsel %vm386_vm2, %v382_v34, inf  ;;  %v436_v34 = vand.u32 65535, %v3505_v20 }
 0x213   :  { %388 = vmin.xlane.f32.xlu0 %v387_v47 }
 0x214   :  { %v319_v50 = vpop.xlane.xlu2 %318 }
 0x215   :  { %v320_v46 = vcvt.f32.s32 %v319_v50  ;;  %v438_v50 = vcvt.s32.f32 %v436_v34 }
 0x217   :  { %v3560_v33 = vadd.s32 %v322_v23, %v320_v46 }
 0x218   :  { %v3562_v38 = vpop.xlane.xlu0 %398 }
 0x219   :  { %vm469_vm3 = vcmp.eq.s32.totalorder %v3259_v37, %v3560_v33  ;;  %vm400_vm4 = vcmp.eq.f32.partialorder %v3454_v48, %v3562_v38  ;;  %v405_v61 = vcvt.f32.s32 %v3562_v38 }
 0x21a   :  { %2813 = vmatmul.msk.f32.gmra.mxu1 %vm469_vm3, %v5685_v1  ;;  %v401_v39 = vsel %vm400_vm4, %v396_v63, inf  ;;  %v450_v63 = vand.u32 65535, %v3523_v19 }
 0x21b   :  { %402 = vmin.xlane.f32.xlu1 %v401_v39 }
 0x21c   :  { %v333_v60 = vpop.xlane.xlu1 %332 }
 0x21d   :  { %v334_v59 = vcvt.f32.s32 %v333_v60  ;;  %v378_v60 = vshll.u32 %v377_v36, 16 }
 0x21f   :  { %v3571_v43 = vadd.s32 %v336_v52, %v334_v59 }
 0x220   :  { %v3573_v49 = vpop.xlane.xlu2 %412 }
 0x221   :  { %vm470_vm5 = vcmp.eq.s32.totalorder %v3259_v37, %v3571_v43  ;;  %vm414_vm6 = vcmp.eq.f32.partialorder %v3475_v56, %v3573_v49  ;;  %v2824_v56 = vld [vmem:[%s5678_s1 + $0x20] sm:$0xff] }
 0x222   :  { %2814 = vmatmul.msk.f32.gmra.mxu1 %vm470_vm5, %v5685_v1  ;;  %v415_v48 = vsel %vm414_vm6, %v410_v22, inf  ;;  %759 = vmatpush.msra.mxu2 %v2824_v56  ;;  %v391_v22 = vcvt.f32.s32 %v3551_v42  ;;  %v406_v56 = vshll.u32 %v405_v61, 16 }
 0x223   :  { %416 = vmin.xlane.f32.xlu2 %v415_v48 }
 0x224   :  { %v392_v29 = vshll.u32 %v391_v22, 16 }
 0x228   :  { %v3581_v28 = vpop.xlane.xlu1 %426 }
 0x229   :  { %vm428_vm7 = vcmp.eq.f32.partialorder %v3483_v41, %v3581_v28 }
 0x22a   :  { %v429_v35 = vsel %vm428_vm7, %v424_v32, inf }
 0x22b   :  { %430 = vmin.xlane.f32.xlu0 %v429_v35 }
 0x26e   :  { %v347_v57 = vpop.xlane.xlu0 %346 }
 0x26f   :  { %v348_v44 = vcvt.f32.s32 %v347_v57  ;;  %v545_v15 = vpop.f32.mrf.mxu0 }
 0x270   :  { %v3593_v41 = vsub.f32 %v3135_v4, %v545_v15  ;;  %v364_v4 = vshll.u32 %v363_v16, 16 }
 0x271   :  { %v3595_v17 = vadd.s32 %v350_v3, %v348_v44  ;;  %v419_v44 = vcvt.f32.s32 %v3573_v49 }
 0x272   :  { %5753 = vst [vmem:[#allocation2_spill] sm:$0xff] %v3593_v41  ;;  %2829 = vmatmul.msk.f32.vlgmr.msra.gmra.mxu2 %vm41_vm0, %v3593_v41 }
 0x273   :  { %vm471_vm8 = vcmp.eq.s32.totalorder %v3259_v37, %v3595_v17  ;;  %v420_v15 = vshll.u32 %v419_v44, 16 }
 0x274   :  { %2815 = vmatmul.msk.f32.gmra.mxu1 %vm471_vm8, %v5685_v1 }
 0x276   :  { %v3604_v0 = vpop.xlane.xlu0 %440  ;;  %v361_v47 = vpop.xlane.xlu2 %360 }
 0x277   :  { %v362_v25 = vcvt.f32.s32 %v361_v47  ;;  %v548_v23 = vpop.f32.mrf.mxu1  ;;  %vm442_vm9 = vcmp.eq.f32.partialorder %v3518_v26, %v3604_v0 }
 0x278   :  { %v3609_v46 = vsub.f32 %v3142_v5, %v548_v23  ;;  %v443_v20 = vsel %vm442_vm9, %v438_v50, inf  ;;  %v452_v5 = vcvt.s32.f32 %v450_v63  ;;  %v433_v50 = vcvt.f32.s32 %v3581_v28 }
 0x279   :  { %444 = vmin.xlane.f32.xlu1 %v443_v20  ;;  %v3611_v2 = vadd.s32 %v364_v4, %v362_v25  ;;  %v447_v28 = vcvt.f32.s32 %v3604_v0  ;;  %v3691_v0 = vld [vmem:[%s5680_s3 + $0x1] ss:$0 sm:$0xff] }
 0x27a   :  { %5754 = vst [vmem:[#allocation3_spill] sm:$0xff] %v3609_v46  ;;  %2830 = vmatmul.msk.f32.gmra.mxu2 %vm41_vm0, %v3609_v46  ;;  %v434_v4 = vshll.u32 %v433_v50, 16 }
 0x27b   :  { %vm472_vm10 = vcmp.eq.s32.totalorder %v3259_v37, %v3611_v2  ;;  %v448_v36 = vshll.u32 %v447_v28, 16 }
 0x27c   :  { %2816 = vmatmul.msk.f32.gmra.mxu1 %vm472_vm10, %v5685_v1 }
 0x27e   :  { %v375_v26 = vpop.xlane.xlu1 %374  ;;  %v3620_v39 = vpop.xlane.xlu2 %454 }
 0x27f   :  { %v376_v40 = vcvt.f32.s32 %v375_v26  ;;  %v551_v52 = vpop.f32.mrf.mxu1  ;;  %vm456_vm11 = vcmp.eq.f32.partialorder %v3538_v58, %v3620_v39 }
 0x280   :  { %v3625_v59 = vsub.f32 %v3149_v6, %v551_v52  ;;  %v457_v19 = vsel %vm456_vm11, %v452_v5, inf }
 0x281   :  { %458 = vmin.xlane.f32.xlu2 %v457_v19  ;;  %v3627_v54 = vadd.s32 %v378_v60, %v376_v40 }
 0x282   :  { %5755 = vst [vmem:[#allocation4_spill] sm:$0xff] %v3625_v59  ;;  %2831 = vmatmul.msk.f32.gmra.mxu2 %vm41_vm0, %v3625_v59 }
 0x283   :  { %vm473_vm12 = vcmp.eq.s32.totalorder %v3259_v37, %v3627_v54 }
 0x284   :  { %2817 = vmatmul.msk.f32.gmra.mxu1 %vm473_vm12, %v5685_v1 }
 0x286   :  { %v389_v48 = vpop.xlane.xlu0 %388 }
 0x287   :  { %v390_v58 = vcvt.f32.s32 %v389_v48  ;;  %v554_v32 = vpop.f32.mrf.mxu1 }
 0x288   :  { %v3636_v6 = vsub.f32 %v3156_v7, %v554_v32 }
 0x289   :  { %v3638_v35 = vadd.s32 %v392_v29, %v390_v58 }
 0x28a   :  { %5756 = vst [vmem:[#allocation5_spill] sm:$0xff] %v3636_v6  ;;  %2832 = vmatmul.msk.f32.gmra.mxu2 %vm41_vm0, %v3636_v6 }
 0x28b   :  { %vm474_vm13 = vcmp.eq.s32.totalorder %v3259_v37, %v3638_v35 }
 0x28c   :  { %2818 = vmatmul.msk.f32.gmra.mxu1 %vm474_vm13, %v5685_v1 }
 0x28e   :  { %v403_v42 = vpop.xlane.xlu1 %402 }
 0x28f   :  { %v404_v31 = vcvt.f32.s32 %v403_v42  ;;  %v557_v57 = vpop.f32.mrf.mxu1 }
 0x290   :  { %v3647_v3 = vsub.f32 %v3163_v8, %v557_v57 }
 0x291   :  { %v3649_v7 = vadd.s32 %v406_v56, %v404_v31 }
 0x292   :  { %5757 = vst [vmem:[#allocation6_spill] sm:$0xff] %v3647_v3  ;;  %2833 = vmatmul.msk.f32.gmra.mxu2 %vm41_vm0, %v3647_v3 }
 0x293   :  { %vm475_vm14 = vcmp.eq.s32.totalorder %v3259_v37, %v3649_v7 }
 0x294   :  { %2819 = vmatmul.msk.f32.gmra.mxu1 %vm475_vm14, %v5685_v1 }
 0x296   :  { %v417_v38 = vpop.xlane.xlu2 %416 }
 0x297   :  { %v418_v34 = vcvt.f32.s32 %v417_v38  ;;  %v560_v16 = vpop.f32.mrf.mxu1 }
 0x298   :  { %v3658_v47 = vsub.f32 %v3170_v9, %v560_v16 }
 0x299   :  { %v3660_v8 = vadd.s32 %v420_v15, %v418_v34 }
 0x29a   :  { %5758 = vst [vmem:[#allocation7_spill] sm:$0xff] %v3658_v47  ;;  %2834 = vmatmul.msk.f32.gmra.mxu2 %vm41_vm0, %v3658_v47 }
 0x29b   :  { %5759 = vst [vmem:[#allocation8_spill] sm:$0xff] %v3660_v8  ;;  %vm476_vm15 = vcmp.eq.s32.totalorder %v3259_v37, %v3660_v8 }
 0x29c   :  { %2820 = vmatmul.msk.f32.gmra.mxu1 %vm476_vm15, %v5685_v1 }
 0x29e   :  { %v431_v49 = vpop.xlane.xlu0 %430 }
 0x29f   :  { %v432_v25 = vcvt.f32.s32 %v431_v49  ;;  %v563_v23 = vpop.f32.mrf.mxu1 }
 0x2a0   :  { %v3669_v20 = vsub.f32 %v3177_v10, %v563_v23  ;;  %v461_v10 = vcvt.f32.s32 %v3620_v39 }
 0x2a1   :  { %v3671_v9 = vadd.s32 %v434_v4, %v432_v25 }
 0x2a2   :  { %5760 = vst [vmem:[#allocation9_spill] sm:$0xff] %v3669_v20  ;;  %2835 = vmatmul.msk.f32.gmra.mxu2 %vm41_vm0, %v3669_v20  ;;  %v462_v19 = vshll.u32 %v461_v10, 16 }
 0x2a3   :  { %5761 = vst [vmem:[#allocation10_spill] sm:$0xff] %v3671_v9  ;;  %vm477_vm1 = vcmp.eq.s32.totalorder %v3259_v37, %v3671_v9 }
 0x2a4   :  { %2821 = vmatmul.msk.f32.gmra.mxu1 %vm477_vm1, %v5685_v1 }
 0x2ec   :  { %v445_v63 = vpop.xlane.xlu1 %444 }
 0x2ed   :  { %v446_v26 = vcvt.f32.s32 %v445_v63 }
 0x2ef   :  { %v3679_v5 = vadd.s32 %v448_v36, %v446_v26 }
 0x2f1   :  { %5762 = vst [vmem:[#allocation11_spill] sm:$0xff] %v3679_v5  ;;  %v566_v60 = vpop.f32.mrf.mxu1  ;;  %vm478_vm2 = vcmp.eq.s32.totalorder %v3259_v37, %v3679_v5  ;;  %v5773_v5 = vmov 1.0  }
 0x2f2   :  { %v3685_v40 = vsub.f32 %v3184_v11, %v566_v60  ;;  %2822 = vmatmul.msk.f32.gmra.mxu1 %vm478_vm2, %v5685_v1 }
 0x2f4   :  { %5763 = vst [vmem:[#allocation12_spill] sm:$0xff] %v3685_v40  ;;  %2836 = vmatmul.msk.f32.gmra.mxu2 %vm41_vm0, %v3685_v40  ;;  %v459_v52 = vpop.xlane.xlu2 %458 }
 0x2f5   :  { %v460_v39 = vcvt.f32.s32 %v459_v52  ;;  %v761_v22 = vpop.f32.mrf.mxu2 }
 0x2f6   :  { %v812_v48 = vsub.f32 %v3691_v0, %v761_v22 }
 0x2f7   :  { %v3696_v29 = vadd.s32 %v462_v19, %v460_v39 }
 0x2f8   :  { %828 = vmin.xlane.f32.xlu0 %v812_v48 }
 0x2f9   :  { %5764 = vst [vmem:[#allocation13_spill] sm:$0xff] %v3696_v29  ;;  %v569_v11 = vpop.f32.mrf.mxu1  ;;  %vm479_vm3 = vcmp.eq.s32.totalorder %v3259_v37, %v3696_v29 }
 0x2fa   :  { %v3701_v58 = vsub.f32 %v3191_v12, %v569_v11  ;;  %2823 = vmatmul.msk.f32.gmra.mxu1 %vm479_vm3, %v5685_v1 }
 0x2fc   :  { %5765 = vst [vmem:[#allocation14_spill] sm:$0xff] %v3701_v58  ;;  %2837 = vmatmul.msk.f32.gmra.mxu2 %vm41_vm0, %v3701_v58 }
 0x2fd   :  { %v764_v32 = vpop.f32.mrf.mxu2 }
 0x2fe   :  { %v813_v61 = vsub.f32 %v3691_v0, %v764_v32 }
 0x300   :  { %830 = vmin.xlane.f32.xlu1 %v813_v61 }
 0x301   :  { %v572_v42 = vpop.f32.mrf.mxu1 }
 0x302   :  { %v3708_v56 = vsub.f32 %v3198_v13, %v572_v42 }
 0x304   :  { %5766 = vst [vmem:[#allocation15_spill] sm:$0xff] %v3708_v56  ;;  %2838 = vmatmul.msk.f32.gmra.mxu2 %vm41_vm0, %v3708_v56 }
 0x305   :  { %v767_v31 = vpop.f32.mrf.mxu2 }
 0x306   :  { %v814_v12 = vsub.f32 %v3691_v0, %v767_v31 }
 0x308   :  { %832 = vmin.xlane.f32.xlu2 %v814_v12 }
 0x309   :  { %v575_v57 = vpop.f32.mrf.mxu1 }
 0x30a   :  { %v3714_v44 = vsub.f32 %v3205_v14, %v575_v57 }
 0x30c   :  { %5767 = vst [vmem:[#allocation16_spill] sm:$0xff] %v3714_v44  ;;  %2839 = vmatmul.msk.f32.gmra.mxu2 %vm41_vm0, %v3714_v44 }
 0x30d   :  { %v770_v38 = vpop.f32.mrf.mxu2 }
 0x30e   :  { %v815_v15 = vsub.f32 %v3691_v0, %v770_v38 }
 0x310   :  { %834 = vmin.xlane.f32.xlu0 %v815_v15 }
 0x311   :  { %v578_v13 = vpop.f32.mrf.mxu1 }
 0x312   :  { %v3720_v34 = vsub.f32 %v3218_v18, %v578_v13 }
 0x314   :  { %5768 = vst [vmem:[#allocation17_spill] sm:$0xff] %v3720_v34  ;;  %2840 = vmatmul.msk.f32.gmra.mxu2 %vm41_vm0, %v3720_v34 }
 0x315   :  { %v773_v16 = vpop.f32.mrf.mxu2 }
 0x316   :  { %v816_v50 = vsub.f32 %v3691_v0, %v773_v16 }
 0x318   :  { %836 = vmin.xlane.f32.xlu1 %v816_v50 }
 0x319   :  { %v581_v14 = vpop.f32.mrf.mxu1 }
 0x31a   :  { %v3726_v49 = vsub.f32 %v3226_v21, %v581_v14 }
 0x31c   :  { %5769 = vst [vmem:[#allocation18_spill] sm:$0xff] %v3726_v49  ;;  %2841 = vmatmul.msk.f32.gmra.mxu2 %vm41_vm0, %v3726_v49 }
 0x31d   :  { %v776_v4 = vpop.f32.mrf.mxu2 }
 0x31e   :  { %v817_v25 = vsub.f32 %v3691_v0, %v776_v4 }
 0x320   :  { %838 = vmin.xlane.f32.xlu2 %v817_v25 }
 0x321   :  { %v584_v18 = vpop.f32.mrf.mxu1 }
 0x322   :  { %v3732_v23 = vsub.f32 %v3234_v24, %v584_v18 }
 0x324   :  { %5770 = vst [vmem:[#allocation19_spill] sm:$0xff] %v3732_v23  ;;  %2842 = vmatmul.msk.f32.gmra.mxu2 %vm41_vm0, %v3732_v23 }
 0x325   :  { %v779_v28 = vpop.f32.mrf.mxu2 }
 0x326   :  { %v818_v63 = vsub.f32 %v3691_v0, %v779_v28 }
 0x328   :  { %840 = vmin.xlane.f32.xlu1 %v818_v63 }
 0x36b   :  { %v829_v21 = vpop.xlane.xlu0 %828 }
 0x36c   :  { %vm860_vm4 = vcmp.eq.f32.partialorder %v812_v48, %v829_v21 }
 0x36d   :  { %v3738_v36 = vsel %vm860_vm4, %v3259_v37, 128 }
 0x36e   :  { %v893_v26 = vshra.s32 %v3738_v36, 16 }
 0x36f   :  { %v587_v10 = vpop.f32.mrf.mxu1 }
 0x370   :  { %v3742_v60 = vsub.f32 %v3242_v27, %v587_v10  ;;  %v3744_v24 = vcvt.s32.f32 %v893_v26 }
 0x372   :  { %5771 = vst [vmem:[#allocation20_spill] sm:$0xff] %v3742_v60  ;;  %896 = vmin.xlane.f32.xlu0 %v3744_v24  ;;  %2843 = vmatmul.msk.f32.gmra.mxu2 %vm41_vm0, %v3742_v60 }
 0x373   :  { %v831_v52 = vpop.xlane.xlu1 %830 }
 0x374   :  { %vm861_vm5 = vcmp.eq.f32.partialorder %v813_v61, %v831_v52 }
 0x375   :  { %v3750_v19 = vsel %vm861_vm5, %v3259_v37, 128 }
 0x376   :  { %v907_v39 = vshra.s32 %v3750_v19, 16 }
 0x377   :  { %v590_v22 = vpop.f32.mrf.mxu1  ;;  %v782_v48 = vpop.f32.mrf.mxu2 }
 0x378   :  { %v3754_v11 = vsub.f32 %v3250_v30, %v590_v22  ;;  %v3757_v27 = vsub.f32 %v3691_v0, %v782_v48  ;;  %v3759_v32 = vcvt.s32.f32 %v907_v39 }
 0x37a   :  { %5772 = vst [vmem:[#allocation21_spill] sm:$0xff] %v3754_v11  ;;  %842 = vmin.xlane.f32.xlu0 %v3757_v27  ;;  %910 = vmin.xlane.f32.xlu2 %v3759_v32 }
 0x37b   :  { %2844 = vmatmul.msk.f32.gmra.mxu2 %vm41_vm0, %v3754_v11  ;;  %v833_v61 = vpop.xlane.xlu2 %832 }
 0x37c   :  { %vm862_vm6 = vcmp.eq.f32.partialorder %v814_v12, %v833_v61 }
 0x37d   :  { %v3766_v42 = vsel %vm862_vm6, %v3259_v37, 128 }
 0x37e   :  { %v921_v30 = vshra.s32 %v3766_v42, 16 }
 0x37f   :  { %v785_v31 = vpop.f32.mrf.mxu2 }
 0x380   :  { %v3770_v57 = vsub.f32 %v3691_v0, %v785_v31  ;;  %v3772_v38 = vcvt.s32.f32 %v921_v30 }
 0x382   :  { %844 = vmin.xlane.f32.xlu2 %v3770_v57  ;;  %924 = vmin.xlane.f32.xlu1 %v3772_v38 }
 0x383   :  { %v835_v13 = vpop.xlane.xlu0 %834 }
 0x384   :  { %vm863_vm7 = vcmp.eq.f32.partialorder %v815_v15, %v835_v13 }
 0x385   :  { %v3777_v16 = vsel %vm863_vm7, %v3259_v37, 128 }
 0x386   :  { %v935_v12 = vshra.s32 %v3777_v16, 16 }
 0x387   :  { %v788_v14 = vpop.f32.mrf.mxu2 }
 0x388   :  { %v3781_v4 = vsub.f32 %v3691_v0, %v788_v14  ;;  %v3783_v18 = vcvt.s32.f32 %v935_v12 }
 0x38a   :  { %938 = vmin.xlane.f32.xlu0 %v3783_v18  ;;  %846 = vmin.xlane.f32.xlu1 %v3781_v4 }
 0x38b   :  { %v837_v28 = vpop.xlane.xlu1 %836 }
 0x38c   :  { %vm864_vm8 = vcmp.eq.f32.partialorder %v816_v50, %v837_v28 }
 0x38d   :  { %v3788_v21 = vsel %vm864_vm8, %v3259_v37, 128 }
 0x38e   :  { %v949_v15 = vshra.s32 %v3788_v21, 16 }
 0x38f   :  { %v791_v26 = vpop.f32.mrf.mxu2 }
 0x390   :  { %v3792_v10 = vsub.f32 %v3691_v0, %v791_v26  ;;  %v3794_v52 = vcvt.s32.f32 %v949_v15 }
 0x392   :  { %848 = vmin.xlane.f32.xlu0 %v3792_v10  ;;  %952 = vmin.xlane.f32.xlu2 %v3794_v52 }
 0x393   :  { %v839_v39 = vpop.xlane.xlu2 %838 }
 0x394   :  { %vm865_vm9 = vcmp.eq.f32.partialorder %v817_v25, %v839_v39 }
 0x395   :  { %v3799_v22 = vsel %vm865_vm9, %v3259_v37, 128 }
 0x396   :  { %v963_v50 = vshra.s32 %v3799_v22, 16 }
 0x397   :  { %v794_v48 = vpop.f32.mrf.mxu2 }
 0x398   :  { %v3803_v61 = vsub.f32 %v3691_v0, %v794_v48  ;;  %v3805_v30 = vcvt.s32.f32 %v963_v50 }
 0x39a   :  { %850 = vmin.xlane.f32.xlu2 %v3803_v61  ;;  %966 = vmin.xlane.f32.xlu1 %v3805_v30 }
 0x39b   :  { %v841_v31 = vpop.xlane.xlu1 %840 }
 0x39c   :  { %vm866_vm10 = vcmp.eq.f32.partialorder %v818_v63, %v841_v31  ;;  %v892_v63 = vand.u32 65535, %v3738_v36  ;;  %v906_v31 = vand.u32 65535, %v3750_v19 }
 0x39d   :  { %v3810_v13 = vsel %vm866_vm10, %v3259_v37, 128 }
 0x39e   :  { %v977_v25 = vshra.s32 %v3810_v13, 16  ;;  %v894_v50 = vcvt.s32.f32 %v892_v63  ;;  %v908_v1 = vcvt.s32.f32 %v906_v31  ;;  %v920_v63 = vand.u32 65535, %v3766_v42 }
 0x39f   :  { %v797_v12 = vpop.f32.mrf.mxu2 }
 0x3a0   :  { %v3814_v14 = vsub.f32 %v3691_v0, %v797_v12  ;;  %v3816_v28 = vcvt.s32.f32 %v977_v25 }
 0x3a2   :  { %852 = vmin.xlane.f32.xlu2 %v3814_v14  ;;  %980 = vmin.xlane.f32.xlu1 %v3816_v28 }
 0x3a7   :  { %v800_v15 = vpop.f32.mrf.mxu2 }
 0x3a8   :  { %v3821_v26 = vsub.f32 %v3691_v0, %v800_v15 }
 0x3aa   :  { %854 = vmin.xlane.f32.xlu2 %v3821_v26 }
 0x3e5   :  { %v3825_v39 = vpop.xlane.xlu0 %896 }
 0x3e6   :  { %vm898_vm11 = vcmp.eq.f32.partialorder %v3744_v24, %v3825_v39 }
 0x3e7   :  { %v899_v48 = vsel %vm898_vm11, %v894_v50, inf }
 0x3e8   :  { %900 = vmin.xlane.f32.xlu0 %v899_v48 }
 0x3ed   :  { %v843_v25 = vpop.xlane.xlu0 %842  ;;  %v3830_v12 = vpop.xlane.xlu2 %910 }
 0x3ee   :  { %vm867_vm12 = vcmp.eq.f32.partialorder %v3757_v27, %v843_v25  ;;  %vm912_vm13 = vcmp.eq.f32.partialorder %v3759_v32, %v3830_v12  ;;  %v922_v27 = vcvt.s32.f32 %v920_v63  ;;  %v917_v29 = vcvt.f32.s32 %v3830_v12 }
 0x3ef   :  { %v3836_v36 = vsel %vm867_vm12, %v3259_v37, 128  ;;  %v913_v15 = vsel %vm912_vm13, %v908_v1, inf }
 0x3f0   :  { %914 = vmin.xlane.f32.xlu0 %v913_v15  ;;  %v991_v24 = vshra.s32 %v3836_v36, 16  ;;  %v934_v15 = vand.u32 65535, %v3777_v16  ;;  %v990_v9 = vand.u32 65535, %v3836_v36  ;;  %v918_v8 = vshll.u32 %v917_v29, 16 }
 0x3f2   :  { %v3840_v50 = vcvt.s32.f32 %v991_v24 }
 0x3f4   :  { %994 = vmin.xlane.f32.xlu1 %v3840_v50 }
 0x3f5   :  { %v803_v19 = vpop.f32.mrf.mxu2  ;;  %v3843_v48 = vpop.xlane.xlu1 %924 }
 0x3f6   :  { %v3846_v31 = vsub.f32 %v3691_v0, %v803_v19  ;;  %v845_v32 = vpop.xlane.xlu2 %844  ;;  %vm926_vm14 = vcmp.eq.f32.partialorder %v3772_v38, %v3843_v48  ;;  %v936_v19 = vcvt.s32.f32 %v934_v15 }
 0x3f7   :  { %vm868_vm15 = vcmp.eq.f32.partialorder %v3770_v57, %v845_v32  ;;  %v927_v1 = vsel %vm926_vm14, %v922_v27, inf }
 0x3f8   :  { %v3852_v42 = vsel %vm868_vm15, %v3259_v37, 128  ;;  %856 = vmin.xlane.f32.xlu2 %v3846_v31  ;;  %928 = vmin.xlane.f32.xlu0 %v927_v1 }
 0x3f9   :  { %v1005_v25 = vshra.s32 %v3852_v42, 16 }
 0x3fb   :  { %v3857_v24 = vcvt.s32.f32 %v1005_v25  ;;  %v948_v25 = vand.u32 65535, %v3788_v21  ;;  %v2874_v21 = vld [vmem:[%s5681_s2 + $0xe8] sm:$0xff] }
 0x3fd   :  { %1008 = vmin.xlane.f32.xlu1 %v3857_v24  ;;  %v3860_v63 = vpop.xlane.xlu0 %938  ;;  %v847_v38 = vpop.xlane.xlu1 %846 }
 0x3fe   :  { %v806_v57 = vpop.f32.mrf.mxu2  ;;  %vm869_vm1 = vcmp.eq.f32.partialorder %v3781_v4, %v847_v38  ;;  %vm940_vm2 = vcmp.eq.f32.partialorder %v3783_v18, %v3860_v63  ;;  %v2876_v4 = vld [vmem:[%s5681_s2 + $0xf8] sm:$0xff] }
 0x3ff   :  { %v3866_v27 = vsub.f32 %v3691_v0, %v806_v57  ;;  %v3869_v32 = vsel %vm869_vm1, %v3259_v37, 128  ;;  %v941_v16 = vsel %vm940_vm2, %v936_v19, inf  ;;  %v2875_v0 = vld [vmem:[%s5681_s2 + $0xf0] sm:$0xff]  ;;  %v950_v19 = vcvt.s32.f32 %v948_v25  ;;  %1181 = vmatpush.msra.mxu3 %v2876_v4  ;;  %v2873_v25 = vld [vmem:[%s5681_s2 + $0xe0] sm:$0xff]  ;;  %v2872_v4 = vld [vmem:[%s5681_s2 + $0xd8] sm:$0xff] }
 0x400   :  { %942 = vmin.xlane.f32.xlu0 %v941_v16  ;;  %v1019_v1 = vshra.s32 %v3869_v32, 16 }
 0x401   :  { %858 = vmin.xlane.f32.xlu2 %v3866_v27  ;;  %1182 = vmatpush.msra.mxu3 %v2875_v0  ;;  %v2871_v0 = vld [vmem:[%s5681_s2 + $0xd0] sm:$0xff] }
 0x402   :  { %v3874_v15 = vcvt.s32.f32 %v1019_v1 }
 0x403   :  { %1183 = vmatpush.msra.mxu3 %v2874_v21 }
 0x405   :  { %1022 = vmin.xlane.f32.xlu1 %v3874_v15  ;;  %v849_v18 = vpop.xlane.xlu0 %848  ;;  %v3883_v38 = vpop.xlane.xlu2 %952  ;;  %1184 = vmatpush.msra.mxu3 %v2873_v25 }
 0x406   :  { %vm870_vm3 = vcmp.eq.f32.partialorder %v3792_v10, %v849_v18  ;;  %vm954_vm4 = vcmp.eq.f32.partialorder %v3794_v52, %v3883_v38  ;;  %v962_v10 = vand.u32 65535, %v3799_v22  ;;  %v2870_v22 = vld [vmem:[%s5681_s2 + $0xc8] sm:$0xff] }
 0x407   :  { %v3892_v57 = vsel %vm870_vm3, %v3259_v37, 128  ;;  %v955_v16 = vsel %vm954_vm4, %v950_v19, inf  ;;  %1185 = vmatpush.msra.mxu3 %v2872_v4  ;;  %v2868_v4 = vld [vmem:[%s5681_s2 + $0xb8] sm:$0xff] }
 0x408   :  { %956 = vmin.xlane.f32.xlu0 %v955_v16  ;;  %v1033_v1 = vshra.s32 %v3892_v57, 16  ;;  %v964_v16 = vcvt.s32.f32 %v962_v10  ;;  %v2869_v10 = vld [vmem:[%s5681_s2 + $0xc0] sm:$0xff] }
 0x409   :  { %1186 = vmatpush.msra.mxu3 %v2871_v0  ;;  %v2867_v0 = vld [vmem:[%s5681_s2 + $0xb0] sm:$0xff] }
 0x40a   :  { %v3899_v52 = vcvt.s32.f32 %v1033_v1 }
 0x40b   :  { %1187 = vmatpush.msra.mxu3 %v2870_v22 }
 0x40d   :  { %1036 = vmin.xlane.f32.xlu1 %v3899_v52  ;;  %v3908_v18 = vpop.xlane.xlu1 %966  ;;  %v851_v19 = vpop.xlane.xlu2 %850  ;;  %1188 = vmatpush.msra.mxu3 %v2869_v10 }
 0x40e   :  { %vm871_vm5 = vcmp.eq.f32.partialorder %v3803_v61, %v851_v19  ;;  %vm968_vm6 = vcmp.eq.f32.partialorder %v3805_v30, %v3908_v18  ;;  %v976_v61 = vand.u32 65535, %v3810_v13  ;;  %v2866_v13 = vld [vmem:[%s5681_s2 + $0xa8] sm:$0xff] }
 0x40f   :  { %v3917_v21 = vsel %vm871_vm5, %v3259_v37, 128  ;;  %v969_v1 = vsel %vm968_vm6, %v964_v16, inf  ;;  %1189 = vmatpush.msra.mxu3 %v2868_v4 }
 0x410   :  { %970 = vmin.xlane.f32.xlu2 %v969_v1  ;;  %v1047_v25 = vshra.s32 %v3917_v21, 16  ;;  %v978_v1 = vcvt.s32.f32 %v976_v61  ;;  %v2865_v61 = vld [vmem:[%s5681_s2 + $0xa0] sm:$0xff] }
 0x411   :  { %1190 = vmatpush.msra.mxu3 %v2867_v0 }
 0x412   :  { %v3924_v30 = vcvt.s32.f32 %v1047_v25 }
 0x413   :  { %1191 = vmatpush.msra.mxu3 %v2866_v13  ;;  %v2863_v13 = vld [vmem:[%s5681_s2 + $0x90] sm:$0xff] }
 0x414   :  { %1050 = vmin.xlane.f32.xlu0 %v3924_v30 }
 0x415   :  { %v3933_v19 = vpop.xlane.xlu1 %980  ;;  %v853_v16 = vpop.xlane.xlu2 %852  ;;  %1192 = vmatpush.msra.mxu3 %v2865_v61 }
 0x416   :  { %vm872_vm7 = vcmp.eq.f32.partialorder %v3814_v14, %v853_v16  ;;  %vm982_vm8 = vcmp.eq.f32.partialorder %v3816_v28, %v3933_v19  ;;  %v2864_v28 = vld [vmem:[%s5681_s2 + $0x98] sm:$0xff] }
 0x417   :  { %v3942_v22 = vsel %vm872_vm7, %v3259_v37, 128  ;;  %v983_v25 = vsel %vm982_vm8, %v978_v1, inf  ;;  %1193 = vmatpush.msra.mxu3 %v2864_v28 }
 0x418   :  { %984 = vmin.xlane.f32.xlu1 %v983_v25  ;;  %v1061_v10 = vshra.s32 %v3942_v22, 16  ;;  %v2862_v25 = vld [vmem:[%s5681_s2 + $0x88] sm:$0xff] }
 0x419   :  { %1194 = vmatpush.msra.mxu3 %v2863_v13 }
 0x41a   :  { %v3948_v14 = vcvt.s32.f32 %v1061_v10  ;;  %v903_v10 = vcvt.f32.s32 %v3825_v39 }
 0x41b   :  { %1195 = vmatpush.msra.mxu3 %v2862_v25 }
 0x41c   :  { %1064 = vmin.xlane.f32.xlu2 %v3948_v14  ;;  %v904_v28 = vshll.u32 %v903_v10, 16  ;;  %v992_v10 = vcvt.s32.f32 %v990_v9  ;;  %v1004_v9 = vand.u32 65535, %v3852_v42 }
 0x41d   :  { %v855_v4 = vpop.xlane.xlu2 %854 }
 0x41e   :  { %vm873_vm9 = vcmp.eq.f32.partialorder %v3821_v26, %v855_v4  ;;  %v2861_v26 = vld [vmem:[%s5681_s2 + $0x80] sm:$0xff] }
 0x41f   :  { %v3956_v0 = vsel %vm873_vm9, %v3259_v37, 128  ;;  %1196 = vmatpush.msra.mxu3 %v2861_v26 }
 0x420   :  { %v1075_v16 = vshra.s32 %v3956_v0, 16 }
 0x422   :  { %v3959_v1 = vcvt.s32.f32 %v1075_v16 }
 0x424   :  { %1078 = vmin.xlane.f32.xlu1 %v3959_v1 }
 0x45b   :  { %v901_v61 = vpop.xlane.xlu0 %900 }
 0x45c   :  { %v902_v4 = vcvt.f32.s32 %v901_v61  ;;  %v931_v61 = vcvt.f32.s32 %v3843_v48 }
 0x45e   :  { %v3972_v16 = vadd.s32 %v904_v28, %v902_v4  ;;  %v932_v28 = vshll.u32 %v931_v61, 16 }
 0x460   :  { %vm1116_vm10 = vcmp.eq.s32.totalorder %v3259_v37, %v3972_v16 }
 0x461   :  { %2877 = vmatmul.msk.f32.vlgmr.msra.gmra.mxu3 %vm1116_vm10, %v5773_v5 }
 0x463   :  { %v915_v13 = vpop.xlane.xlu0 %914 }
 0x464   :  { %v916_v25 = vcvt.f32.s32 %v915_v13 }
 0x466   :  { %v3979_v26 = vadd.s32 %v918_v8, %v916_v25 }
 0x467   :  { %v3981_v39 = vpop.xlane.xlu1 %994 }
 0x468   :  { %vm1117_vm11 = vcmp.eq.s32.totalorder %v3259_v37, %v3979_v26  ;;  %vm996_vm12 = vcmp.eq.f32.partialorder %v3840_v50, %v3981_v39  ;;  %v945_v50 = vcvt.f32.s32 %v3860_v63 }
 0x469   :  { %2878 = vmatmul.msk.f32.gmra.mxu3 %vm1117_vm11, %v5773_v5  ;;  %v997_v12 = vsel %vm996_vm12, %v992_v10, inf  ;;  %v1006_v10 = vcvt.s32.f32 %v1004_v9 }
 0x46a   :  { %998 = vmin.xlane.f32.xlu0 %v997_v12  ;;  %v946_v12 = vshll.u32 %v945_v50, 16 }
 0x46b   :  { %v929_v36 = vpop.xlane.xlu0 %928  ;;  %v857_v29 = vpop.xlane.xlu2 %856 }
 0x46c   :  { %v930_v8 = vcvt.f32.s32 %v929_v36  ;;  %vm874_vm13 = vcmp.eq.f32.partialorder %v3846_v31, %v857_v29  ;;  %v1018_v29 = vand.u32 65535, %v3869_v32 }
 0x46d   :  { %v3992_v48 = vsel %vm874_vm13, %v3259_v37, 128 }
 0x46e   :  { %v3994_v4 = vadd.s32 %v932_v28, %v930_v8  ;;  %v1089_v13 = vshra.s32 %v3992_v48, 16  ;;  %v1020_v50 = vcvt.s32.f32 %v1018_v29 }
 0x470   :  { %v3998_v25 = vpop.xlane.xlu1 %1008  ;;  %vm1118_vm14 = vcmp.eq.s32.totalorder %v3259_v37, %v3994_v4  ;;  %v4002_v61 = vcvt.s32.f32 %v1089_v13 }
 0x471   :  { %2879 = vmatmul.msk.f32.gmra.mxu3 %vm1118_vm14, %v5773_v5  ;;  %vm1010_vm15 = vcmp.eq.f32.partialorder %v3857_v24, %v3998_v25  ;;  %v959_v24 = vcvt.f32.s32 %v3883_v38 }
 0x472   :  { %v1011_v31 = vsel %vm1010_vm15, %v1006_v10, inf  ;;  %1092 = vmin.xlane.f32.xlu0 %v4002_v61 }
 0x473   :  { %1012 = vmin.xlane.f32.xlu2 %v1011_v31  ;;  %v943_v42 = vpop.xlane.xlu0 %942  ;;  %v960_v31 = vshll.u32 %v959_v24, 16 }
 0x474   :  { %v944_v63 = vcvt.f32.s32 %v943_v42  ;;  %v859_v36 = vpop.xlane.xlu2 %858  ;;  %v1032_v42 = vand.u32 65535, %v3892_v57  ;;  %v1046_v57 = vand.u32 65535, %v3917_v21 }
 0x475   :  { %vm875_vm1 = vcmp.eq.f32.partialorder %v3866_v27, %v859_v36 }
 0x476   :  { %v4011_v28 = vsel %vm875_vm1, %v3259_v37, 128  ;;  %v4013_v8 = vadd.s32 %v946_v12, %v944_v63  ;;  %v973_v63 = vcvt.f32.s32 %v3908_v18 }
 0x477   :  { %v1103_v9 = vshra.s32 %v4011_v28, 16 }
 0x478   :  { %v4017_v13 = vpop.xlane.xlu1 %1022  ;;  %vm1119_vm2 = vcmp.eq.s32.totalorder %v3259_v37, %v4013_v8  ;;  %v974_v24 = vshll.u32 %v973_v63, 16 }
 0x479   :  { %2880 = vmatmul.msk.f32.gmra.mxu3 %vm1119_vm2, %v5773_v5  ;;  %vm1024_vm3 = vcmp.eq.f32.partialorder %v3874_v15, %v4017_v13  ;;  %v4024_v27 = vcvt.s32.f32 %v1103_v9  ;;  %v1034_v15 = vcvt.s32.f32 %v1032_v42 }
 0x47a   :  { %v1025_v32 = vsel %vm1024_vm3, %v1020_v50, inf }
 0x47b   :  { %1026 = vmin.xlane.f32.xlu1 %v1025_v32  ;;  %1106 = vmin.xlane.f32.xlu2 %v4024_v27  ;;  %v957_v10 = vpop.xlane.xlu0 %956 }
 0x47c   :  { %v958_v38 = vcvt.f32.s32 %v957_v10  ;;  %v1048_v10 = vcvt.s32.f32 %v1046_v57 }
 0x47e   :  { %v4028_v12 = vadd.s32 %v960_v31, %v958_v38  ;;  %v987_v31 = vcvt.f32.s32 %v3933_v19  ;;  %v1060_v38 = vand.u32 65535, %v3942_v22 }
 0x480   :  { %v4031_v36 = vpop.xlane.xlu1 %1036  ;;  %vm1120_vm4 = vcmp.eq.s32.totalorder %v3259_v37, %v4028_v12  ;;  %v988_v42 = vshll.u32 %v987_v31, 16  ;;  %v1062_v19 = vcvt.s32.f32 %v1060_v38 }
 0x481   :  { %2881 = vmatmul.msk.f32.gmra.mxu3 %vm1120_vm4, %v5773_v5  ;;  %vm1038_vm5 = vcmp.eq.f32.partialorder %v3899_v52, %v4031_v36 }
 0x482   :  { %v1039_v29 = vsel %vm1038_vm5, %v1034_v15, inf }
 0x483   :  { %1040 = vmin.xlane.f32.xlu0 %v1039_v29  ;;  %v971_v9 = vpop.xlane.xlu2 %970 }
 0x484   :  { %v972_v50 = vcvt.f32.s32 %v971_v9  ;;  %v1074_v9 = vand.u32 65535, %v3956_v0  ;;  %v2894_v0 = vld [vmem:[%s5678_s1 + $0x48] sm:$0xff] }
 0x486   :  { %v4039_v32 = vadd.s32 %v974_v24, %v972_v50  ;;  %v1076_v57 = vcvt.s32.f32 %v1074_v9  ;;  %v2896_v50 = vld [vmem:[%s5678_s1 + $0x58] sm:$0xff] }
 0x487   :  { %v4041_v18 = vpop.xlane.xlu0 %1050  ;;  %1409 = vmatpush.msra.mxu0 %v2896_v50 }
 0x488   :  { %vm1121_vm6 = vcmp.eq.s32.totalorder %v3259_v37, %v4039_v32  ;;  %vm1052_vm7 = vcmp.eq.f32.partialorder %v3924_v30, %v4041_v18 }
 0x489   :  { %2882 = vmatmul.msk.f32.gmra.mxu3 %vm1121_vm6, %v5773_v5  ;;  %v1053_v52 = vsel %vm1052_vm7, %v1048_v10, inf  ;;  %v1001_v10 = vcvt.f32.s32 %v3981_v39 }
 0x48a   :  { %1054 = vmin.xlane.f32.xlu1 %v1053_v52 }
 0x48b   :  { %v985_v21 = vpop.xlane.xlu1 %984  ;;  %v1002_v52 = vshll.u32 %v1001_v10, 16 }
 0x48c   :  { %v986_v63 = vcvt.f32.s32 %v985_v21 }
 0x48e   :  { %v4050_v15 = vadd.s32 %v988_v42, %v986_v63  ;;  %v1088_v42 = vand.u32 65535, %v3992_v48  ;;  %v1015_v63 = vcvt.f32.s32 %v3998_v25 }
 0x48f   :  { %v4052_v29 = vpop.xlane.xlu2 %1064 }
 0x490   :  { %vm1122_vm8 = vcmp.eq.s32.totalorder %v3259_v37, %v4050_v15  ;;  %vm1066_vm9 = vcmp.eq.f32.partialorder %v3948_v14, %v4052_v29  ;;  %v2895_v14 = vld [vmem:[%s5678_s1 + $0x50] sm:$0xff]  ;;  %v1090_v39 = vcvt.s32.f32 %v1088_v42 }
 0x491   :  { %2883 = vmatmul.msk.f32.gmra.mxu3 %vm1122_vm8, %v5773_v5  ;;  %v1067_v30 = vsel %vm1066_vm9, %v1062_v19, inf  ;;  %1410 = vmatpush.msra.mxu0 %v2895_v14  ;;  %v1102_v14 = vand.u32 65535, %v4011_v28 }
 0x492   :  { %1068 = vmin.xlane.f32.xlu2 %v1067_v30 }
 0x493   :  { %1411 = vmatpush.msra.mxu0 %v2894_v0  ;;  %v1029_v0 = vcvt.f32.s32 %v4017_v13 }
 0x497   :  { %v4060_v22 = vpop.xlane.xlu1 %1078 }
 0x498   :  { %vm1080_vm10 = vcmp.eq.f32.partialorder %v3959_v1, %v4060_v22  ;;  %v2893_v1 = vld [vmem:[%s5678_s1 + $0x40] sm:$0xff] }
 0x499   :  { %v1081_v24 = vsel %vm1080_vm10, %v1076_v57, inf  ;;  %1412 = vmatpush.msra.mxu0 %v2893_v1 }
 0x49a   :  { %1082 = vmin.xlane.f32.xlu0 %v1081_v24  ;;  %v1016_v24 = vshll.u32 %v1015_v63, 16  ;;  %v1043_v63 = vcvt.f32.s32 %v4031_v36 }
 0x4dd   :  { %v999_v31 = vpop.xlane.xlu0 %998 }
 0x4de   :  { %v1000_v21 = vcvt.f32.s32 %v999_v31 }
 0x4e0   :  { %v4077_v38 = vadd.s32 %v1002_v52, %v1000_v21  ;;  %v1104_v52 = vcvt.s32.f32 %v1102_v14  ;;  %v1030_v21 = vshll.u32 %v1029_v0, 16 }
 0x4e2   :  { %vm1123_vm11 = vcmp.eq.s32.totalorder %v3259_v37, %v4077_v38 }
 0x4e3   :  { %2884 = vmatmul.msk.f32.gmra.mxu3 %vm1123_vm11, %v5773_v5 }
 0x4e4   :  { %v1198_v19 = vpop.f32.mrf.mxu3 }
 0x4e5   :  { %v4085_v30 = vsub.f32 %v3593_v41, %v1198_v19  ;;  %v4087_v9 = vpop.xlane.xlu0 %1092 }
 0x4e6   :  { %v1013_v57 = vpop.xlane.xlu2 %1012  ;;  %vm1094_vm12 = vcmp.eq.f32.partialorder %v4002_v61, %v4087_v9 }
 0x4e7   :  { %v1014_v48 = vcvt.f32.s32 %v1013_v57  ;;  %2898 = vmatmul.msk.f32.vlgmr.msra.gmra.mxu0 %vm41_vm0, %v4085_v30  ;;  %v1095_v50 = vsel %vm1094_vm12, %v1090_v39, inf }
 0x4e8   :  { %1096 = vmin.xlane.f32.xlu1 %v1095_v50  ;;  %v1057_v50 = vcvt.f32.s32 %v4041_v18 }
 0x4e9   :  { %v4093_v25 = vadd.s32 %v1016_v24, %v1014_v48  ;;  %v1044_v24 = vshll.u32 %v1043_v63, 16 }
 0x4eb   :  { %vm1124_vm13 = vcmp.eq.s32.totalorder %v3259_v37, %v4093_v25 }
 0x4ec   :  { %2885 = vmatmul.msk.f32.gmra.mxu3 %vm1124_vm13, %v5773_v5  ;;  %v1201_v1 = vpop.f32.mrf.mxu3 }
 0x4ed   :  { %v4101_v61 = vsub.f32 %v3609_v46, %v1201_v1  ;;  %v1058_v1 = vshll.u32 %v1057_v50, 16 }
 0x4ee   :  { %v1027_v10 = vpop.xlane.xlu1 %1026  ;;  %v4103_v31 = vpop.xlane.xlu2 %1106 }
 0x4ef   :  { %v1028_v42 = vcvt.f32.s32 %v1027_v10  ;;  %2899 = vmatmul.msk.f32.gmra.mxu0 %vm41_vm0, %v4101_v61  ;;  %vm1108_vm14 = vcmp.eq.f32.partialorder %v4024_v27, %v4103_v31 }
 0x4f0   :  { %v1109_v28 = vsel %vm1108_vm14, %v1104_v52, inf }
 0x4f1   :  { %1110 = vmin.xlane.f32.xlu2 %v1109_v28  ;;  %v4109_v13 = vadd.s32 %v1030_v21, %v1028_v42  ;;  %v1071_v21 = vcvt.f32.s32 %v4052_v29 }
 0x4f3   :  { %vm1125_vm15 = vcmp.eq.s32.totalorder %v3259_v37, %v4109_v13  ;;  %v1072_v63 = vshll.u32 %v1071_v21, 16  ;;  %v1099_v21 = vcvt.f32.s32 %v4087_v9 }
 0x4f4   :  { %2886 = vmatmul.msk.f32.gmra.mxu3 %vm1125_vm15, %v5773_v5  ;;  %v1204_v19 = vpop.f32.mrf.mxu3 }
 0x4f5   :  { %v4116_v39 = vsub.f32 %v3625_v59, %v1204_v19 }
 0x4f6   :  { %v1041_v57 = vpop.xlane.xlu0 %1040 }
 0x4f7   :  { %v1042_v48 = vcvt.f32.s32 %v1041_v57  ;;  %2900 = vmatmul.msk.f32.gmra.mxu0 %vm41_vm0, %v4116_v39 }
 0x4f9   :  { %v4120_v27 = vadd.s32 %v1044_v24, %v1042_v48  ;;  %v1085_v24 = vcvt.f32.s32 %v4060_v22 }
 0x4fb   :  { %vm1126_vm1 = vcmp.eq.s32.totalorder %v3259_v37, %v4120_v27 }
 0x4fc   :  { %2887 = vmatmul.msk.f32.gmra.mxu3 %vm1126_vm1, %v5773_v5  ;;  %v1207_v36 = vpop.f32.mrf.mxu3 }
 0x4fd   :  { %v4127_v14 = vsub.f32 %v3636_v6, %v1207_v36  ;;  %v1055_v0 = vpop.xlane.xlu1 %1054  ;;  %v1086_v36 = vshll.u32 %v1085_v24, 16  ;;  %v1113_v24 = vcvt.f32.s32 %v4103_v31 }
 0x4fe   :  { %v1056_v10 = vcvt.f32.s32 %v1055_v0 }
 0x4ff   :  { %2901 = vmatmul.msk.f32.gmra.mxu0 %vm41_vm0, %v4127_v14  ;;  %v1114_v9 = vshll.u32 %v1113_v24, 16 }
 0x500   :  { %v4131_v52 = vadd.s32 %v1058_v1, %v1056_v10 }
 0x502   :  { %vm1127_vm2 = vcmp.eq.s32.totalorder %v3259_v37, %v4131_v52 }
 0x504   :  { %2888 = vmatmul.msk.f32.gmra.mxu3 %vm1127_vm2, %v5773_v5  ;;  %v1210_v18 = vpop.f32.mrf.mxu3 }
 0x505   :  { %v4138_v42 = vsub.f32 %v3647_v3, %v1210_v18  ;;  %v1069_v28 = vpop.xlane.xlu2 %1068 }
 0x506   :  { %v1070_v19 = vcvt.f32.s32 %v1069_v28  ;;  %v1100_v28 = vshll.u32 %v1099_v21, 16 }
 0x507   :  { %2902 = vmatmul.msk.f32.gmra.mxu0 %vm41_vm0, %v4138_v42 }
 0x508   :  { %v4142_v57 = vadd.s32 %v1072_v63, %v1070_v19 }
 0x50a   :  { %5774 = vst [vmem:[#allocation22_spill] sm:$0xff] %v4142_v57  ;;  %vm1128_vm3 = vcmp.eq.s32.totalorder %v3259_v37, %v4142_v57 }
 0x50c   :  { %2889 = vmatmul.msk.f32.gmra.mxu3 %vm1128_vm3, %v5773_v5  ;;  %v1213_v29 = vpop.f32.mrf.mxu3 }
 0x50d   :  { %v4149_v48 = vsub.f32 %v3658_v47, %v1213_v29  ;;  %v1083_v50 = vpop.xlane.xlu0 %1082  ;;  %v4173_v29 = vld [vmem:[%s5680_s3 + $0x2] ss:$0 sm:$0xff] }
 0x50e   :  { %v1084_v0 = vcvt.f32.s32 %v1083_v50 }
 0x50f   :  { %5775 = vst [vmem:[#allocation23_spill] sm:$0xff] %v4149_v48  ;;  %2903 = vmatmul.msk.f32.gmra.mxu0 %vm41_vm0, %v4149_v48 }
 0x510   :  { %v4153_v1 = vadd.s32 %v1086_v36, %v1084_v0 }
 0x512   :  { %5776 = vst [vmem:[#allocation24_spill] sm:$0xff] %v4153_v1  ;;  %vm1129_vm4 = vcmp.eq.s32.totalorder %v3259_v37, %v4153_v1 }
 0x514   :  { %2890 = vmatmul.msk.f32.gmra.mxu3 %vm1129_vm4, %v5773_v5  ;;  %v1216_v22 = vpop.f32.mrf.mxu3 }
 0x515   :  { %v4159_v10 = vsub.f32 %v3669_v20, %v1216_v22 }
 0x517   :  { %5777 = vst [vmem:[#allocation25_spill] sm:$0xff] %v4159_v10  ;;  %2904 = vmatmul.msk.f32.gmra.mxu0 %vm41_vm0, %v4159_v10 }
 0x55b   :  { %v1097_v18 = vpop.xlane.xlu1 %1096 }
 0x55c   :  { %v1098_v63 = vcvt.f32.s32 %v1097_v18 }
 0x55e   :  { %v4164_v19 = vadd.s32 %v1100_v28, %v1098_v63 }
 0x560   :  { %5778 = vst [vmem:[#allocation26_spill] sm:$0xff] %v4164_v19  ;;  %vm1130_vm5 = vcmp.eq.s32.totalorder %v3259_v37, %v4164_v19 }
 0x561   :  { %2891 = vmatmul.msk.f32.gmra.mxu3 %vm1130_vm5, %v5773_v5 }
 0x564   :  { %v1111_v50 = vpop.xlane.xlu2 %1110  ;;  %v1414_v36 = vpop.f32.mrf.mxu0 }
 0x565   :  { %v1112_v0 = vcvt.f32.s32 %v1111_v50  ;;  %v1465_v22 = vsub.f32 %v4173_v29, %v1414_v36 }
 0x566   :  { %v1219_v21 = vpop.f32.mrf.mxu3 }
 0x567   :  { %v4177_v18 = vsub.f32 %v3685_v40, %v1219_v21  ;;  %1481 = vmin.xlane.f32.xlu0 %v1465_v22  ;;  %v4179_v28 = vadd.s32 %v1114_v9, %v1112_v0 }
 0x569   :  { %5779 = vst [vmem:[#allocation27_spill] sm:$0xff] %v4177_v18  ;;  %vm1131_vm6 = vcmp.eq.s32.totalorder %v3259_v37, %v4179_v28  ;;  %2905 = vmatmul.msk.f32.gmra.mxu0 %vm41_vm0, %v4177_v18 }
 0x56a   :  { %5780 = vst [vmem:[#allocation28_spill] sm:$0xff] %v4179_v28  ;;  %2892 = vmatmul.msk.f32.gmra.mxu3 %vm1131_vm6, %v5773_v5 }
 0x56c   :  { %v1417_v31 = vpop.f32.mrf.mxu0 }
 0x56d   :  { %v1466_v63 = vsub.f32 %v4173_v29, %v1417_v31 }
 0x56f   :  { %v1222_v24 = vpop.f32.mrf.mxu3  ;;  %1483 = vmin.xlane.f32.xlu1 %v1466_v63 }
 0x570   :  { %v4188_v50 = vsub.f32 %v3701_v58, %v1222_v24 }
 0x572   :  { %5781 = vst [vmem:[#allocation29_spill] sm:$0xff] %v4188_v50  ;;  %2906 = vmatmul.msk.f32.gmra.mxu0 %vm41_vm0, %v4188_v50 }
 0x574   :  { %v1420_v36 = vpop.f32.mrf.mxu0 }
 0x575   :  { %v1467_v9 = vsub.f32 %v4173_v29, %v1420_v36 }
 0x577   :  { %v1225_v0 = vpop.f32.mrf.mxu3  ;;  %1485 = vmin.xlane.f32.xlu2 %v1467_v9 }
 0x578   :  { %v4194_v21 = vsub.f32 %v3708_v56, %v1225_v0 }
 0x57a   :  { %5782 = vst [vmem:[#allocation30_spill] sm:$0xff] %v4194_v21  ;;  %2907 = vmatmul.msk.f32.gmra.mxu0 %vm41_vm0, %v4194_v21 }
 0x57c   :  { %v1423_v31 = vpop.f32.mrf.mxu0 }
 0x57d   :  { %v1468_v40 = vsub.f32 %v4173_v29, %v1423_v31 }
 0x57f   :  { %v1228_v47 = vpop.f32.mrf.mxu3  ;;  %1487 = vmin.xlane.f32.xlu0 %v1468_v40 }
 0x580   :  { %v4200_v24 = vsub.f32 %v3714_v44, %v1228_v47 }
 0x582   :  { %5783 = vst [vmem:[#allocation31_spill] sm:$0xff] %v4200_v24  ;;  %2908 = vmatmul.msk.f32.gmra.mxu0 %vm41_vm0, %v4200_v24 }
 0x584   :  { %v1426_v36 = vpop.f32.mrf.mxu0 }
 0x585   :  { %v1469_v58 = vsub.f32 %v4173_v29, %v1426_v36 }
 0x587   :  { %v1231_v3 = vpop.f32.mrf.mxu3  ;;  %1489 = vmin.xlane.f32.xlu1 %v1469_v58 }
 0x588   :  { %v4206_v0 = vsub.f32 %v3720_v34, %v1231_v3 }
 0x58a   :  { %5784 = vst [vmem:[#allocation32_spill] sm:$0xff] %v4206_v0  ;;  %2909 = vmatmul.msk.f32.gmra.mxu0 %vm41_vm0, %v4206_v0 }
 0x58c   :  { %v1429_v31 = vpop.f32.mrf.mxu0 }
 0x58d   :  { %v4211_v56 = vsub.f32 %v4173_v29, %v1429_v31 }
 0x58f   :  { %v1234_v47 = vpop.f32.mrf.mxu3  ;;  %1491 = vmin.xlane.f32.xlu2 %v4211_v56 }
 0x590   :  { %v4215_v44 = vsub.f32 %v3726_v49, %v1234_v47 }
 0x592   :  { %5785 = vst [vmem:[#allocation33_spill] sm:$0xff] %v4215_v44  ;;  %2910 = vmatmul.msk.f32.gmra.mxu0 %vm41_vm0, %v4215_v44 }
 0x594   :  { %v1432_v36 = vpop.f32.mrf.mxu0 }
 0x595   :  { %v4220_v3 = vsub.f32 %v4173_v29, %v1432_v36 }
 0x597   :  { %v1237_v34 = vpop.f32.mrf.mxu3  ;;  %1493 = vmin.xlane.f32.xlu1 %v4220_v3 }
 0x598   :  { %v4224_v20 = vsub.f32 %v3732_v23, %v1237_v34 }
 0x59a   :  { %5786 = vst [vmem:[#allocation34_spill] sm:$0xff] %v4224_v20  ;;  %2911 = vmatmul.msk.f32.gmra.mxu0 %vm41_vm0, %v4224_v20 }
 0x5da   :  { %v1482_v31 = vpop.xlane.xlu0 %1481 }
 0x5db   :  { %vm1513_vm7 = vcmp.eq.f32.partialorder %v1465_v22, %v1482_v31 }
 0x5dc   :  { %v4229_v47 = vsel %vm1513_vm7, %v3259_v37, 128 }
 0x5dd   :  { %v1546_v49 = vshra.s32 %v4229_v47, 16 }
 0x5df   :  { %v4232_v59 = vcvt.s32.f32 %v1546_v49 }
 0x5e1   :  { %1549 = vmin.xlane.f32.xlu0 %v4232_v59 }
 0x5e2   :  { %v1484_v36 = vpop.xlane.xlu1 %1483 }
 0x5e3   :  { %vm1514_vm8 = vcmp.eq.f32.partialorder %v1466_v63, %v1484_v36 }
 0x5e4   :  { %v4236_v46 = vsel %vm1514_vm8, %v3259_v37, 128  ;;  %v1240_v34 = vpop.f32.mrf.mxu3 }
 0x5e5   :  { %v4239_v23 = vsub.f32 %v3742_v60, %v1240_v34  ;;  %v1560_v22 = vshra.s32 %v4236_v46, 16 }
 0x5e6   :  { %v1435_v31 = vpop.f32.mrf.mxu0 }
 0x5e7   :  { %5787 = vst [vmem:[#allocation35_spill] sm:$0xff] %v4239_v23  ;;  %v4243_v6 = vsub.f32 %v4173_v29, %v1435_v31  ;;  %2912 = vmatmul.msk.f32.gmra.mxu0 %vm41_vm0, %v4239_v23  ;;  %v4247_v49 = vcvt.s32.f32 %v1560_v22 }
 0x5e9   :  { %1495 = vmin.xlane.f32.xlu0 %v4243_v6  ;;  %1563 = vmin.xlane.f32.xlu2 %v4247_v49 }
 0x5ea   :  { %v1486_v63 = vpop.xlane.xlu2 %1485 }
 0x5eb   :  { %vm1515_vm9 = vcmp.eq.f32.partialorder %v1467_v9, %v1486_v63 }
 0x5ec   :  { %v4252_v36 = vsel %vm1515_vm9, %v3259_v37, 128 }
 0x5ed   :  { %v1243_v34 = vpop.f32.mrf.mxu3  ;;  %v1574_v60 = vshra.s32 %v4252_v36, 16 }
 0x5ee   :  { %v4256_v31 = vsub.f32 %v3754_v11, %v1243_v34 }
 0x5ef   :  { %v1438_v41 = vpop.f32.mrf.mxu0  ;;  %v4258_v20 = vcvt.s32.f32 %v1574_v60 }
 0x5f0   :  { %5788 = vst [vmem:[#allocation36_spill] sm:$0xff] %v4256_v31  ;;  %v4261_v22 = vsub.f32 %v4173_v29, %v1438_v41  ;;  %2913 = vmatmul.msk.f32.gmra.mxu0 %vm41_vm0, %v4256_v31 }
 0x5f1   :  { %1577 = vmin.xlane.f32.xlu1 %v4258_v20 }
 0x5f2   :  { %1497 = vmin.xlane.f32.xlu2 %v4261_v22  ;;  %v1488_v9 = vpop.xlane.xlu0 %1487 }
 0x5f3   :  { %vm1516_vm10 = vcmp.eq.f32.partialorder %v1468_v40, %v1488_v9  ;;  %v2945_v40 = vld [vmem:[%s5681_s2 + $0x178] sm:$0xff] }
 0x5f4   :  { %v4268_v63 = vsel %vm1516_vm10, %v3259_v37, 128  ;;  %1834 = vmatpush.msrb.mxu2 %v2945_v40 }
 0x5f5   :  { %v1588_v34 = vshra.s32 %v4268_v63, 16 }
 0x5f7   :  { %v1441_v11 = vpop.f32.mrf.mxu0  ;;  %v4271_v60 = vcvt.s32.f32 %v1588_v34 }
 0x5f8   :  { %v4274_v41 = vsub.f32 %v4173_v29, %v1441_v11 }
 0x5f9   :  { %1591 = vmin.xlane.f32.xlu0 %v4271_v60 }
 0x5fa   :  { %1499 = vmin.xlane.f32.xlu1 %v4274_v41  ;;  %v1490_v31 = vpop.xlane.xlu1 %1489 }
 0x5fb   :  { %vm1517_vm11 = vcmp.eq.f32.partialorder %v1469_v58, %v1490_v31 }
 0x5fc   :  { %v4282_v9 = vsel %vm1517_vm11, %v3259_v37, 128 }
 0x5fd   :  { %v1602_v34 = vshra.s32 %v4282_v9, 16 }
 0x5ff   :  { %v1444_v23 = vpop.f32.mrf.mxu0  ;;  %v4285_v44 = vcvt.s32.f32 %v1602_v34 }
 0x600   :  { %v4288_v11 = vsub.f32 %v4173_v29, %v1444_v23 }
 0x601   :  { %1605 = vmin.xlane.f32.xlu2 %v4285_v44 }
 0x602   :  { %1501 = vmin.xlane.f32.xlu0 %v4288_v11  ;;  %v1492_v0 = vpop.xlane.xlu2 %1491 }
 0x603   :  { %vm1518_vm12 = vcmp.eq.f32.partialorder %v4211_v56, %v1492_v0 }
 0x604   :  { %v4294_v58 = vsel %vm1518_vm12, %v3259_v37, 128 }
 0x605   :  { %v1616_v31 = vshra.s32 %v4294_v58, 16 }
 0x607   :  { %v1447_v40 = vpop.f32.mrf.mxu0  ;;  %v4297_v24 = vcvt.s32.f32 %v1616_v31 }
 0x608   :  { %v4300_v34 = vsub.f32 %v4173_v29, %v1447_v40 }
 0x609   :  { %1619 = vmin.xlane.f32.xlu1 %v4297_v24 }
 0x60a   :  { %1503 = vmin.xlane.f32.xlu2 %v4300_v34  ;;  %v1494_v23 = vpop.xlane.xlu1 %1493 }
 0x60b   :  { %vm1519_vm13 = vcmp.eq.f32.partialorder %v4220_v3, %v1494_v23  ;;  %v2944_v3 = vld [vmem:[%s5681_s2 + $0x170] sm:$0xff]  ;;  %v2942_v23 = vld [vmem:[%s5681_s2 + $0x160] sm:$0xff] }
 0x60c   :  { %v4306_v56 = vsel %vm1519_vm13, %v3259_v37, 128  ;;  %1835 = vmatpush.msrb.mxu2 %v2944_v3  ;;  %vm2648_vm13 = vcmask 7168  }
 0x60d   :  { %v1630_v0 = vshra.s32 %v4306_v56, 16 }
 0x60f   :  { %v1450_v21 = vpop.f32.mrf.mxu0  ;;  %v4309_v50 = vcvt.s32.f32 %v1630_v0  ;;  %v1545_v0 = vand.u32 65535, %v4229_v47 }
 0x610   :  { %v4312_v31 = vsub.f32 %v4173_v29, %v1450_v21  ;;  %v2943_v21 = vld [vmem:[%s5681_s2 + $0x168] sm:$0xff] }
 0x611   :  { %1633 = vmin.xlane.f32.xlu1 %v4309_v50  ;;  %1836 = vmatpush.msrb.mxu2 %v2943_v21  ;;  %v1547_v3 = vcvt.s32.f32 %v1545_v0  ;;  %v1559_v21 = vand.u32 65535, %v4236_v46  ;;  %v1573_v0 = vand.u32 65535, %v4252_v36 }
 0x612   :  { %1505 = vmin.xlane.f32.xlu2 %v4312_v31 }
 0x613   :  { %1837 = vmatpush.msrb.mxu2 %v2942_v23  ;;  %v2940_v23 = vld [vmem:[%s5681_s2 + $0x150] sm:$0xff]  ;;  %v1561_v1 = vcvt.s32.f32 %v1559_v21  ;;  %v1575_v21 = vcvt.s32.f32 %v1573_v0  ;;  %v2938_v0 = vld [vmem:[%s5681_s2 + $0x140] sm:$0xff] }
 0x617   :  { %v1453_v40 = vpop.f32.mrf.mxu0 }
 0x618   :  { %v4317_v28 = vsub.f32 %v4173_v29, %v1453_v40  ;;  %v2941_v40 = vld [vmem:[%s5681_s2 + $0x158] sm:$0xff] }
 0x619   :  { %1838 = vmatpush.msrb.mxu2 %v2941_v40  ;;  %v2939_v40 = vld [vmem:[%s5681_s2 + $0x148] sm:$0xff] }
 0x61a   :  { %1507 = vmin.xlane.f32.xlu2 %v4317_v28 }
 0x61b   :  { %1839 = vmatpush.msrb.mxu2 %v2940_v23 }
 0x61d   :  { %1840 = vmatpush.msrb.mxu2 %v2939_v40 }
 0x61f   :  { %1841 = vmatpush.msrb.mxu2 %v2938_v0 }
 0x654   :  { %v4333_v18 = vpop.xlane.xlu0 %1549 }
 0x655   :  { %vm1551_vm14 = vcmp.eq.f32.partialorder %v4232_v59, %v4333_v18 }
 0x656   :  { %v1552_v19 = vsel %vm1551_vm14, %v1547_v3, inf  ;;  %vm2665_vm14 = vcmask 15360  }
 0x657   :  { %1553 = vmin.xlane.f32.xlu0 %v1552_v19 }
 0x65c   :  { %v1496_v47 = vpop.xlane.xlu0 %1495  ;;  %v4341_v10 = vpop.xlane.xlu2 %1563 }
 0x65d   :  { %vm1520_vm15 = vcmp.eq.f32.partialorder %v4243_v6, %v1496_v47  ;;  %vm1565_vm1 = vcmp.eq.f32.partialorder %v4247_v49, %v4341_v10 }
 0x65e   :  { %v4347_v59 = vsel %vm1520_vm15, %v3259_v37, 128  ;;  %v1566_v19 = vsel %vm1565_vm1, %v1561_v1, inf }
 0x65f   :  { %1567 = vmin.xlane.f32.xlu0 %v1566_v19  ;;  %v1644_v46 = vshra.s32 %v4347_v59, 16 }
 0x661   :  { %v4354_v3 = vcvt.s32.f32 %v1644_v46  ;;  %v1587_v46 = vand.u32 65535, %v4268_v63 }
 0x663   :  { %1647 = vmin.xlane.f32.xlu1 %v4354_v3 }
 0x664   :  { %v1456_v6 = vpop.f32.mrf.mxu0  ;;  %v4357_v49 = vpop.xlane.xlu1 %1577 }
 0x665   :  { %v4360_v1 = vsub.f32 %v4173_v29, %v1456_v6  ;;  %v1498_v23 = vpop.xlane.xlu2 %1497  ;;  %vm1579_vm2 = vcmp.eq.f32.partialorder %v4258_v20, %v4357_v49 }
 0x666   :  { %vm1521_vm3 = vcmp.eq.f32.partialorder %v4261_v22, %v1498_v23  ;;  %v1580_v36 = vsel %vm1579_vm2, %v1575_v21, inf  ;;  %v1589_v22 = vcvt.s32.f32 %v1587_v46  ;;  %v1601_v46 = vand.u32 65535, %v4282_v9  ;;  %v2935_v9 = vld [vmem:[%s5681_s2 + $0x128] sm:$0xff] }
 0x667   :  { %v4366_v47 = vsel %vm1521_vm3, %v3259_v37, 128  ;;  %1509 = vmin.xlane.f32.xlu2 %v4360_v1  ;;  %1581 = vmin.xlane.f32.xlu0 %v1580_v36 }
 0x668   :  { %v1658_v19 = vshra.s32 %v4366_v47, 16  ;;  %v1603_v0 = vcvt.s32.f32 %v1601_v46 }
 0x66a   :  { %v4374_v40 = vcvt.s32.f32 %v1658_v19 }
 0x66c   :  { %1661 = vmin.xlane.f32.xlu1 %v4374_v40  ;;  %v4377_v20 = vpop.xlane.xlu0 %1591 }
 0x66d   :  { %v1459_v6 = vpop.f32.mrf.mxu0  ;;  %v1500_v21 = vpop.xlane.xlu1 %1499  ;;  %vm1593_vm4 = vcmp.eq.f32.partialorder %v4271_v60, %v4377_v20  ;;  %v2937_v60 = vld [vmem:[%s5681_s2 + $0x138] sm:$0xff] }
 0x66e   :  { %v4382_v23 = vsub.f32 %v4173_v29, %v1459_v6  ;;  %vm1522_vm5 = vcmp.eq.f32.partialorder %v4274_v41, %v1500_v21  ;;  %v1594_v63 = vsel %vm1593_vm4, %v1589_v22, inf  ;;  %1842 = vmatpush.msrb.mxu2 %v2937_v60  ;;  %v2936_v22 = vld [vmem:[%s5681_s2 + $0x130] sm:$0xff]  ;;  %v1615_v60 = vand.u32 65535, %v4294_v58  ;;  %v2931_v58 = vld [vmem:[%s5681_s2 + $0x108] sm:$0xff] }
 0x66f   :  { %v4386_v36 = vsel %vm1522_vm5, %v3259_v37, 128  ;;  %1595 = vmin.xlane.f32.xlu0 %v1594_v63  ;;  %v2934_v63 = vld [vmem:[%s5681_s2 + $0x120] sm:$0xff] }
 0x670   :  { %1511 = vmin.xlane.f32.xlu2 %v4382_v23  ;;  %v1672_v19 = vshra.s32 %v4386_v36, 16  ;;  %1843 = vmatpush.msrb.mxu2 %v2936_v22 }
 0x672   :  { %v4394_v29 = vcvt.s32.f32 %v1672_v19  ;;  %1844 = vmatpush.msrb.mxu2 %v2935_v9  ;;  %v1617_v9 = vcvt.s32.f32 %v1615_v60 }
 0x674   :  { %1675 = vmin.xlane.f32.xlu1 %v4394_v29  ;;  %v4397_v41 = vpop.xlane.xlu2 %1605  ;;  %1845 = vmatpush.msrb.mxu2 %v2934_v63  ;;  %v2930_v63 = vld [vmem:[%s5681_s2 + $0x100] sm:$0xff] }
 0x675   :  { %v1502_v6 = vpop.xlane.xlu0 %1501  ;;  %vm1607_vm6 = vcmp.eq.f32.partialorder %v4285_v44, %v4397_v41  ;;  %v2933_v44 = vld [vmem:[%s5681_s2 + $0x118] sm:$0xff] }
 0x676   :  { %vm1523_vm7 = vcmp.eq.f32.partialorder %v4288_v11, %v1502_v6  ;;  %v1608_v21 = vsel %vm1607_vm6, %v1603_v0, inf  ;;  %v2932_v0 = vld [vmem:[%s5681_s2 + $0x110] sm:$0xff]  ;;  %1846 = vmatpush.msrb.mxu2 %v2933_v44  ;;  %v1629_v44 = vand.u32 65535, %v4306_v56 }
 0x677   :  { %v4412_v19 = vsel %vm1523_vm7, %v3259_v37, 128  ;;  %1609 = vmin.xlane.f32.xlu0 %v1608_v21 }
 0x678   :  { %v1686_v46 = vshra.s32 %v4412_v19, 16  ;;  %1847 = vmatpush.msrb.mxu2 %v2932_v0 }
 0x67a   :  { %v4419_v11 = vcvt.s32.f32 %v1686_v46  ;;  %1848 = vmatpush.msrb.mxu2 %v2931_v58 }
 0x67c   :  { %1689 = vmin.xlane.f32.xlu1 %v4419_v11  ;;  %v4425_v22 = vpop.xlane.xlu1 %1619  ;;  %1849 = vmatpush.msrb.mxu2 %v2930_v63 }
 0x67d   :  { %v1504_v6 = vpop.xlane.xlu2 %1503  ;;  %vm1621_vm8 = vcmp.eq.f32.partialorder %v4297_v24, %v4425_v22 }
 0x67e   :  { %vm1524_vm9 = vcmp.eq.f32.partialorder %v4300_v34, %v1504_v6  ;;  %v1622_v21 = vsel %vm1621_vm8, %v1617_v9, inf  ;;  %v1631_v34 = vcvt.s32.f32 %v1629_v44  ;;  %v1556_v44 = vcvt.f32.s32 %v4333_v18 }
 0x67f   :  { %v4437_v46 = vsel %vm1524_vm9, %v3259_v37, 128  ;;  %1623 = vmin.xlane.f32.xlu2 %v1622_v21 }
 0x680   :  { %v1700_v60 = vshra.s32 %v4437_v46, 16 }
 0x682   :  { %v4441_v48 = vcvt.s32.f32 %v1700_v60  ;;  %v2965_v60 = vld [vmem:[%s5678_s1 + $0x78] sm:$0xff] }
 0x683   :  { %2062 = vmatpush.msrb.mxu1 %v2965_v60  ;;  %v1643_v60 = vand.u32 65535, %v4347_v59 }
 0x684   :  { %1703 = vmin.xlane.f32.xlu0 %v4441_v48  ;;  %v4444_v24 = vpop.xlane.xlu1 %1633 }
 0x685   :  { %v1506_v0 = vpop.xlane.xlu2 %1505  ;;  %vm1635_vm10 = vcmp.eq.f32.partialorder %v4309_v50, %v4444_v24 }
 0x686   :  { %vm1525_vm11 = vcmp.eq.f32.partialorder %v4312_v31, %v1506_v0  ;;  %v1636_v9 = vsel %vm1635_vm10, %v1631_v34, inf  ;;  %v1557_v0 = vshll.u32 %v1556_v44, 16 }
 0x687   :  { %v4450_v58 = vsel %vm1525_vm11, %v3259_v37, 128  ;;  %1637 = vmin.xlane.f32.xlu1 %v1636_v9 }
 0x688   :  { %v1714_v56 = vshra.s32 %v4450_v58, 16 }
 0x68a   :  { %v4453_v6 = vcvt.s32.f32 %v1714_v56  ;;  %v2649_v56 = vsel %vm2648_vm13, %v3487_v51, %v3972_v16  ;;  %v1645_v16 = vcvt.s32.f32 %v1643_v60 }
 0x68c   :  { %1717 = vmin.xlane.f32.xlu2 %v4453_v6 }
 0x68d   :  { %v1508_v21 = vpop.xlane.xlu2 %1507 }
 0x68e   :  { %vm1526_vm12 = vcmp.eq.f32.partialorder %v4317_v28, %v1508_v21  ;;  %v1570_v21 = vcvt.f32.s32 %v4341_v10  ;;  %v1584_v10 = vcvt.f32.s32 %v4357_v49 }
 0x68f   :  { %v4458_v63 = vsel %vm1526_vm12, %v3259_v37, 128 }
 0x690   :  { %v1728_v50 = vshra.s32 %v4458_v63, 16  ;;  %v1571_v44 = vshll.u32 %v1570_v21, 16 }
 0x692   :  { %v4461_v31 = vcvt.s32.f32 %v1728_v50 }
 0x694   :  { %1731 = vmin.xlane.f32.xlu1 %v4461_v31 }
 0x6ca   :  { %v1554_v34 = vpop.xlane.xlu0 %1553 }
 0x6cb   :  { %v1555_v28 = vcvt.f32.s32 %v1554_v34 }
 0x6cd   :  { %v1558_v9 = vadd.s32 %v1557_v0, %v1555_v28  ;;  %v2650_v0 = vsel %vm2648_vm13, %v3495_v45, %v3979_v26  ;;  %v1657_v45 = vand.u32 65535, %v4366_v47  ;;  %v1585_v26 = vshll.u32 %v1584_v10, 16 }
 0x6cf   :  { %v4473_v50 = vsel %vm2665_vm14, %v2649_v56, %v1558_v9  ;;  %vm1769_vm15 = vcmp.eq.s32.totalorder %v3259_v37, %v1558_v9  ;;  %v1659_v60 = vcvt.s32.f32 %v1657_v45 }
 0x6d0   :  { %5789 = vst [vmem:[#allocation37_spill] sm:$0xff] %v4473_v50  ;;  %2946 = vmatmul.msk.f32.vlgmr.msrb.gmra.mxu2 %vm1769_vm15, %v5773_v5 }
 0x6d2   :  { %v1568_v18 = vpop.xlane.xlu0 %1567 }
 0x6d3   :  { %v1569_v34 = vcvt.f32.s32 %v1568_v18 }
 0x6d5   :  { %v1572_v57 = vadd.s32 %v1571_v44, %v1569_v34  ;;  %v1598_v44 = vcvt.f32.s32 %v4377_v20 }
 0x6d6   :  { %v4481_v51 = vpop.xlane.xlu1 %1647 }
 0x6d7   :  { %v4485_v28 = vsel %vm2665_vm14, %v2650_v0, %v1572_v57  ;;  %vm1770_vm1 = vcmp.eq.s32.totalorder %v3259_v37, %v1572_v57  ;;  %vm1649_vm2 = vcmp.eq.f32.partialorder %v4354_v3, %v4481_v51  ;;  %v2651_v3 = vsel %vm2648_vm13, %v3511_v53, %v3994_v4  ;;  %v2964_v0 = vld [vmem:[%s5678_s1 + $0x70] sm:$0xff] }
 0x6d8   :  { %2947 = vmatmul.msk.f32.gmra.mxu2 %vm1770_vm1, %v5773_v5  ;;  %v1650_v59 = vsel %vm1649_vm2, %v1645_v16, inf  ;;  %2063 = vmatpush.msrb.mxu1 %v2964_v0  ;;  %v1599_v20 = vshll.u32 %v1598_v44, 16  ;;  %v1671_v16 = vand.u32 65535, %v4386_v36  ;;  %v2653_v0 = vsel %vm2648_vm13, %v3549_v55, %v4028_v12 }
 0x6d9   :  { %1651 = vmin.xlane.f32.xlu0 %v1650_v59  ;;  %v1699_v55 = vand.u32 65535, %v4437_v46 }
 0x6da   :  { %v1582_v9 = vpop.xlane.xlu0 %1581  ;;  %v1510_v56 = vpop.xlane.xlu2 %1509 }
 0x6db   :  { %v1583_v21 = vcvt.f32.s32 %v1582_v9  ;;  %vm1527_vm3 = vcmp.eq.f32.partialorder %v4360_v1, %v1510_v56 }
 0x6dc   :  { %v4494_v49 = vsel %vm1527_vm3, %v3259_v37, 128 }
 0x6dd   :  { %v1586_v18 = vadd.s32 %v1585_v26, %v1583_v21  ;;  %v1742_v57 = vshra.s32 %v4494_v49, 16  ;;  %v1612_v26 = vcvt.f32.s32 %v4397_v41  ;;  %v2963_v41 = vld [vmem:[%s5678_s1 + $0x68] sm:$0xff] }
 0x6de   :  { %2064 = vmatpush.msrb.mxu1 %v2963_v41 }
 0x6df   :  { %v4502_v34 = vsel %vm2665_vm14, %v2651_v3, %v1586_v18  ;;  %v4504_v47 = vpop.xlane.xlu1 %1661  ;;  %vm1771_vm4 = vcmp.eq.s32.totalorder %v3259_v37, %v1586_v18  ;;  %v4507_v1 = vcvt.s32.f32 %v1742_v57  ;;  %v2962_v57 = vld [vmem:[%s5678_s1 + $0x60] sm:$0xff]  ;;  %v1685_v3 = vand.u32 65535, %v4412_v19 }
 0x6e0   :  { %2948 = vmatmul.msk.f32.gmra.mxu2 %vm1771_vm4, %v5773_v5  ;;  %vm1663_vm5 = vcmp.eq.f32.partialorder %v4374_v40, %v4504_v47  ;;  %v2652_v40 = vsel %vm2648_vm13, %v3529_v62, %v4013_v8  ;;  %2065 = vmatpush.msrb.mxu1 %v2962_v57 }
 0x6e1   :  { %v1664_v53 = vsel %vm1663_vm5, %v1659_v60, inf  ;;  %1745 = vmin.xlane.f32.xlu0 %v4507_v1  ;;  %v1613_v60 = vshll.u32 %v1612_v26, 16 }
 0x6e2   :  { %1665 = vmin.xlane.f32.xlu2 %v1664_v53  ;;  %v1596_v4 = vpop.xlane.xlu0 %1595  ;;  %v1626_v53 = vcvt.f32.s32 %v4425_v22 }
 0x6e3   :  { %v1597_v10 = vcvt.f32.s32 %v1596_v4  ;;  %v1512_v59 = vpop.xlane.xlu2 %1511 }
 0x6e4   :  { %vm1528_vm6 = vcmp.eq.f32.partialorder %v4382_v23, %v1512_v59  ;;  %v1673_v23 = vcvt.s32.f32 %v1671_v16  ;;  %v1687_v16 = vcvt.s32.f32 %v1685_v3  ;;  %v1627_v59 = vshll.u32 %v1626_v53, 16 }
 0x6e5   :  { %v1600_v9 = vadd.s32 %v1599_v20, %v1597_v10  ;;  %v4519_v56 = vsel %vm1528_vm6, %v3259_v37, 128  ;;  %v1727_v3 = vand.u32 65535, %v4458_v63  ;;  %v1741_v63 = vand.u32 65535, %v4494_v49 }
 0x6e6   :  { %v1756_v45 = vshra.s32 %v4519_v56, 16 }
 0x6e7   :  { %v4527_v21 = vsel %vm2665_vm14, %v2652_v40, %v1600_v9  ;;  %v4529_v36 = vpop.xlane.xlu1 %1675  ;;  %vm1772_vm7 = vcmp.eq.s32.totalorder %v3259_v37, %v1600_v9  ;;  %v2654_v9 = vsel %vm2648_vm13, %v3560_v33, %v4039_v32  ;;  %v1640_v40 = vcvt.f32.s32 %v4444_v24 }
 0x6e8   :  { %2949 = vmatmul.msk.f32.gmra.mxu2 %vm1772_vm7, %v5773_v5  ;;  %vm1677_vm8 = vcmp.eq.f32.partialorder %v4394_v29, %v4529_v36  ;;  %v4535_v18 = vcvt.s32.f32 %v1756_v45  ;;  %v1713_v33 = vand.u32 65535, %v4450_v58 }
 0x6e9   :  { %v1678_v62 = vsel %vm1677_vm8, %v1673_v23, inf }
 0x6ea   :  { %1679 = vmin.xlane.f32.xlu1 %v1678_v62  ;;  %1759 = vmin.xlane.f32.xlu2 %v4535_v18  ;;  %v1610_v8 = vpop.xlane.xlu0 %1609  ;;  %v1641_v62 = vshll.u32 %v1640_v40, 16  ;;  %v1682_v40 = vcvt.f32.s32 %v4529_v36 }
 0x6eb   :  { %v1611_v44 = vcvt.f32.s32 %v1610_v8  ;;  %v2655_v8 = vsel %vm2648_vm13, %v3571_v43, %v4050_v15  ;;  %v1729_v43 = vcvt.s32.f32 %v1727_v3 }
 0x6ed   :  { %v1614_v29 = vadd.s32 %v1613_v60, %v1611_v44  ;;  %v1654_v44 = vcvt.f32.s32 %v4481_v51 }
 0x6ef   :  { %v4550_v4 = vsel %vm2665_vm14, %v2653_v0, %v1614_v29  ;;  %v4552_v20 = vpop.xlane.xlu1 %1689  ;;  %vm1773_vm9 = vcmp.eq.s32.totalorder %v3259_v37, %v1614_v29  ;;  %v1655_v0 = vshll.u32 %v1654_v44, 16 }
 0x6f0   :  { %2950 = vmatmul.msk.f32.gmra.mxu2 %vm1773_vm9, %v5773_v5  ;;  %vm1691_vm10 = vcmp.eq.f32.partialorder %v4419_v11, %v4552_v20  ;;  %v1701_v11 = vcvt.s32.f32 %v1699_v55  ;;  %v1743_v55 = vcvt.s32.f32 %v1741_v63 }
 0x6f1   :  { %v1692_v19 = vsel %vm1691_vm10, %v1687_v16, inf }
 0x6f2   :  { %1693 = vmin.xlane.f32.xlu0 %v1692_v19  ;;  %v1624_v10 = vpop.xlane.xlu2 %1623 }
 0x6f3   :  { %v1625_v12 = vcvt.f32.s32 %v1624_v10 }
 0x6f5   :  { %v1628_v22 = vadd.s32 %v1627_v59, %v1625_v12 }
 0x6f7   :  { %v4564_v45 = vsel %vm2665_vm14, %v2654_v9, %v1628_v22  ;;  %v4566_v26 = vpop.xlane.xlu0 %1703  ;;  %vm1774_vm11 = vcmp.eq.s32.totalorder %v3259_v37, %v1628_v22  ;;  %v2657_v22 = vsel %vm2648_vm13, %v3611_v2, %v4093_v25  ;;  %v1755_v9 = vand.u32 65535, %v4519_v56 }
 0x6f8   :  { %2951 = vmatmul.msk.f32.gmra.mxu2 %vm1774_vm11, %v5773_v5  ;;  %vm1705_vm12 = vcmp.eq.f32.partialorder %v4441_v48, %v4566_v26  ;;  %v1715_v48 = vcvt.s32.f32 %v1713_v33  ;;  %v1683_v2 = vshll.u32 %v1682_v40, 16 }
 0x6f9   :  { %v1706_v46 = vsel %vm1705_vm12, %v1701_v11, inf  ;;  %v1757_v33 = vcvt.s32.f32 %v1755_v9 }
 0x6fa   :  { %1707 = vmin.xlane.f32.xlu1 %v1706_v46  ;;  %v1638_v23 = vpop.xlane.xlu1 %1637 }
 0x6fb   :  { %v1639_v32 = vcvt.f32.s32 %v1638_v23 }
 0x6fd   :  { %v1642_v24 = vadd.s32 %v1641_v62, %v1639_v32  ;;  %v2658_v32 = vsel %vm2648_vm13, %v3627_v54, %v4109_v13  ;;  %v2659_v13 = vsel %vm2648_vm13, %v3638_v35, %v4120_v27  ;;  %v2660_v27 = vsel %vm2648_vm13, %v3649_v7, %v4131_v52  ;;  %v5791_v52 = vld [vmem:[#allocation22_spill] sm:$0xff] }
 0x6ff   :  { %v4577_v41 = vsel %vm2665_vm14, %v2655_v8, %v1642_v24  ;;  %v4579_v57 = vpop.xlane.xlu2 %1717  ;;  %vm1775_vm15 = vcmp.eq.s32.totalorder %v3259_v37, %v1642_v24  ;;  %v1696_v24 = vcvt.f32.s32 %v4552_v20  ;;  %v1710_v20 = vcvt.f32.s32 %v4566_v26 }
 0x700   :  { %2952 = vmatmul.msk.f32.gmra.mxu2 %vm1775_vm15, %v5773_v5  ;;  %vm1719_vm1 = vcmp.eq.f32.partialorder %v4453_v6, %v4579_v57  ;;  %v2656_v6 = vsel %vm2648_vm13, %v3595_v17, %v4077_v38  ;;  %v1724_v26 = vcvt.f32.s32 %v4579_v57  ;;  %v5792_v57 = vld [vmem:[#allocation8_spill] sm:$0xff] }
 0x701   :  { %v1720_v58 = vsel %vm1719_vm1, %v1715_v48, inf  ;;  %v1697_v3 = vshll.u32 %v1696_v24, 16 }
 0x702   :  { %1721 = vmin.xlane.f32.xlu2 %v1720_v58 }
 0x707   :  { %v4586_v60 = vpop.xlane.xlu1 %1731 }
 0x708   :  { %vm1733_vm2 = vcmp.eq.f32.partialorder %v4461_v31, %v4586_v60  ;;  %v1668_v31 = vcvt.f32.s32 %v4504_v47 }
 0x709   :  { %v1734_v15 = vsel %vm1733_vm2, %v1729_v43, inf }
 0x70a   :  { %1735 = vmin.xlane.f32.xlu0 %v1734_v15  ;;  %v1669_v17 = vshll.u32 %v1668_v31, 16 }
 0x74c   :  { %v1652_v29 = vpop.xlane.xlu0 %1651 }
 0x74d   :  { %v1653_v53 = vcvt.f32.s32 %v1652_v29 }
 0x74f   :  { %v1656_v16 = vadd.s32 %v1655_v0, %v1653_v53  ;;  %v1711_v53 = vshll.u32 %v1710_v20, 16  ;;  %v5798_v20 = vld [vmem:[#allocation11_spill] sm:$0xff] }
 0x751   :  { %v4596_v19 = vsel %vm2665_vm14, %v2656_v6, %v1656_v16  ;;  %vm1776_vm3 = vcmp.eq.s32.totalorder %v3259_v37, %v1656_v16 }
 0x752   :  { %2953 = vmatmul.msk.f32.gmra.mxu2 %vm1776_vm3, %v5773_v5 }
 0x753   :  { %v1851_v51 = vpop.f32.mrf.mxu2 }
 0x754   :  { %v4602_v10 = vsub.f32 %v4085_v30, %v1851_v51  ;;  %v4604_v59 = vpop.xlane.xlu0 %1745 }
 0x755   :  { %v1666_v12 = vpop.xlane.xlu2 %1665  ;;  %vm1747_vm4 = vcmp.eq.f32.partialorder %v4507_v1, %v4604_v59 }
 0x756   :  { %5790 = vst [vmem:[#allocation38_spill] sm:$0xff] %v4602_v10  ;;  %v1667_v38 = vcvt.f32.s32 %v1666_v12  ;;  %2967 = vmatmul.msk.f32.vlgmr.msrb.gmra.mxu1 %vm41_vm0, %v4602_v10  ;;  %v1748_v49 = vsel %vm1747_vm4, %v1743_v55, inf  ;;  %v1725_v55 = vshll.u32 %v1724_v26, 16 }
 0x757   :  { %1749 = vmin.xlane.f32.xlu1 %v1748_v49 }
 0x758   :  { %v1670_v47 = vadd.s32 %v1669_v17, %v1667_v38  ;;  %v2661_v17 = vsel %vm2648_vm13, %v5792_v57, %v5791_v52  ;;  %v1738_v38 = vcvt.f32.s32 %v4586_v60  ;;  %v5795_v60 = vld [vmem:[#allocation10_spill] sm:$0xff] }
 0x75a   :  { %v4616_v11 = vsel %vm2665_vm14, %v2657_v22, %v1670_v47  ;;  %vm1777_vm5 = vcmp.eq.s32.totalorder %v3259_v37, %v1670_v47  ;;  %v5793_v22 = vld [vmem:[#allocation23_spill] sm:$0xff] }
 0x75b   :  { %2954 = vmatmul.msk.f32.gmra.mxu2 %vm1777_vm5, %v5773_v5  ;;  %v1854_v1 = vpop.f32.mrf.mxu2 }
 0x75c   :  { %v4621_v46 = vsub.f32 %v4101_v61, %v1854_v1  ;;  %v1739_v1 = vshll.u32 %v1738_v38, 16 }
 0x75d   :  { %v1680_v23 = vpop.xlane.xlu1 %1679  ;;  %v4623_v62 = vpop.xlane.xlu2 %1759 }
 0x75e   :  { %v1681_v25 = vcvt.f32.s32 %v1680_v23  ;;  %2968 = vmatmul.msk.f32.gmra.mxu1 %vm41_vm0, %v4621_v46  ;;  %vm1761_vm6 = vcmp.eq.f32.partialorder %v4535_v18, %v4623_v62 }
 0x75f   :  { %v1762_v56 = vsel %vm1761_vm6, %v1757_v33, inf }
 0x760   :  { %v1684_v36 = vadd.s32 %v1683_v2, %v1681_v25  ;;  %1763 = vmin.xlane.f32.xlu2 %v1762_v56  ;;  %v5794_v2 = vld [vmem:[#allocation24_spill] sm:$0xff] }
 0x761   :  { %v2662_v25 = vsel %vm2648_vm13, %v5795_v60, %v5794_v2  ;;  %v5807_v60 = vld [vmem:[#allocation30_spill] sm:$0xff] }
 0x762   :  { %v4634_v8 = vsel %vm2665_vm14, %v2658_v32, %v1684_v36  ;;  %vm1778_vm7 = vcmp.eq.s32.totalorder %v3259_v37, %v1684_v36  ;;  %v5796_v32 = vld [vmem:[#allocation25_spill] sm:$0xff] }
 0x763   :  { %2955 = vmatmul.msk.f32.gmra.mxu2 %vm1778_vm7, %v5773_v5  ;;  %v1857_v48 = vpop.f32.mrf.mxu2 }
 0x764   :  { %v4639_v58 = vsub.f32 %v4116_v39, %v1857_v48  ;;  %v1752_v48 = vcvt.f32.s32 %v4604_v59 }
 0x765   :  { %v1694_v18 = vpop.xlane.xlu0 %1693 }
 0x766   :  { %v1695_v43 = vcvt.f32.s32 %v1694_v18  ;;  %2969 = vmatmul.msk.f32.gmra.mxu1 %vm41_vm0, %v4639_v58 }
 0x768   :  { %v1698_v54 = vadd.s32 %v1697_v3, %v1695_v43  ;;  %v1753_v3 = vshll.u32 %v1752_v48, 16 }
 0x76a   :  { %v4648_v15 = vsel %vm2665_vm14, %v2659_v13, %v1698_v54  ;;  %vm1779_vm8 = vcmp.eq.s32.totalorder %v3259_v37, %v1698_v54  ;;  %v5797_v13 = vld [vmem:[#allocation26_spill] sm:$0xff] }
 0x76b   :  { %2956 = vmatmul.msk.f32.gmra.mxu2 %vm1779_vm8, %v5773_v5  ;;  %v1860_v44 = vpop.f32.mrf.mxu2 }
 0x76c   :  { %v4653_v29 = vsub.f32 %v4127_v14, %v1860_v44  ;;  %v2663_v44 = vsel %vm2648_vm13, %v5798_v20, %v5797_v13 }
 0x76d   :  { %v1708_v0 = vpop.xlane.xlu1 %1707 }
 0x76e   :  { %v1709_v16 = vcvt.f32.s32 %v1708_v0  ;;  %2970 = vmatmul.msk.f32.gmra.mxu1 %vm41_vm0, %v4653_v29 }
 0x770   :  { %v1712_v35 = vadd.s32 %v1711_v53, %v1709_v16  ;;  %v1766_v53 = vcvt.f32.s32 %v4623_v62  ;;  %v4726_v62 = vld [vmem:[%s5680_s3 + $0x3] ss:$0 sm:$0xff] }
 0x772   :  { %v4662_v6 = vsel %vm2665_vm14, %v2660_v27, %v1712_v35  ;;  %vm1780_vm9 = vcmp.eq.s32.totalorder %v3259_v37, %v1712_v35  ;;  %v1767_v59 = vshll.u32 %v1766_v53, 16 }
 0x773   :  { %2957 = vmatmul.msk.f32.gmra.mxu2 %vm1780_vm9, %v5773_v5  ;;  %v1863_v63 = vpop.f32.mrf.mxu2 }
 0x774   :  { %v4667_v31 = vsub.f32 %v4138_v42, %v1863_v63 }
 0x775   :  { %v1722_v51 = vpop.xlane.xlu2 %1721 }
 0x776   :  { %v1723_v12 = vcvt.f32.s32 %v1722_v51  ;;  %2971 = vmatmul.msk.f32.gmra.mxu1 %vm41_vm0, %v4667_v31  ;;  %v5800_v51 = vld [vmem:[#allocation27_spill] sm:$0xff] }
 0x778   :  { %v1726_v7 = vadd.s32 %v1725_v55, %v1723_v12  ;;  %v5802_v12 = vld [vmem:[#allocation28_spill] sm:$0xff] }
 0x77a   :  { %v4676_v49 = vsel %vm2665_vm14, %v2661_v17, %v1726_v7  ;;  %vm1781_vm10 = vcmp.eq.s32.totalorder %v3259_v37, %v1726_v7  ;;  %v5803_v7 = vld [vmem:[#allocation13_spill] sm:$0xff] }
 0x77b   :  { %2958 = vmatmul.msk.f32.gmra.mxu2 %vm1781_vm10, %v5773_v5  ;;  %v1866_v47 = vpop.f32.mrf.mxu2  ;;  %v2664_v52 = vsel %vm2648_vm13, %v5803_v7, %v5802_v12 }
 0x77c   :  { %v4681_v9 = vsub.f32 %v5793_v22, %v1866_v47 }
 0x77d   :  { %v1736_v40 = vpop.xlane.xlu0 %1735 }
 0x77e   :  { %v1737_v23 = vcvt.f32.s32 %v1736_v40  ;;  %2972 = vmatmul.msk.f32.gmra.mxu1 %vm41_vm0, %v4681_v9  ;;  %v5805_v40 = vld [vmem:[#allocation29_spill] sm:$0xff] }
 0x780   :  { %v1740_v33 = vadd.s32 %v1739_v1, %v1737_v23 }
 0x782   :  { %v4689_v56 = vsel %vm2665_vm14, %v2662_v25, %v1740_v33  ;;  %vm1782_vm11 = vcmp.eq.s32.totalorder %v3259_v37, %v1740_v33 }
 0x783   :  { %2959 = vmatmul.msk.f32.gmra.mxu2 %vm1782_vm11, %v5773_v5  ;;  %v1869_v36 = vpop.f32.mrf.mxu2 }
 0x784   :  { %v4694_v24 = vsub.f32 %v5796_v32, %v1869_v36 }
 0x786   :  { %2973 = vmatmul.msk.f32.gmra.mxu1 %vm41_vm0, %v4694_v24 }
 0x7ca   :  { %v1750_v18 = vpop.xlane.xlu1 %1749 }
 0x7cb   :  { %v1751_v43 = vcvt.f32.s32 %v1750_v18 }
 0x7cd   :  { %v1754_v54 = vadd.s32 %v1753_v3, %v1751_v43  ;;  %v5809_v3 = vld [vmem:[#allocation31_spill] sm:$0xff] }
 0x7cf   :  { %v4703_v0 = vsel %vm2665_vm14, %v2663_v44, %v1754_v54  ;;  %vm1783_vm12 = vcmp.eq.s32.totalorder %v3259_v37, %v1754_v54  ;;  %v5811_v44 = vld [vmem:[#allocation32_spill] sm:$0xff] }
 0x7d0   :  { %5799 = vst [vmem:[#allocation22_spill] sm:$0xff] %v4703_v0  ;;  %2960 = vmatmul.msk.f32.gmra.mxu2 %vm1783_vm12, %v5773_v5 }
 0x7d3   :  { %v1764_v16 = vpop.xlane.xlu2 %1763  ;;  %v4708_v35 = vpop.f32.mrf.mxu1 }
 0x7d4   :  { %v1765_v27 = vcvt.f32.s32 %v1764_v16 }
 0x7d5   :  { %v1872_v26 = vpop.f32.mrf.mxu2 }
 0x7d6   :  { %v1768_v63 = vadd.s32 %v1767_v59, %v1765_v27  ;;  %v4711_v55 = vsub.f32 %v5800_v51, %v1872_v26  ;;  %v5813_v26 = vld [vmem:[#allocation33_spill] sm:$0xff] }
 0x7d8   :  { %5801 = vst [vmem:[#allocation8_spill] sm:$0xff] %v4711_v55  ;;  %v4717_v57 = vsel %vm2665_vm14, %v2664_v52, %v1768_v63  ;;  %vm1784_vm15 = vcmp.eq.s32.totalorder %v3259_v37, %v1768_v63  ;;  %2974 = vmatmul.msk.f32.gmra.mxu1 %vm41_vm0, %v4711_v55 }
 0x7d9   :  { %5804 = vst [vmem:[#allocation23_spill] sm:$0xff] %v4717_v57  ;;  %2961 = vmatmul.msk.f32.gmra.mxu2 %vm1784_vm15, %v5773_v5 }
 0x7db   :  { %v2070_v17 = vpop.f32.mrf.mxu1 }
 0x7dc   :  { %v2119_v38 = vsub.f32 %v4726_v62, %v2070_v17  ;;  %v5815_v17 = vld [vmem:[#allocation34_spill] sm:$0xff] }
 0x7de   :  { %v1875_v47 = vpop.f32.mrf.mxu2  ;;  %2136 = vmin.xlane.f32.xlu0 %v2119_v38 }
 0x7df   :  { %v4730_v1 = vsub.f32 %v5805_v40, %v1875_v47 }
 0x7e1   :  { %5806 = vst [vmem:[#allocation24_spill] sm:$0xff] %v4730_v1  ;;  %2975 = vmatmul.msk.f32.gmra.mxu1 %vm41_vm0, %v4730_v1 }
 0x7e3   :  { %v2073_v23 = vpop.f32.mrf.mxu1 }
 0x7e4   :  { %v2120_v33 = vsub.f32 %v4726_v62, %v2073_v23 }
 0x7e6   :  { %v1878_v2 = vpop.f32.mrf.mxu2  ;;  %2138 = vmin.xlane.f32.xlu1 %v2120_v33 }
 0x7e7   :  { %v4736_v25 = vsub.f32 %v5807_v60, %v1878_v2 }
 0x7e9   :  { %5808 = vst [vmem:[#allocation10_spill] sm:$0xff] %v4736_v25  ;;  %2976 = vmatmul.msk.f32.gmra.mxu1 %vm41_vm0, %v4736_v25 }
 0x7eb   :  { %v2076_v36 = vpop.f32.mrf.mxu1 }
 0x7ec   :  { %v2121_v48 = vsub.f32 %v4726_v62, %v2076_v36 }
 0x7ee   :  { %v1881_v18 = vpop.f32.mrf.mxu2  ;;  %2140 = vmin.xlane.f32.xlu2 %v2121_v48 }
 0x7ef   :  { %v4742_v43 = vsub.f32 %v5809_v3, %v1881_v18 }
 0x7f1   :  { %5810 = vst [vmem:[#allocation25_spill] sm:$0xff] %v4742_v43  ;;  %2977 = vmatmul.msk.f32.gmra.mxu1 %vm41_vm0, %v4742_v43 }
 0x7f3   :  { %v2079_v54 = vpop.f32.mrf.mxu1 }
 0x7f4   :  { %v2122_v13 = vsub.f32 %v4726_v62, %v2079_v54  ;;  %v5817_v54 = vld [vmem:[#allocation35_spill] sm:$0xff] }
 0x7f6   :  { %v1884_v20 = vpop.f32.mrf.mxu2  ;;  %2142 = vmin.xlane.f32.xlu0 %v2122_v13 }
 0x7f7   :  { %v4748_v53 = vsub.f32 %v5811_v44, %v1884_v20 }
 0x7f9   :  { %5812 = vst [vmem:[#allocation26_spill] sm:$0xff] %v4748_v53  ;;  %2978 = vmatmul.msk.f32.gmra.mxu1 %vm41_vm0, %v4748_v53 }
 0x7fb   :  { %v2082_v16 = vpop.f32.mrf.mxu1 }
 0x7fc   :  { %v2123_v59 = vsub.f32 %v4726_v62, %v2082_v16 }
 0x7fe   :  { %v1887_v27 = vpop.f32.mrf.mxu2  ;;  %2144 = vmin.xlane.f32.xlu1 %v2123_v59 }
 0x7ff   :  { %v4754_v63 = vsub.f32 %v5813_v26, %v1887_v27 }
 0x801   :  { %5814 = vst [vmem:[#allocation11_spill] sm:$0xff] %v4754_v63  ;;  %2979 = vmatmul.msk.f32.gmra.mxu1 %vm41_vm0, %v4754_v63  ;;  %v5819_v63 = vld [vmem:[#allocation36_spill] sm:$0xff] }
 0x803   :  { %v2085_v12 = vpop.f32.mrf.mxu1 }
 0x804   :  { %v2124_v7 = vsub.f32 %v4726_v62, %v2085_v12 }
 0x806   :  { %v1890_v52 = vpop.f32.mrf.mxu2  ;;  %2146 = vmin.xlane.f32.xlu2 %v2124_v7 }
 0x807   :  { %v4760_v47 = vsub.f32 %v5815_v17, %v1890_v52 }
 0x809   :  { %5816 = vst [vmem:[#allocation28_spill] sm:$0xff] %v4760_v47  ;;  %2980 = vmatmul.msk.f32.gmra.mxu1 %vm41_vm0, %v4760_v47 }
 0x851   :  { %v2137_v23 = vpop.xlane.xlu0 %2136 }
 0x852   :  { %vm2167_vm14 = vcmp.eq.f32.partialorder %v2119_v38, %v2137_v23 }
 0x853   :  { %v2183_v2 = vsel %vm2167_vm14, %v3259_v37, 128  ;;  %v1893_v36 = vpop.f32.mrf.mxu2 }
 0x854   :  { %v2213_v18 = vshra.s32 %v2183_v2, 16  ;;  %v4766_v20 = vsub.f32 %v5817_v54, %v1893_v36 }
 0x855   :  { %v2088_v16 = vpop.f32.mrf.mxu1 }
 0x856   :  { %5818 = vst [vmem:[#allocation13_spill] sm:$0xff] %v4766_v20  ;;  %v4768_v27 = vcvt.s32.f32 %v2213_v18  ;;  %v2125_v12 = vsub.f32 %v4726_v62, %v2088_v16  ;;  %2981 = vmatmul.msk.f32.gmra.mxu1 %vm41_vm0, %v4766_v20 }
 0x858   :  { %2216 = vmin.xlane.f32.xlu0 %v4768_v27  ;;  %2148 = vmin.xlane.f32.xlu1 %v2125_v12 }
 0x859   :  { %v2139_v52 = vpop.xlane.xlu1 %2138 }
 0x85a   :  { %vm2168_vm1 = vcmp.eq.f32.partialorder %v2120_v33, %v2139_v52 }
 0x85b   :  { %v2184_v38 = vsel %vm2168_vm1, %v3259_v37, 128 }
 0x85c   :  { %v2227_v23 = vshra.s32 %v2184_v38, 16  ;;  %v1896_v57 = vpop.f32.mrf.mxu2 }
 0x85d   :  { %v4776_v36 = vsub.f32 %v5819_v63, %v1896_v57 }
 0x85e   :  { %v4778_v50 = vcvt.s32.f32 %v2227_v23  ;;  %v2091_v18 = vpop.f32.mrf.mxu1 }
 0x85f   :  { %5820 = vst [vmem:[#allocation29_spill] sm:$0xff] %v4776_v36  ;;  %v4781_v16 = vsub.f32 %v4726_v62, %v2091_v18  ;;  %2982 = vmatmul.msk.f32.gmra.mxu1 %vm41_vm0, %v4776_v36 }
 0x860   :  { %2230 = vmin.xlane.f32.xlu2 %v4778_v50 }
 0x861   :  { %2150 = vmin.xlane.f32.xlu0 %v4781_v16  ;;  %v2141_v33 = vpop.xlane.xlu2 %2140 }
 0x862   :  { %vm2169_vm2 = vcmp.eq.f32.partialorder %v2121_v48, %v2141_v33 }
 0x863   :  { %v4788_v52 = vsel %vm2169_vm2, %v3259_v37, 128 }
 0x864   :  { %v2241_v57 = vshra.s32 %v4788_v52, 16 }
 0x866   :  { %v4791_v23 = vcvt.s32.f32 %v2241_v57  ;;  %v2094_v20 = vpop.f32.mrf.mxu1 }
 0x867   :  { %v4794_v18 = vsub.f32 %v4726_v62, %v2094_v20 }
 0x868   :  { %2244 = vmin.xlane.f32.xlu1 %v4791_v23 }
 0x869   :  { %2152 = vmin.xlane.f32.xlu2 %v4794_v18  ;;  %v2143_v36 = vpop.xlane.xlu0 %2142 }
 0x86a   :  { %vm2170_vm3 = vcmp.eq.f32.partialorder %v2122_v13, %v2143_v36 }
 0x86b   :  { %v4799_v53 = vsel %vm2170_vm3, %v3259_v37, 128 }
 0x86c   :  { %v2255_v48 = vshra.s32 %v4799_v53, 16 }
 0x86e   :  { %v4802_v33 = vcvt.s32.f32 %v2255_v48  ;;  %v2097_v25 = vpop.f32.mrf.mxu1 }
 0x86f   :  { %v4805_v57 = vsub.f32 %v4726_v62, %v2097_v25 }
 0x870   :  { %2258 = vmin.xlane.f32.xlu0 %v4802_v33 }
 0x871   :  { %2154 = vmin.xlane.f32.xlu1 %v4805_v57  ;;  %v2145_v20 = vpop.xlane.xlu1 %2144 }
 0x872   :  { %vm2171_vm4 = vcmp.eq.f32.partialorder %v2123_v59, %v2145_v20 }
 0x873   :  { %v4810_v47 = vsel %vm2171_vm4, %v3259_v37, 128 }
 0x874   :  { %v2269_v13 = vshra.s32 %v4810_v47, 16 }
 0x876   :  { %v4813_v36 = vcvt.s32.f32 %v2269_v13  ;;  %v2100_v0 = vpop.f32.mrf.mxu1 }
 0x877   :  { %v4816_v48 = vsub.f32 %v4726_v62, %v2100_v0 }
 0x878   :  { %2272 = vmin.xlane.f32.xlu2 %v4813_v36 }
 0x879   :  { %2156 = vmin.xlane.f32.xlu0 %v4816_v48  ;;  %v2147_v25 = vpop.xlane.xlu2 %2146 }
 0x87a   :  { %vm2172_vm5 = vcmp.eq.f32.partialorder %v2124_v7, %v2147_v25  ;;  %v2212_v7 = vand.u32 65535, %v2183_v2 }
 0x87b   :  { %v4821_v1 = vsel %vm2172_vm5, %v3259_v37, 128  ;;  %vm2682_vm5 = vcmask 23552  }
 0x87c   :  { %v2283_v59 = vshra.s32 %v4821_v1, 16  ;;  %v2214_v25 = vcvt.s32.f32 %v2212_v7 }
 0x87e   :  { %v4824_v20 = vcvt.s32.f32 %v2283_v59  ;;  %v2103_v43 = vpop.f32.mrf.mxu1 }
 0x87f   :  { %v4827_v13 = vsub.f32 %v4726_v62, %v2103_v43 }
 0x880   :  { %2286 = vmin.xlane.f32.xlu1 %v4824_v20 }
 0x881   :  { %2158 = vmin.xlane.f32.xlu2 %v4827_v13 }
 0x886   :  { %v2106_v0 = vpop.f32.mrf.mxu1 }
 0x887   :  { %v4832_v55 = vsub.f32 %v4726_v62, %v2106_v0  ;;  %v2226_v0 = vand.u32 65535, %v2184_v38 }
 0x889   :  { %2160 = vmin.xlane.f32.xlu2 %v4832_v55  ;;  %v2228_v2 = vcvt.s32.f32 %v2226_v0 }
 0x8cb   :  { %v4835_v10 = vpop.xlane.xlu0 %2216  ;;  %v2149_v59 = vpop.xlane.xlu1 %2148 }
 0x8cc   :  { %vm2218_vm6 = vcmp.eq.f32.partialorder %v4768_v27, %v4835_v10  ;;  %vm2173_vm7 = vcmp.eq.f32.partialorder %v2125_v12, %v2149_v59 }
 0x8cd   :  { %v4840_v43 = vsel %vm2173_vm7, %v3259_v37, 128  ;;  %v2219_v63 = vsel %vm2218_vm6, %v2214_v25, inf  ;;  %vm2699_vm6 = vcmask 31744  }
 0x8ce   :  { %v2297_v17 = vshra.s32 %v4840_v43, 16  ;;  %2220 = vmin.xlane.f32.xlu0 %v2219_v63 }
 0x8d0   :  { %v4843_v26 = vcvt.s32.f32 %v2297_v17  ;;  %v2240_v17 = vand.u32 65535, %v4788_v52 }
 0x8d2   :  { %2300 = vmin.xlane.f32.xlu1 %v4843_v26  ;;  %v2242_v59 = vcvt.s32.f32 %v2240_v17  ;;  %v2254_v17 = vand.u32 65535, %v4799_v53  ;;  %v2268_v53 = vand.u32 65535, %v4810_v47 }
 0x8d3   :  { %v2109_v7 = vpop.f32.mrf.mxu1  ;;  %v4846_v3 = vpop.xlane.xlu2 %2230 }
 0x8d4   :  { %v2151_v54 = vpop.xlane.xlu0 %2150  ;;  %v4849_v27 = vsub.f32 %v4726_v62, %v2109_v7  ;;  %vm2232_vm8 = vcmp.eq.f32.partialorder %v4778_v50, %v4846_v3  ;;  %v4867_v50 = vsub.f32 %v4726_v62, %v4708_v35 }
 0x8d5   :  { %vm2174_vm9 = vcmp.eq.f32.partialorder %v4781_v16, %v2151_v54  ;;  %v2233_v12 = vsel %vm2232_vm8, %v2228_v2, inf }
 0x8d6   :  { %v4855_v63 = vsel %vm2174_vm9, %v3259_v37, 128  ;;  %2162 = vmin.xlane.f32.xlu2 %v4849_v27  ;;  %2234 = vmin.xlane.f32.xlu0 %v2233_v12 }
 0x8d7   :  { %v2311_v38 = vshra.s32 %v4855_v63, 16 }
 0x8d9   :  { %v4860_v25 = vcvt.s32.f32 %v2311_v38 }
 0x8db   :  { %2314 = vmin.xlane.f32.xlu1 %v4860_v25  ;;  %v4863_v0 = vpop.xlane.xlu1 %2244 }
 0x8dc   :  { %vm2246_vm10 = vcmp.eq.f32.partialorder %v4791_v23, %v4863_v0  ;;  %v2153_v54 = vpop.xlane.xlu2 %2152  ;;  %v2112_v7 = vpop.f32.mrf.mxu1  ;;  %v3014_v23 = vld [vmem:[%s5681_s2 + $0x1f8] sm:$0xff] }
 0x8dd   :  { %vm2175_vm11 = vcmp.eq.f32.partialorder %v4794_v18, %v2153_v54  ;;  %v2247_v16 = vsel %vm2246_vm10, %v2242_v59, inf  ;;  %v3013_v18 = vld [vmem:[%s5681_s2 + $0x1f0] sm:$0xff]  ;;  %v4890_v38 = vsub.f32 %v4726_v62, %v2112_v7  ;;  %3047 = vmatpush.msrb.mxu3 %v3014_v23  ;;  %2487 = vmatpush.msra.mxu2 %v3014_v23  ;;  %v3012_v54 = vld [vmem:[%s5681_s2 + $0x1e8] sm:$0xff]  ;;  %v3010_v23 = vld [vmem:[%s5681_s2 + $0x1d8] sm:$0xff] }
 0x8de   :  { %v4873_v52 = vsel %vm2175_vm11, %v3259_v37, 128  ;;  %2134 = vmin.xlane.f32.xlu2 %v4867_v50  ;;  %2248 = vmin.xlane.f32.xlu0 %v2247_v16 }
 0x8df   :  { %v2325_v2 = vshra.s32 %v4873_v52, 16  ;;  %3048 = vmatpush.msrb.mxu3 %v3013_v18  ;;  %2488 = vmatpush.msra.mxu2 %v3013_v18  ;;  %v3009_v18 = vld [vmem:[%s5681_s2 + $0x1d0] sm:$0xff] }
 0x8e1   :  { %v4877_v12 = vcvt.s32.f32 %v2325_v2  ;;  %v2256_v2 = vcvt.s32.f32 %v2254_v17  ;;  %3049 = vmatpush.msrb.mxu3 %v3012_v54  ;;  %2489 = vmatpush.msra.mxu2 %v3012_v54 }
 0x8e3   :  { %2328 = vmin.xlane.f32.xlu1 %v4877_v12  ;;  %v4880_v35 = vpop.xlane.xlu0 %2258 }
 0x8e4   :  { %v2155_v59 = vpop.xlane.xlu1 %2154  ;;  %vm2260_vm15 = vcmp.eq.f32.partialorder %v4802_v33, %v4880_v35 }
 0x8e5   :  { %vm2176_vm12 = vcmp.eq.f32.partialorder %v4805_v57, %v2155_v59  ;;  %v3011_v57 = vld [vmem:[%s5681_s2 + $0x1e0] sm:$0xff]  ;;  %v2261_v47 = vsel %vm2260_vm15, %v2256_v2, inf  ;;  %v2270_v59 = vcvt.s32.f32 %v2268_v53  ;;  %v3008_v53 = vld [vmem:[%s5681_s2 + $0x1c8] sm:$0xff]  ;;  %v2282_v2 = vand.u32 65535, %v4821_v1 }
 0x8e6   :  { %v4897_v16 = vsel %vm2176_vm12, %v3259_v37, 128  ;;  %2164 = vmin.xlane.f32.xlu0 %v4890_v38  ;;  %3050 = vmatpush.msrb.mxu3 %v3011_v57 }
 0x8e7   :  { %v2339_v62 = vshra.s32 %v4897_v16, 16  ;;  %2490 = vmatpush.msra.mxu2 %v3011_v57  ;;  %v3006_v57 = vld [vmem:[%s5681_s2 + $0x1b8] sm:$0xff] }
 0x8e8   :  { %3051 = vmatpush.msrb.mxu3 %v3010_v23 }
 0x8e9   :  { %v4907_v7 = vcvt.s32.f32 %v2339_v62  ;;  %2491 = vmatpush.msra.mxu2 %v3010_v23 }
 0x8ea   :  { %3052 = vmatpush.msrb.mxu3 %v3009_v18 }
 0x8eb   :  { %2342 = vmin.xlane.f32.xlu2 %v4907_v7  ;;  %2262 = vmin.xlane.f32.xlu1 %v2261_v47  ;;  %v4913_v33 = vpop.xlane.xlu2 %2272 }
 0x8ec   :  { %v2157_v17 = vpop.xlane.xlu0 %2156  ;;  %vm2274_vm14 = vcmp.eq.f32.partialorder %v4813_v36, %v4913_v33  ;;  %v3007_v36 = vld [vmem:[%s5681_s2 + $0x1c0] sm:$0xff]  ;;  %3053 = vmatpush.msrb.mxu3 %v3008_v53  ;;  %2492 = vmatpush.msra.mxu2 %v3009_v18  ;;  %v3004_v18 = vld [vmem:[%s5681_s2 + $0x1a8] sm:$0xff] }
 0x8ed   :  { %vm2177_vm1 = vcmp.eq.f32.partialorder %v4816_v48, %v2157_v17  ;;  %v2275_v54 = vsel %vm2274_vm14, %v2270_v59, inf  ;;  %v2284_v59 = vcvt.s32.f32 %v2282_v2  ;;  %v3005_v17 = vld [vmem:[%s5681_s2 + $0x1b0] sm:$0xff] }
 0x8ee   :  { %v4925_v62 = vsel %vm2177_vm1, %v3259_v37, 128  ;;  %2276 = vmin.xlane.f32.xlu0 %v2275_v54  ;;  %3054 = vmatpush.msrb.mxu3 %v3007_v36 }
 0x8ef   :  { %v2353_v47 = vshra.s32 %v4925_v62, 16  ;;  %2493 = vmatpush.msra.mxu2 %v3008_v53 }
 0x8f0   :  { %3055 = vmatpush.msrb.mxu3 %v3006_v57 }
 0x8f1   :  { %v4932_v48 = vcvt.s32.f32 %v2353_v47  ;;  %2494 = vmatpush.msra.mxu2 %v3007_v36  ;;  %v3002_v47 = vld [vmem:[%s5681_s2 + $0x198] sm:$0xff] }
 0x8f2   :  { %3056 = vmatpush.msrb.mxu3 %v3005_v17 }
 0x8f3   :  { %2356 = vmin.xlane.f32.xlu1 %v4932_v48  ;;  %v4938_v1 = vpop.xlane.xlu1 %2286  ;;  %2495 = vmatpush.msra.mxu2 %v3006_v57 }
 0x8f4   :  { %vm2288_vm2 = vcmp.eq.f32.partialorder %v4824_v20, %v4938_v1  ;;  %v2159_v23 = vpop.xlane.xlu2 %2158  ;;  %v3003_v20 = vld [vmem:[%s5681_s2 + $0x1a0] sm:$0xff]  ;;  %3057 = vmatpush.msrb.mxu3 %v3004_v18 }
 0x8f5   :  { %vm2178_vm3 = vcmp.eq.f32.partialorder %v4827_v13, %v2159_v23  ;;  %v2289_v54 = vsel %vm2288_vm2, %v2284_v59, inf  ;;  %2496 = vmatpush.msra.mxu2 %v3005_v17  ;;  %v3001_v17 = vld [vmem:[%s5681_s2 + $0x190] sm:$0xff] }
 0x8f6   :  { %v4950_v2 = vsel %vm2178_vm3, %v3259_v37, 128  ;;  %2290 = vmin.xlane.f32.xlu2 %v2289_v54  ;;  %3058 = vmatpush.msrb.mxu3 %v3003_v20  ;;  %v2999_v54 = vld [vmem:[%s5681_s2 + $0x180] sm:$0xff] }
 0x8f7   :  { %v2367_v53 = vshra.s32 %v4950_v2, 16  ;;  %2497 = vmatpush.msra.mxu2 %v3004_v18  ;;  %v2223_v18 = vcvt.f32.s32 %v4835_v10 }
 0x8f8   :  { %3059 = vmatpush.msrb.mxu3 %v3002_v47 }
 0x8f9   :  { %v4956_v13 = vcvt.s32.f32 %v2367_v53  ;;  %2498 = vmatpush.msra.mxu2 %v3003_v20  ;;  %v2296_v53 = vand.u32 65535, %v4840_v43  ;;  %v2310_v43 = vand.u32 65535, %v4855_v63 }
 0x8fa   :  { %3060 = vmatpush.msrb.mxu3 %v3001_v17 }
 0x8fb   :  { %2370 = vmin.xlane.f32.xlu0 %v4956_v13  ;;  %2499 = vmatpush.msra.mxu2 %v3002_v47  ;;  %v2224_v47 = vshll.u32 %v2223_v18, 16 }
 0x8fc   :  { %v2161_v36 = vpop.xlane.xlu2 %2160 }
 0x8fd   :  { %vm2179_vm4 = vcmp.eq.f32.partialorder %v4832_v55, %v2161_v36  ;;  %2500 = vmatpush.msra.mxu2 %v3001_v17  ;;  %v3000_v55 = vld [vmem:[%s5681_s2 + $0x188] sm:$0xff]  ;;  %v2298_v17 = vcvt.s32.f32 %v2296_v53 }
 0x8fe   :  { %v4964_v59 = vsel %vm2179_vm4, %v3259_v37, 128  ;;  %3061 = vmatpush.msrb.mxu3 %v3000_v55 }
 0x8ff   :  { %v2381_v57 = vshra.s32 %v4964_v59, 16  ;;  %2501 = vmatpush.msra.mxu2 %v3000_v55  ;;  %v2237_v55 = vcvt.f32.s32 %v4846_v3 }
 0x900   :  { %3062 = vmatpush.msrb.mxu3 %v2999_v54 }
 0x901   :  { %v4967_v23 = vcvt.s32.f32 %v2381_v57  ;;  %2502 = vmatpush.msra.mxu2 %v2999_v54  ;;  %v2238_v18 = vshll.u32 %v2237_v55, 16  ;;  %v2324_v55 = vand.u32 65535, %v4873_v52  ;;  %v2338_v52 = vand.u32 65535, %v4897_v16 }
 0x903   :  { %2384 = vmin.xlane.f32.xlu2 %v4967_v23 }
 0x941   :  { %v2221_v20 = vpop.xlane.xlu0 %2220 }
 0x942   :  { %v2222_v36 = vcvt.f32.s32 %v2221_v20 }
 0x944   :  { %v2225_v57 = vadd.s32 %v2224_v47, %v2222_v36  ;;  %v2312_v47 = vcvt.s32.f32 %v2310_v43 }
 0x945   :  { %v4981_v60 = vpop.xlane.xlu1 %2300 }
 0x946   :  { %v2684_v51 = vsel %vm2682_vm5, %v4485_v28, %v2225_v57  ;;  %vm2302_vm7 = vcmp.eq.f32.partialorder %v4843_v26, %v4981_v60  ;;  %vm2423_vm8 = vcmp.eq.s32.totalorder %v3259_v37, %v2225_v57 }
 0x947   :  { %2701 = vst.msk [vmem:[%s5682_s4 + $0x8] sm:$0xff] %vm2699_vm6, %v2684_v51  ;;  %3016 = vmatmul.msk.f32.vlgmr.msrb.gmra.mxu3 %vm2423_vm8, %v5773_v5  ;;  %v2303_v10 = vsel %vm2302_vm7, %v2298_v17, inf  ;;  %v2251_v51 = vcvt.f32.s32 %v4863_v0 }
 0x948   :  { %2304 = vmin.xlane.f32.xlu1 %v2303_v10 }
 0x949   :  { %v2235_v3 = vpop.xlane.xlu0 %2234  ;;  %v2163_v54 = vpop.xlane.xlu2 %2162  ;;  %v2252_v17 = vshll.u32 %v2251_v51, 16 }
 0x94a   :  { %v2236_v28 = vcvt.f32.s32 %v2235_v3  ;;  %vm2180_vm9 = vcmp.eq.f32.partialorder %v4849_v27, %v2163_v54  ;;  %v2326_v54 = vcvt.s32.f32 %v2324_v55 }
 0x94b   :  { %v4997_v26 = vsel %vm2180_vm9, %v3259_v37, 128 }
 0x94c   :  { %v2239_v53 = vadd.s32 %v2238_v18, %v2236_v28  ;;  %v2395_v20 = vshra.s32 %v4997_v26, 16 }
 0x94e   :  { %v2685_v36 = vsel %vm2682_vm5, %v4502_v34, %v2239_v53  ;;  %v5003_v57 = vcvt.s32.f32 %v2395_v20  ;;  %v5005_v63 = vpop.xlane.xlu1 %2314  ;;  %vm2424_vm10 = vcmp.eq.s32.totalorder %v3259_v37, %v2239_v53  ;;  %v2265_v20 = vcvt.f32.s32 %v4880_v35 }
 0x94f   :  { %2702 = vst.msk [vmem:[%s5682_s4 + $0x10] sm:$0xff] %vm2699_vm6, %v2685_v36  ;;  %vm2316_vm11 = vcmp.eq.f32.partialorder %v4860_v25, %v5005_v63  ;;  %3017 = vmatmul.msk.f32.gmra.mxu3 %vm2424_vm10, %v5773_v5  ;;  %v2340_v36 = vcvt.s32.f32 %v2338_v52 }
 0x950   :  { %v2317_v27 = vsel %vm2316_vm11, %v2312_v47, inf  ;;  %2398 = vmin.xlane.f32.xlu1 %v5003_v57 }
 0x951   :  { %2318 = vmin.xlane.f32.xlu0 %v2317_v27  ;;  %v2249_v34 = vpop.xlane.xlu0 %2248  ;;  %v2135_v0 = vpop.xlane.xlu2 %2134 }
 0x952   :  { %v2250_v10 = vcvt.f32.s32 %v2249_v34  ;;  %vm2166_vm12 = vcmp.eq.f32.partialorder %v4867_v50, %v2135_v0 }
 0x953   :  { %v5019_v43 = vsel %vm2166_vm12, %v3259_v37, 128 }
 0x954   :  { %v2253_v3 = vadd.s32 %v2252_v17, %v2250_v10  ;;  %v2199_v25 = vshra.s32 %v5019_v43, 16  ;;  %v2266_v17 = vshll.u32 %v2265_v20, 16  ;;  %v2352_v10 = vand.u32 65535, %v4925_v62 }
 0x955   :  { %v2366_v20 = vand.u32 65535, %v4950_v2  ;;  %v2380_v2 = vand.u32 65535, %v4964_v59  ;;  %v2394_v59 = vand.u32 65535, %v4997_v26 }
 0x956   :  { %v2686_v18 = vsel %vm2682_vm5, %v4527_v21, %v2253_v3  ;;  %v5024_v28 = vcvt.s32.f32 %v2199_v25  ;;  %v5026_v53 = vpop.xlane.xlu1 %2328  ;;  %vm2425_vm15 = vcmp.eq.s32.totalorder %v3259_v37, %v2253_v3 }
 0x957   :  { %2703 = vst.msk [vmem:[%s5682_s4 + $0x18] sm:$0xff] %vm2699_vm6, %v2686_v18  ;;  %vm2330_vm14 = vcmp.eq.f32.partialorder %v4877_v12, %v5026_v53  ;;  %3018 = vmatmul.msk.f32.gmra.mxu3 %vm2425_vm15, %v5773_v5  ;;  %v2279_v12 = vcvt.f32.s32 %v4913_v33  ;;  %v2293_v18 = vcvt.f32.s32 %v4938_v1 }
 0x958   :  { %v2331_v50 = vsel %vm2330_vm14, %v2326_v54, inf  ;;  %v2354_v54 = vcvt.s32.f32 %v2352_v10 }
 0x959   :  { %2332 = vmin.xlane.f32.xlu2 %v2331_v50  ;;  %2202 = vmin.xlane.f32.xlu0 %v5024_v28  ;;  %v2165_v21 = vpop.xlane.xlu0 %2164  ;;  %v2280_v3 = vshll.u32 %v2279_v12, 16  ;;  %v2294_v52 = vshll.u32 %v2293_v18, 16  ;;  %v5821_v18 = vld [vmem:[#allocation2_spill] sm:$0xff] }
 0x95a   :  { %vm2181_vm1 = vcmp.eq.f32.partialorder %v4890_v38, %v2165_v21 }
 0x95b   :  { %v5041_v47 = vsel %vm2181_vm1, %v3259_v37, 128 }
 0x95c   :  { %v2409_v51 = vshra.s32 %v5041_v47, 16 }
 0x95e   :  { %v5045_v27 = vcvt.s32.f32 %v2409_v51  ;;  %v2263_v34 = vpop.xlane.xlu1 %2262  ;;  %v5047_v0 = vpop.xlane.xlu2 %2342  ;;  %v2368_v51 = vcvt.s32.f32 %v2366_v20  ;;  %v3068_v20 = vld [vmem:[%s5679_s0 + $0x8] sm:$0xff] }
 0x95f   :  { %v2264_v55 = vcvt.f32.s32 %v2263_v34  ;;  %vm2344_vm2 = vcmp.eq.f32.partialorder %v4907_v7, %v5047_v0  ;;  %v2382_v34 = vcvt.s32.f32 %v2380_v2 }
 0x960   :  { %2412 = vmin.xlane.f32.xlu1 %v5045_v27  ;;  %v2345_v35 = vsel %vm2344_vm2, %v2340_v36, inf }
 0x961   :  { %v2267_v38 = vadd.s32 %v2266_v17, %v2264_v55  ;;  %2346 = vmin.xlane.f32.xlu2 %v2345_v35  ;;  %v2277_v16 = vpop.xlane.xlu0 %2276  ;;  %v2307_v55 = vcvt.f32.s32 %v4981_v60  ;;  %v2396_v60 = vcvt.s32.f32 %v2394_v59 }
 0x962   :  { %v2278_v33 = vcvt.f32.s32 %v2277_v16 }
 0x963   :  { %v2687_v25 = vsel %vm2682_vm5, %v4550_v4, %v2267_v38  ;;  %vm2426_vm3 = vcmp.eq.s32.totalorder %v3259_v37, %v2267_v38 }
 0x964   :  { %2704 = vst.msk [vmem:[%s5682_s4 + $0x20] sm:$0xff] %vm2699_vm6, %v2687_v25  ;;  %v2281_v7 = vadd.s32 %v2280_v3, %v2278_v33  ;;  %3019 = vmatmul.msk.f32.gmra.mxu3 %vm2426_vm3, %v5773_v5  ;;  %v2321_v3 = vcvt.f32.s32 %v5005_v63  ;;  %v2198_v63 = vand.u32 65535, %v5019_v43 }
 0x966   :  { %v2688_v62 = vsel %vm2682_vm5, %v4564_v45, %v2281_v7  ;;  %v5064_v50 = vpop.xlane.xlu1 %2356  ;;  %vm2427_vm7 = vcmp.eq.s32.totalorder %v3259_v37, %v2281_v7  ;;  %v2322_v26 = vshll.u32 %v2321_v3, 16  ;;  %v3069_v3 = vld [vmem:[%s5679_s0 + $0x10] sm:$0xff] }
 0x967   :  { %2705 = vst.msk [vmem:[%s5682_s4 + $0x28] sm:$0xff] %vm2699_vm6, %v2688_v62  ;;  %vm2358_vm4 = vcmp.eq.f32.partialorder %v4932_v48, %v5064_v50  ;;  %v609_v62 = vmul.f32 %v5821_v18, %v5821_v18  ;;  %v5825_v18 = vld [vmem:[#allocation9_spill] sm:$0xff] }
 0x968   :  { %v2359_v4 = vsel %vm2358_vm4, %v2354_v54, inf }
 0x969   :  { %2360 = vmin.xlane.f32.xlu0 %v2359_v4  ;;  %v2291_v21 = vpop.xlane.xlu2 %2290  ;;  %v2335_v4 = vcvt.f32.s32 %v5026_v53 }
 0x96a   :  { %v2292_v1 = vcvt.f32.s32 %v2291_v21  ;;  %v2200_v21 = vcvt.s32.f32 %v2198_v63  ;;  %v2363_v63 = vcvt.f32.s32 %v5064_v50 }
 0x96c   :  { %v2295_v45 = vadd.s32 %v2294_v52, %v2292_v1  ;;  %3020 = vmatmul.msk.f32.gmra.mxu3 %vm2427_vm7, %v5773_v5  ;;  %v625_v1 = vsel %vm41_vm0, %v609_v62, 0.0  ;;  %v615_v62 = vmul.f32 %v5825_v18, %v5825_v18 }
 0x96e   :  { %v2689_v36 = vsel %vm2682_vm5, %v4577_v41, %v2295_v45  ;;  %v5077_v12 = vpop.xlane.xlu0 %2370  ;;  %vm2428_vm9 = vcmp.eq.s32.totalorder %v3259_v37, %v2295_v45  ;;  %v2336_v45 = vshll.u32 %v2335_v4, 16 }
 0x96f   :  { %2706 = vst.msk [vmem:[%s5682_s4 + $0x30] sm:$0xff] %vm2699_vm6, %v2689_v36  ;;  %vm2372_vm8 = vcmp.eq.f32.partialorder %v4956_v13, %v5077_v12  ;;  %v2308_v13 = vshll.u32 %v2307_v55, 16 }
 0x970   :  { %v2373_v48 = vsel %vm2372_vm8, %v2368_v51, inf }
 0x971   :  { %2374 = vmin.xlane.f32.xlu1 %v2373_v48  ;;  %v2408_v48 = vand.u32 65535, %v5041_v47 }
 0x974   :  { %3021 = vmatmul.msk.f32.gmra.mxu3 %vm2428_vm9, %v5773_v5 }
 0x976   :  { %v5088_v41 = vpop.xlane.xlu2 %2384 }
 0x977   :  { %vm2386_vm10 = vcmp.eq.f32.partialorder %v4967_v23, %v5088_v41 }
 0x978   :  { %v2387_v17 = vsel %vm2386_vm10, %v2382_v34, inf  ;;  %v5822_v34 = vld [vmem:[#allocation5_spill] sm:$0xff] }
 0x979   :  { %2388 = vmin.xlane.f32.xlu2 %v2387_v17  ;;  %v612_v17 = vmul.f32 %v5822_v34, %v5822_v34 }
 0x97b   :  { %v634_v59 = vsel %vm41_vm0, %v612_v17, 0.0  ;;  %v2377_v17 = vcvt.f32.s32 %v5077_v12 }
 0x97d   :  { %v2378_v12 = vshll.u32 %v2377_v17, 16 }
 0x9bb   :  { %v2305_v35 = vpop.xlane.xlu1 %2304 }
 0x9bc   :  { %v2306_v38 = vcvt.f32.s32 %v2305_v35 }
 0x9be   :  { %v2309_v16 = vadd.s32 %v2308_v13, %v2306_v38  ;;  %v5823_v13 = vld [vmem:[#allocation3_spill] sm:$0xff]  ;;  %v2410_v38 = vcvt.s32.f32 %v2408_v48 }
 0x9bf   :  { %v610_v47 = vmul.f32 %v5823_v13, %v5823_v13  ;;  %v5829_v13 = vld [vmem:[#allocation12_spill] sm:$0xff] }
 0x9c0   :  { %v2690_v10 = vsel %vm2682_vm5, %v4596_v19, %v2309_v16  ;;  %vm2429_vm11 = vcmp.eq.s32.totalorder %v3259_v37, %v2309_v16 }
 0x9c1   :  { %2707 = vst.msk [vmem:[%s5682_s4 + $0x38] sm:$0xff] %vm2699_vm6, %v2690_v10  ;;  %3022 = vmatmul.msk.f32.gmra.mxu3 %vm2429_vm11, %v5773_v5 }
 0x9c3   :  { %v5103_v23 = vpop.xlane.xlu1 %2398 }
 0x9c4   :  { %v2319_v33 = vpop.xlane.xlu0 %2318  ;;  %vm2400_vm12 = vcmp.eq.f32.partialorder %v5003_v57, %v5103_v23 }
 0x9c5   :  { %v2320_v19 = vcvt.f32.s32 %v2319_v33  ;;  %v2401_v25 = vsel %vm2400_vm12, %v2396_v60, inf }
 0x9c6   :  { %2402 = vmin.xlane.f32.xlu0 %v2401_v25  ;;  %v5824_v25 = vld [vmem:[#allocation4_spill] sm:$0xff] }
 0x9c7   :  { %v2323_v7 = vadd.s32 %v2322_v26, %v2320_v19  ;;  %v628_v19 = vsel %vm41_vm0, %v610_v47, 0.0  ;;  %v616_v47 = vmul.f32 %v5829_v13, %v5829_v13 }
 0x9c9   :  { %v2691_v54 = vsel %vm2682_vm5, %v4616_v11, %v2323_v7  ;;  %vm2430_vm15 = vcmp.eq.s32.totalorder %v3259_v37, %v2323_v7  ;;  %v611_v7 = vmul.f32 %v5824_v25, %v5824_v25 }
 0x9ca   :  { %2708 = vst.msk [vmem:[%s5682_s4 + $0x40] sm:$0xff] %vm2699_vm6, %v2691_v54  ;;  %3023 = vmatmul.msk.f32.gmra.mxu3 %vm2430_vm15, %v5773_v5  ;;  %v2507_v57 = vpop.f32.mrf.mxu3 }
 0x9cb   :  { %v5120_v43 = vsub.f32 %v4621_v46, %v2507_v57  ;;  %v5826_v57 = vld [vmem:[#allocation6_spill] sm:$0xff] }
 0x9cc   :  { %v5122_v11 = vpop.xlane.xlu0 %2202  ;;  %v2333_v52 = vpop.xlane.xlu2 %2332 }
 0x9cd   :  { %v2717_v53 = vsub.f32 %v3068_v20, %v5120_v43  ;;  %vm2204_vm14 = vcmp.eq.f32.partialorder %v5024_v28, %v5122_v11  ;;  %v2334_v51 = vcvt.f32.s32 %v2333_v52  ;;  %v2349_v28 = vcvt.f32.s32 %v5047_v0 }
 0x9ce   :  { %626 = vadd.xlane.f32.xlu0 %v625_v1  ;;  %v2205_v36 = vsel %vm2204_vm14, %v2200_v21, inf  ;;  %v613_v21 = vmul.f32 %v5826_v57, %v5826_v57  ;;  %v631_v52 = vsel %vm41_vm0, %v611_v7, 0.0  ;;  %v2364_v20 = vshll.u32 %v2363_v63, 16  ;;  %v5831_v7 = vld [vmem:[#allocation18_spill] sm:$0xff] }
 0x9cf   :  { %2733 = vst.msk [vmem:[%s5683_s5 + $0x8] sm:$0xff] %vm41_vm0, %v2717_v53  ;;  %2206 = vmin.xlane.f32.xlu1 %v2205_v36  ;;  %v2337_v2 = vadd.s32 %v2336_v45, %v2334_v51  ;;  %v2350_v10 = vshll.u32 %v2349_v28, 16  ;;  %v3070_v53 = vld [vmem:[%s5679_s0 + $0x18] sm:$0xff]  ;;  %v643_v51 = vsel %vm41_vm0, %v615_v62, 0.0  ;;  %v621_v63 = vmul.f32 %v5831_v7, %v5831_v7 }
 0x9d0   :  { %v637_v36 = vsel %vm41_vm0, %v613_v21, 0.0 }
 0x9d1   :  { %v2692_v55 = vsel %vm2682_vm5, %v4634_v8, %v2337_v2  ;;  %vm2431_vm1 = vcmp.eq.s32.totalorder %v3259_v37, %v2337_v2  ;;  %v5827_v2 = vld [vmem:[#allocation7_spill] sm:$0xff]  ;;  %v661_v21 = vsel %vm41_vm0, %v621_v63, 0.0 }
 0x9d2   :  { %v2510_v35 = vpop.f32.mrf.mxu3  ;;  %2709 = vst.msk [vmem:[%s5682_s4 + $0x48] sm:$0xff] %vm2699_vm6, %v2692_v55  ;;  %3024 = vmatmul.msk.f32.gmra.mxu3 %vm2431_vm1, %v5773_v5  ;;  %v614_v34 = vmul.f32 %v5827_v2, %v5827_v2  ;;  %v5828_v55 = vld [vmem:[#allocation15_spill] sm:$0xff] }
 0x9d3   :  { %v5150_v16 = vsub.f32 %v4639_v58, %v2510_v35  ;;  %v5152_v0 = vpop.xlane.xlu1 %2412  ;;  %v618_v35 = vmul.f32 %v5828_v55, %v5828_v55 }
 0x9d4   :  { %vm2414_vm2 = vcmp.eq.f32.partialorder %v5045_v27, %v5152_v0  ;;  %v2347_v8 = vpop.xlane.xlu2 %2346 }
 0x9d5   :  { %v2718_v60 = vsub.f32 %v3069_v3, %v5150_v16  ;;  %v2348_v33 = vcvt.f32.s32 %v2347_v8  ;;  %v2415_v26 = vsel %vm2414_vm2, %v2410_v38, inf }
 0x9d6   :  { %635 = vadd.xlane.f32.xlu0 %v634_v59  ;;  %2416 = vmin.xlane.f32.xlu2 %v2415_v26  ;;  %v640_v59 = vsel %vm41_vm0, %v614_v34, 0.0  ;;  %v5830_v26 = vld [vmem:[#allocation14_spill] sm:$0xff]  ;;  %v3072_v34 = vld [vmem:[%s5679_s0 + $0x28] sm:$0xff] }
 0x9d7   :  { %2734 = vst.msk [vmem:[%s5683_s5 + $0x10] sm:$0xff] %vm41_vm0, %v2718_v60  ;;  %v2351_v27 = vadd.s32 %v2350_v10, %v2348_v33  ;;  %629 = vadd.xlane.f32.xlu1 %v628_v19  ;;  %v646_v10 = vsel %vm41_vm0, %v616_v47, 0.0  ;;  %v617_v19 = vmul.f32 %v5830_v26, %v5830_v26 }
 0x9d9   :  { %v2693_v54 = vsel %vm2682_vm5, %v4648_v15, %v2351_v27  ;;  %vm2432_vm3 = vcmp.eq.s32.totalorder %v3259_v37, %v2351_v27  ;;  %v2391_v27 = vcvt.f32.s32 %v5088_v41  ;;  %v5832_v41 = vld [vmem:[#allocation16_spill] sm:$0xff] }
 0x9da   :  { %2710 = vst.msk [vmem:[%s5682_s4 + $0x50] sm:$0xff] %vm2699_vm6, %v2693_v54  ;;  %v2513_v4 = vpop.f32.mrf.mxu3  ;;  %3025 = vmatmul.msk.f32.gmra.mxu3 %vm2432_vm3, %v5773_v5  ;;  %v3071_v54 = vld [vmem:[%s5679_s0 + $0x20] sm:$0xff]  ;;  %v619_v62 = vmul.f32 %v5832_v41, %v5832_v41 }
 0x9db   :  { %v5182_v50 = vsub.f32 %v4653_v29, %v2513_v4  ;;  %v2392_v4 = vshll.u32 %v2391_v27, 16  ;;  %v1265_v27 = vmul.f32 %v4127_v14, %v4127_v14 }
 0x9dc   :  { %v2361_v15 = vpop.xlane.xlu0 %2360 }
 0x9dd   :  { %v2719_v1 = vsub.f32 %v3070_v53, %v5182_v50  ;;  %v2362_v45 = vcvt.f32.s32 %v2361_v15  ;;  %v649_v15 = vsel %vm41_vm0, %v617_v19, 0.0  ;;  %v1267_v19 = vmul.f32 %v5793_v22, %v5793_v22 }
 0x9de   :  { %644 = vadd.xlane.f32.xlu0 %v643_v51  ;;  %632 = vadd.xlane.f32.xlu2 %v631_v52  ;;  %v655_v52 = vsel %vm41_vm0, %v619_v62, 0.0  ;;  %v5833_v51 = vld [vmem:[#allocation21_spill] sm:$0xff]  ;;  %v1287_v63 = vsel %vm41_vm0, %v1265_v27, 0.0  ;;  %v1266_v22 = vmul.f32 %v4138_v42, %v4138_v42  ;;  %v1273_v62 = vmul.f32 %v5811_v44, %v5811_v44 }
 0x9df   :  { %2735 = vst.msk [vmem:[%s5683_s5 + $0x18] sm:$0xff] %vm41_vm0, %v2719_v1  ;;  %v2365_v48 = vadd.s32 %v2364_v20, %v2362_v45  ;;  %638 = vadd.xlane.f32.xlu1 %v637_v36  ;;  %v624_v36 = vmul.f32 %v5833_v51, %v5833_v51 }
 0x9e1   :  { %v2694_v28 = vsel %vm2682_vm5, %v4662_v6, %v2365_v48  ;;  %vm2433_vm4 = vcmp.eq.s32.totalorder %v3259_v37, %v2365_v48  ;;  %v652_v6 = vsel %vm41_vm0, %v618_v35, 0.0  ;;  %v5834_v48 = vld [vmem:[#allocation17_spill] sm:$0xff]  ;;  %v670_v55 = vsel %vm41_vm0, %v624_v36, 0.0 }
 0x9e2   :  { %2711 = vst.msk [vmem:[%s5682_s4 + $0x58] sm:$0xff] %vm2699_vm6, %v2694_v28  ;;  %3026 = vmatmul.msk.f32.gmra.mxu3 %vm2433_vm4, %v5773_v5  ;;  %v620_v2 = vmul.f32 %v5834_v48, %v5834_v48 }
 0x9e4   :  { %v2375_v38 = vpop.xlane.xlu1 %2374  ;;  %v658_v35 = vsel %vm41_vm0, %v620_v2, 0.0  ;;  %v1916_v2 = vmul.f32 %v4621_v46, %v4621_v46 }
 0x9e5   :  { %v2376_v8 = vcvt.f32.s32 %v2375_v38 }
 0x9e6   :  { %653 = vadd.xlane.f32.xlu0 %v652_v6  ;;  %641 = vadd.xlane.f32.xlu2 %v640_v59  ;;  %v3073_v59 = vld [vmem:[%s5679_s0 + $0x30] sm:$0xff] }
 0x9e7   :  { %v2379_v3 = vadd.s32 %v2378_v12, %v2376_v8  ;;  %v2516_v60 = vpop.f32.mrf.mxu3  ;;  %647 = vadd.xlane.f32.xlu1 %v646_v10  ;;  %v1264_v12 = vmul.f32 %v4116_v39, %v4116_v39  ;;  %v5836_v8 = vld [vmem:[#allocation20_spill] sm:$0xff] }
 0x9e8   :  { %v5214_v33 = vsub.f32 %v4667_v31, %v2516_v60  ;;  %v623_v6 = vmul.f32 %v5836_v8, %v5836_v8  ;;  %v1917_v8 = vmul.f32 %v4639_v58, %v4639_v58 }
 0x9e9   :  { %v2695_v25 = vsel %vm2682_vm5, %v4676_v49, %v2379_v3  ;;  %vm2434_vm7 = vcmp.eq.s32.totalorder %v3259_v37, %v2379_v3  ;;  %v1262_v3 = vmul.f32 %v4085_v30, %v4085_v30  ;;  %v1284_v60 = vsel %vm41_vm0, %v1264_v12, 0.0  ;;  %v5844_v12 = vld [vmem:[#allocation38_spill] sm:$0xff] }
 0x9ea   :  { %2712 = vst.msk [vmem:[%s5682_s4 + $0x60] sm:$0xff] %vm2699_vm6, %v2695_v25  ;;  %v2720_v18 = vsub.f32 %v3071_v54, %v5214_v33  ;;  %3027 = vmatmul.msk.f32.gmra.mxu3 %vm2434_vm7, %v5773_v5  ;;  %v667_v39 = vsel %vm41_vm0, %v623_v6, 0.0  ;;  %v1263_v30 = vmul.f32 %v4101_v61, %v4101_v61  ;;  %v1293_v25 = vsel %vm41_vm0, %v1267_v19, 0.0 }
 0x9eb   :  { %v1278_v26 = vsel %vm41_vm0, %v1262_v3, 0.0  ;;  %v1270_v54 = vmul.f32 %v5805_v40, %v5805_v40  ;;  %v1268_v61 = vmul.f32 %v5796_v32, %v5796_v32  ;;  %v1311_v32 = vsel %vm41_vm0, %v1273_v62, 0.0  ;;  %v5845_v3 = vld [vmem:[#allocation8_spill] sm:$0xff] }
 0x9ec   :  { %2736 = vst.msk [vmem:[%s5683_s5 + $0x20] sm:$0xff] %vm41_vm0, %v2720_v18  ;;  %v2389_v49 = vpop.xlane.xlu2 %2388  ;;  %v1281_v7 = vsel %vm41_vm0, %v1263_v30, 0.0  ;;  %v1290_v18 = vsel %vm41_vm0, %v1266_v22, 0.0  ;;  %v1915_v46 = vmul.f32 %v5844_v12, %v5844_v12  ;;  %v2405_v19 = vcvt.f32.s32 %v5103_v23 }
 0x9ed   :  { %v2390_v57 = vcvt.f32.s32 %v2389_v49  ;;  %v1302_v14 = vsel %vm41_vm0, %v1270_v54, 0.0  ;;  %v1296_v41 = vsel %vm41_vm0, %v1268_v61, 0.0  ;;  %v5837_v49 = vld [vmem:[#allocation27_spill] sm:$0xff]  ;;  %v5847_v54 = vld [vmem:[#allocation24_spill] sm:$0xff] }
 0x9ee   :  { %662 = vadd.xlane.f32.xlu0 %v661_v21  ;;  %650 = vadd.xlane.f32.xlu2 %v649_v15  ;;  %v1269_v40 = vmul.f32 %v5837_v49, %v5837_v49  ;;  %v5839_v15 = vld [vmem:[#allocation35_spill] sm:$0xff]  ;;  %v1923_v22 = vmul.f32 %v5847_v54, %v5847_v54 }
 0x9ef   :  { %v2393_v20 = vadd.s32 %v2392_v4, %v2390_v57  ;;  %v2519_v53 = vpop.f32.mrf.mxu3  ;;  %656 = vadd.xlane.f32.xlu1 %v655_v52  ;;  %v5838_v4 = vld [vmem:[#allocation30_spill] sm:$0xff]  ;;  %v1276_v52 = vmul.f32 %v5839_v15, %v5839_v15 }
 0x9f0   :  { %v5243_v1 = vsub.f32 %v4681_v9, %v2519_v53  ;;  %v1271_v42 = vmul.f32 %v5838_v4, %v5838_v4  ;;  %v1299_v57 = vsel %vm41_vm0, %v1269_v40, 0.0  ;;  %v5841_v53 = vld [vmem:[#allocation33_spill] sm:$0xff]  ;;  %v1955_v62 = vsel %vm41_vm0, %v1923_v22, 0.0  ;;  %v5849_v40 = vld [vmem:[#allocation28_spill] sm:$0xff] }
 0x9f1   :  { %v2696_v45 = vsel %vm2682_vm5, %v4689_v56, %v2393_v20  ;;  %vm2435_vm8 = vcmp.eq.s32.totalorder %v3259_v37, %v2393_v20  ;;  %v5835_v56 = vld [vmem:[#allocation19_spill] sm:$0xff]  ;;  %v1320_v51 = vsel %vm41_vm0, %v1276_v52, 0.0  ;;  %v1928_v4 = vmul.f32 %v5849_v40, %v5849_v40 }
 0x9f2   :  { %2713 = vst.msk [vmem:[%s5682_s4 + $0x68] sm:$0xff] %vm2699_vm6, %v2696_v45  ;;  %v2721_v17 = vsub.f32 %v3072_v34, %v5243_v1  ;;  %v622_v28 = vmul.f32 %v5835_v56, %v5835_v56  ;;  %3028 = vmatmul.msk.f32.gmra.mxu3 %vm2435_vm8, %v5773_v5  ;;  %v1305_v21 = vsel %vm41_vm0, %v1271_v42, 0.0  ;;  %v5840_v20 = vld [vmem:[#allocation31_spill] sm:$0xff]  ;;  %v1274_v45 = vmul.f32 %v5841_v53, %v5841_v53  ;;  %v5842_v34 = vld [vmem:[#allocation34_spill] sm:$0xff]  ;;  %v5843_v56 = vld [vmem:[#allocation36_spill] sm:$0xff] }
 0x9f3   :  { %v1272_v44 = vmul.f32 %v5840_v20, %v5840_v20  ;;  %v5850_v42 = vld [vmem:[#allocation10_spill] sm:$0xff] }
 0x9f4   :  { %2737 = vst.msk [vmem:[%s5683_s5 + $0x28] sm:$0xff] %vm41_vm0, %v2721_v17  ;;  %v664_v13 = vsel %vm41_vm0, %v622_v28, 0.0  ;;  %v1314_v48 = vsel %vm41_vm0, %v1274_v45, 0.0  ;;  %v1275_v17 = vmul.f32 %v5842_v34, %v5842_v34  ;;  %v1277_v28 = vmul.f32 %v5843_v56, %v5843_v56 }
 0x9f5   :  { %v1308_v36 = vsel %vm41_vm0, %v1272_v44, 0.0  ;;  %v1970_v45 = vsel %vm41_vm0, %v1928_v4, 0.0 }
 0x9f6   :  { %671 = vadd.xlane.f32.xlu0 %v670_v55  ;;  %659 = vadd.xlane.f32.xlu2 %v658_v35  ;;  %v1934_v55 = vsel %vm41_vm0, %v1916_v2, 0.0  ;;  %v1317_v35 = vsel %vm41_vm0, %v1275_v17, 0.0  ;;  %v5852_v2 = vld [vmem:[#allocation37_spill] sm:$0xff] }
 0x9f7   :  { %665 = vadd.xlane.f32.xlu1 %v664_v13  ;;  %v2522_v47 = vpop.f32.mrf.mxu3  ;;  %v1323_v13 = vsel %vm41_vm0, %v1277_v28, 0.0  ;;  %v3074_v17 = vld [vmem:[%s5679_s0 + $0x38] sm:$0xff] }
 0x9f8   :  { %v5271_v38 = vsub.f32 %v4694_v24, %v2522_v47  ;;  %v1919_v47 = vmul.f32 %v4667_v31, %v4667_v31  ;;  %v1918_v31 = vmul.f32 %v4653_v29, %v4653_v29  ;;  %v1921_v29 = vmul.f32 %v4694_v24, %v4694_v24 }
 0x9f9   :  { %v2209_v24 = vcvt.f32.s32 %v5122_v11 }
 0x9fa   :  { %v2722_v10 = vsub.f32 %v3073_v59, %v5271_v38  ;;  %v1943_v6 = vsel %vm41_vm0, %v1919_v47, 0.0  ;;  %v1931_v59 = vsel %vm41_vm0, %v1915_v46, 0.0 }
 0x9fb   :  { %v2210_v15 = vshll.u32 %v2209_v24, 16 }
 0x9fc   :  { %2738 = vst.msk [vmem:[%s5683_s5 + $0x30] sm:$0xff] %vm41_vm0, %v2722_v10  ;;  %v1937_v10 = vsel %vm41_vm0, %v1917_v8, 0.0  ;;  %v5854_v8 = vld [vmem:[#allocation13_spill] sm:$0xff] }
 0x9fe   :  { %1285 = vadd.xlane.f32.xlu0 %v1284_v60  ;;  %668 = vadd.xlane.f32.xlu2 %v667_v39  ;;  %v1922_v60 = vmul.f32 %v5845_v3, %v5845_v3  ;;  %v1920_v39 = vmul.f32 %v4681_v9, %v4681_v9 }
 0x9ff   :  { %1279 = vadd.xlane.f32.xlu1 %v1278_v26  ;;  %v1940_v26 = vsel %vm41_vm0, %v1918_v31, 0.0 }
 0xa00   :  { %v1952_v58 = vsel %vm41_vm0, %v1922_v60, 0.0  ;;  %v1946_v30 = vsel %vm41_vm0, %v1920_v39, 0.0  ;;  %v5855_v60 = vld [vmem:[#allocation23_spill] sm:$0xff] }
 0xa06   :  { %1294 = vadd.xlane.f32.xlu0 %v1293_v25  ;;  %1282 = vadd.xlane.f32.xlu2 %v1281_v7  ;;  %v5846_v25 = vld [vmem:[#allocation25_spill] sm:$0xff] }
 0xa07   :  { %1288 = vadd.xlane.f32.xlu1 %v1287_v63  ;;  %v1925_v7 = vmul.f32 %v5846_v25, %v5846_v25  ;;  %v2406_v63 = vshll.u32 %v2405_v19, 16 }
 0xa09   :  { %v1961_v23 = vsel %vm41_vm0, %v1925_v7, 0.0  ;;  %v5856_v7 = vld [vmem:[#allocation29_spill] sm:$0xff] }
 0xa0e   :  { %1303 = vadd.xlane.f32.xlu0 %v1302_v14  ;;  %1291 = vadd.xlane.f32.xlu2 %v1290_v18  ;;  %v1949_v14 = vsel %vm41_vm0, %v1921_v29, 0.0  ;;  %v5848_v18 = vld [vmem:[#allocation22_spill] sm:$0xff]  ;;  %v2569_v29 = vmul.f32 %v5120_v43, %v5120_v43  ;;  %v2570_v43 = vmul.f32 %v5150_v16, %v5150_v16 }
 0xa0f   :  { %1297 = vadd.xlane.f32.xlu1 %v1296_v41 }
 0xa10   :  { %v2590_v16 = vsel %vm41_vm0, %v2570_v43, 0.0 }
 0xa16   :  { %1312 = vadd.xlane.f32.xlu0 %v1311_v32  ;;  %1300 = vadd.xlane.f32.xlu2 %v1299_v57  ;;  %v1924_v32 = vmul.f32 %v5850_v42, %v5850_v42 }
 0xa17   :  { %1306 = vadd.xlane.f32.xlu1 %v1305_v21  ;;  %v5851_v21 = vld [vmem:[#allocation26_spill] sm:$0xff] }
 0xa18   :  { %v1926_v11 = vmul.f32 %v5851_v21, %v5851_v21 }
 0xa1e   :  { %1321 = vadd.xlane.f32.xlu0 %v1320_v51  ;;  %1309 = vadd.xlane.f32.xlu2 %v1308_v36  ;;  %v1958_v51 = vsel %vm41_vm0, %v1924_v32, 0.0  ;;  %v2419_v36 = vcvt.f32.s32 %v5152_v0  ;;  %v2573_v32 = vmul.f32 %v5243_v1, %v5243_v1 }
 0xa1f   :  { %1315 = vadd.xlane.f32.xlu1 %v1314_v48  ;;  %v1964_v48 = vsel %vm41_vm0, %v1926_v11, 0.0 }
 0xa20   :  { %v2599_v1 = vsel %vm41_vm0, %v2573_v32, 0.0 }
 0xa26   :  { %1935 = vadd.xlane.f32.xlu0 %v1934_v55  ;;  %1318 = vadd.xlane.f32.xlu2 %v1317_v35  ;;  %v5853_v55 = vld [vmem:[#allocation11_spill] sm:$0xff] }
 0xa27   :  { %1324 = vadd.xlane.f32.xlu1 %v1323_v13  ;;  %v1927_v35 = vmul.f32 %v5853_v55, %v5853_v55  ;;  %v2420_v13 = vshll.u32 %v2419_v36, 16 }
 0xa2e   :  { %1944 = vadd.xlane.f32.xlu0 %v1943_v6  ;;  %1932 = vadd.xlane.f32.xlu2 %v1931_v59  ;;  %v1929_v6 = vmul.f32 %v5854_v8, %v5854_v8 }
 0xa2f   :  { %1938 = vadd.xlane.f32.xlu1 %v1937_v10 }
 0xa36   :  { %1953 = vadd.xlane.f32.xlu0 %v1952_v58  ;;  %1941 = vadd.xlane.f32.xlu2 %v1940_v26  ;;  %v1973_v58 = vsel %vm41_vm0, %v1929_v6, 0.0  ;;  %v3075_v26 = vld [vmem:[%s5679_s0 + $0x40] sm:$0xff] }
 0xa37   :  { %1947 = vadd.xlane.f32.xlu1 %v1946_v30 }
 0xa39   :  { %v2403_v27 = vpop.xlane.xlu0 %2402 }
 0xa3a   :  { %v2404_v9 = vcvt.f32.s32 %v2403_v27 }
 0xa3c   :  { %v2407_v61 = vadd.s32 %v2406_v63, %v2404_v9 }
 0xa3e   :  { %v2697_v41 = vsel %vm2682_vm5, %v5848_v18, %v2407_v61  ;;  %1962 = vadd.xlane.f32.xlu0 %v1961_v23  ;;  %1950 = vadd.xlane.f32.xlu2 %v1949_v14  ;;  %vm2436_vm9 = vcmp.eq.s32.totalorder %v3259_v37, %v2407_v61  ;;  %v3076_v61 = vld [vmem:[%s5679_s0 + $0x48] sm:$0xff] }
 0xa3f   :  { %2714 = vst.msk [vmem:[%s5682_s4 + $0x70] sm:$0xff] %vm2699_vm6, %v2697_v41  ;;  %1956 = vadd.xlane.f32.xlu1 %v1955_v62  ;;  %3029 = vmatmul.msk.f32.gmra.mxu3 %vm2436_vm9, %v5773_v5  ;;  %v2572_v41 = vmul.f32 %v5214_v33, %v5214_v33  ;;  %v3077_v33 = vld [vmem:[%s5679_s0 + $0x50] sm:$0xff] }
 0xa41   :  { %v5372_v49 = vpop.xlane.xlu0 %626  ;;  %v2596_v4 = vsel %vm41_vm0, %v2572_v41, 0.0 }
 0xa42   :  { %v2207_v57 = vpop.xlane.xlu1 %2206 }
 0xa43   :  { %v2208_v52 = vcvt.f32.s32 %v2207_v57 }
 0xa44   :  { %v2525_v20 = vpop.f32.mrf.mxu3 }
 0xa45   :  { %v2211_v44 = vadd.s32 %v2210_v15, %v2208_v52  ;;  %v5381_v53 = vsub.f32 %v5845_v3, %v2525_v20  ;;  %v1967_v3 = vsel %vm41_vm0, %v1927_v35, 0.0 }
 0xa46   :  { %1971 = vadd.xlane.f32.xlu0 %v1970_v45  ;;  %1959 = vadd.xlane.f32.xlu2 %v1958_v51 }
 0xa47   :  { %vm2422_vm10 = vcmp.eq.s32.totalorder %v3259_v37, %v2211_v44  ;;  %v2683_v34 = vsel %vm2682_vm5, %v5852_v2, %v2211_v44  ;;  %v2723_v56 = vsub.f32 %v3074_v17, %v5381_v53  ;;  %1965 = vadd.xlane.f32.xlu1 %v1964_v48  ;;  %v2575_v52 = vmul.f32 %v5381_v53, %v5381_v53  ;;  %v3078_v53 = vld [vmem:[%s5679_s0 + $0x58] sm:$0xff] }
 0xa48   :  { %2700 = vst.msk [vmem:[%s5682_s4] sm:$0xff] %vm2699_vm6, %v2683_v34  ;;  %3015 = vmatmul.msk.f32.vlgmr.msra.gmra.mxu2 %vm2422_vm10, %v5773_v5 }
 0xa49   :  { %2739 = vst.msk [vmem:[%s5683_s5 + $0x38] sm:$0xff] %vm41_vm0, %v2723_v56  ;;  %v5403_v0 = vpop.xlane.xlu0 %635  ;;  %v2417_v28 = vpop.xlane.xlu2 %2416  ;;  %v2605_v44 = vsel %vm41_vm0, %v2575_v52, 0.0 }
 0xa4a   :  { %v5407_v47 = vpop.xlane.xlu1 %629  ;;  %v2418_v46 = vcvt.f32.s32 %v2417_v28 }
 0xa4c   :  { %v2421_v59 = vadd.s32 %v2420_v13, %v2418_v46  ;;  %v3079_v46 = vld [vmem:[%s5679_s0 + $0x60] sm:$0xff] }
 0xa4d   :  { %v2528_v10 = vpop.f32.mrf.mxu3 }
 0xa4e   :  { %v2698_v31 = vsel %vm2682_vm5, %v5855_v60, %v2421_v59  ;;  %v2560_v39 = vsub.f32 %v5847_v54, %v2528_v10  ;;  %1968 = vadd.xlane.f32.xlu2 %v1967_v3  ;;  %vm2437_vm11 = vcmp.eq.s32.totalorder %v3259_v37, %v2421_v59  ;;  %v1930_v37 = vmul.f32 %v5856_v7, %v5856_v7 }
 0xa4f   :  { %2715 = vst.msk [vmem:[%s5682_s4 + $0x78] sm:$0xff] %vm2699_vm6, %v2698_v31  ;;  %1974 = vadd.xlane.f32.xlu1 %v1973_v58  ;;  %3030 = vmatmul.msk.f32.gmra.mxu3 %vm2437_vm11, %v5773_v5  ;;  %v2587_v54 = vsel %vm41_vm0, %v2569_v29, 0.0 }
 0xa50   :  { %v2724_v19 = vsub.f32 %v3075_v26, %v2560_v39  ;;  %v1976_v63 = vsel %vm41_vm0, %v1930_v37, 0.0  ;;  %v2576_v51 = vmul.f32 %v2560_v39, %v2560_v39  ;;  %v3080_v26 = vld [vmem:[%s5679_s0 + $0x68] sm:$0xff] }
 0xa51   :  { %v5425_v30 = vpop.xlane.xlu0 %644  ;;  %v5427_v27 = vpop.xlane.xlu2 %632 }
 0xa52   :  { %2740 = vst.msk [vmem:[%s5683_s5 + $0x40] sm:$0xff] %vm41_vm0, %v2724_v19  ;;  %v5437_v5 = vpop.xlane.xlu1 %638  ;;  %v2608_v56 = vsel %vm41_vm0, %v2576_v51, 0.0 }
 0xa55   :  { %v2531_v9 = vpop.f32.mrf.mxu3 }
 0xa56   :  { %1977 = vadd.xlane.f32.xlu2 %v1976_v63  ;;  %v5442_v22 = vsub.f32 %v5850_v42, %v2531_v9 }
 0xa57   :  { %2588 = vadd.xlane.f32.xlu1 %v2587_v54 }
 0xa58   :  { %v2725_v23 = vsub.f32 %v3076_v61, %v5442_v22 }
 0xa59   :  { %v5450_v14 = vpop.xlane.xlu0 %653  ;;  %v5452_v18 = vpop.xlane.xlu2 %641 }
 0xa5a   :  { %v5456_v62 = vpop.xlane.xlu1 %647  ;;  %2741 = vst.msk [vmem:[%s5683_s5 + $0x48] sm:$0xff] %vm41_vm0, %v2725_v23 }
 0xa5d   :  { %v2534_v24 = vpop.f32.mrf.mxu3 }
 0xa5e   :  { %2591 = vadd.xlane.f32.xlu2 %v2590_v16  ;;  %v2562_v42 = vsub.f32 %v5846_v25, %v2534_v24 }
 0xa5f   :  { %2597 = vadd.xlane.f32.xlu1 %v2596_v4 }
 0xa60   :  { %v2726_v57 = vsub.f32 %v3077_v33, %v2562_v42  ;;  %v2578_v34 = vmul.f32 %v2562_v42, %v2562_v42 }
 0xa61   :  { %v5470_v11 = vpop.xlane.xlu0 %662  ;;  %v5472_v15 = vpop.xlane.xlu2 %650 }
 0xa62   :  { %v657_v20 = vpop.xlane.xlu1 %656  ;;  %2742 = vst.msk [vmem:[%s5683_s5 + $0x50] sm:$0xff] %vm41_vm0, %v2726_v57  ;;  %v2614_v28 = vsel %vm41_vm0, %v2578_v34, 0.0 }
 0xa65   :  { %v2537_v25 = vpop.f32.mrf.mxu3 }
 0xa66   :  { %2600 = vadd.xlane.f32.xlu2 %v2599_v1  ;;  %v2563_v45 = vsub.f32 %v5851_v21, %v2537_v25 }
 0xa67   :  { %2606 = vadd.xlane.f32.xlu1 %v2605_v44 }
 0xa68   :  { %v2727_v36 = vsub.f32 %v3078_v53, %v2563_v45  ;;  %v2579_v13 = vmul.f32 %v2563_v45, %v2563_v45 }
 0xa69   :  { %v672_v48 = vpop.xlane.xlu0 %671  ;;  %v5486_v2 = vpop.xlane.xlu2 %659 }
 0xa6a   :  { %v666_v17 = vpop.xlane.xlu1 %665  ;;  %2743 = vst.msk [vmem:[%s5683_s5 + $0x58] sm:$0xff] %vm41_vm0, %v2727_v36  ;;  %v2617_v60 = vsel %vm41_vm0, %v2579_v13, 0.0 }
 0xa6d   :  { %v2540_v21 = vpop.f32.mrf.mxu3 }
 0xa6e   :  { %2609 = vadd.xlane.f32.xlu2 %v2608_v56  ;;  %v5495_v35 = vsub.f32 %v5853_v55, %v2540_v21 }
 0xa6f   :  { %2615 = vadd.xlane.f32.xlu1 %v2614_v28 }
 0xa70   :  { %v2728_v6 = vsub.f32 %v3079_v46, %v5495_v35 }
 0xa71   :  { %v5501_v59 = vpop.xlane.xlu0 %1285  ;;  %v669_v10 = vpop.xlane.xlu2 %668 }
 0xa72   :  { %v1280_v3 = vpop.xlane.xlu1 %1279  ;;  %2744 = vst.msk [vmem:[%s5683_s5 + $0x60] sm:$0xff] %vm41_vm0, %v2728_v6 }
 0xa73   :  { %v1326_v55 = vadd.f32 %v1280_v3, %v5372_v49 }
 0xa75   :  { %v2543_v31 = vpop.f32.mrf.mxu3 }
 0xa76   :  { %2618 = vadd.xlane.f32.xlu2 %v2617_v60  ;;  %v2565_v39 = vsub.f32 %v5849_v40, %v2543_v31  ;;  %v3081_v60 = vld [vmem:[%s5679_s0 + $0x70] sm:$0xff] }
 0xa78   :  { %v2581_v58 = vmul.f32 %v2565_v39, %v2565_v39  ;;  %v2729_v19 = vsub.f32 %v3080_v26, %v2565_v39 }
 0xa79   :  { %v5513_v37 = vpop.xlane.xlu0 %1294  ;;  %v1283_v29 = vpop.xlane.xlu2 %1282 }
 0xa7a   :  { %v1289_v63 = vpop.xlane.xlu1 %1288  ;;  %v1327_v9 = vadd.f32 %v1283_v29, %v5407_v47  ;;  %2745 = vst.msk [vmem:[%s5683_s5 + $0x68] sm:$0xff] %vm41_vm0, %v2729_v19  ;;  %v2623_v40 = vsel %vm41_vm0, %v2581_v58, 0.0 }
 0xa7b   :  { %v1329_v49 = vadd.f32 %v1289_v63, %v5403_v0  ;;  %2624 = vadd.xlane.f32.xlu1 %v2623_v40 }
 0xa81   :  { %v5522_v54 = vpop.xlane.xlu0 %1303  ;;  %v1292_v43 = vpop.xlane.xlu2 %1291 }
 0xa82   :  { %v1298_v61 = vpop.xlane.xlu1 %1297  ;;  %v1330_v23 = vadd.f32 %v1292_v43, %v5437_v5  ;;  %v1328_v43 = vadd.f32 %v5501_v59, %v5427_v27 }
 0xa83   :  { %v1332_v41 = vadd.f32 %v1298_v61, %v5425_v30 }
 0xa89   :  { %v5526_v16 = vpop.xlane.xlu0 %1312  ;;  %v1301_v47 = vpop.xlane.xlu2 %1300 }
 0xa8a   :  { %v1307_v24 = vpop.xlane.xlu1 %1306  ;;  %v5529_v4 = vadd.f32 %v1301_v47, %v5456_v62 }
 0xa8b   :  { %v1335_v0 = vadd.f32 %v1307_v24, %v5450_v14 }
 0xa91   :  { %v1322_v42 = vpop.xlane.xlu0 %1321  ;;  %v1310_v32 = vpop.xlane.xlu2 %1309 }
 0xa92   :  { %v1340_v33 = vadd.f32 %v1322_v42, %v669_v10  ;;  %v1316_v57 = vpop.xlane.xlu1 %1315  ;;  %v5532_v52 = vadd.f32 %v1310_v32, %v657_v20 }
 0xa93   :  { %v1338_v1 = vadd.f32 %v1316_v57, %v5470_v11  ;;  %v2571_v57 = vmul.f32 %v5182_v50, %v5182_v50 }
 0xa99   :  { %v1319_v5 = vpop.xlane.xlu2 %1318 }
 0xa9a   :  { %v1325_v25 = vpop.xlane.xlu1 %1324  ;;  %v5535_v30 = vadd.f32 %v1319_v5, %v666_v17  ;;  %v1936_v17 = vpop.xlane.xlu0 %1935 }
 0xa9b   :  { %v1341_v44 = vadd.f32 %v1325_v25, %v672_v48  ;;  %v1980_v58 = vadd.f32 %v1936_v17, %v1327_v9  ;;  %v3082_v9 = vld [vmem:[%s5679_s0] sm:$0xff]  ;;  %v2593_v25 = vsel %vm41_vm0, %v2571_v57, 0.0 }
 0xaa1   :  { %v1933_v45 = vpop.xlane.xlu2 %1932 }
 0xaa2   :  { %v1939_v51 = vpop.xlane.xlu1 %1938  ;;  %v5537_v53 = vadd.f32 %v1933_v45, %v1326_v55  ;;  %v1945_v19 = vpop.xlane.xlu0 %1944 }
 0xaa3   :  { %v1981_v47 = vadd.f32 %v1939_v51, %v1328_v43  ;;  %v1983_v24 = vadd.f32 %v1945_v19, %v1330_v23  ;;  %v3083_v23 = vld [vmem:[%s5679_s0 + $0x78] sm:$0xff] }
 0xaa9   :  { %v1942_v62 = vpop.xlane.xlu2 %1941 }
 0xaaa   :  { %v1948_v36 = vpop.xlane.xlu1 %1947  ;;  %v5539_v14 = vadd.f32 %v1942_v62, %v1329_v49 }
 0xab1   :  { %v1951_v34 = vpop.xlane.xlu2 %1950 }
 0xab2   :  { %v5541_v56 = vpop.xlane.xlu1 %1956  ;;  %v5543_v20 = vadd.f32 %v1951_v34, %v1332_v41 }
 0xab9   :  { %v1960_v21 = vpop.xlane.xlu2 %1959 }
 0xaba   :  { %v5545_v11 = vpop.xlane.xlu1 %1965  ;;  %v5547_v28 = vadd.f32 %v1960_v21, %v1335_v0  ;;  %v2574_v21 = vmul.f32 %v5271_v38, %v5271_v38 }
 0xac1   :  { %v1969_v48 = vpop.xlane.xlu2 %1968 }
 0xac2   :  { %v1975_v13 = vpop.xlane.xlu1 %1974  ;;  %v5549_v46 = vadd.f32 %v1969_v48, %v1338_v1  ;;  %v2546_v6 = vpop.f32.mrf.mxu3 }
 0xac3   :  { %v5551_v10 = vadd.f32 %v1975_v13, %v1340_v33  ;;  %v2566_v3 = vsub.f32 %v5854_v8, %v2546_v6  ;;  %v1954_v1 = vpop.xlane.xlu0 %1953 }
 0xac5   :  { %v2582_v55 = vmul.f32 %v2566_v3, %v2566_v3  ;;  %v2730_v31 = vsub.f32 %v3081_v60, %v2566_v3  ;;  %v2577_v3 = vmul.f32 %v5442_v22, %v5442_v22  ;;  %v2580_v60 = vmul.f32 %v5495_v35, %v5495_v35 }
 0xac7   :  { %2746 = vst.msk [vmem:[%s5683_s5 + $0x70] sm:$0xff] %vm41_vm0, %v2730_v31  ;;  %v2626_v39 = vsel %vm41_vm0, %v2582_v55, 0.0 }
 0xac8   :  { %2627 = vadd.xlane.f32.xlu2 %v2626_v39 }
 0xac9   :  { %v1978_v26 = vpop.xlane.xlu2 %1977 }
 0xaca   :  { %v2589_v29 = vpop.xlane.xlu1 %2588  ;;  %v5562_v63 = vadd.f32 %v1978_v26, %v1341_v44  ;;  %v1986_v44 = vadd.f32 %v1954_v1, %v5529_v4 }
 0xacb   :  { %v2633_v8 = vadd.f32 %v2589_v29, %v1980_v58  ;;  %v2504_v49 = vpop.f32.mrf.mxu2 }
 0xacc   :  { %v2552_v40 = vsub.f32 %v5844_v12, %v2504_v49 }
 0xacd   :  { %2749 = vst.msk [vmem:[%s5684_s6 + $0x8] sm:$0xff] %vm2648_vm13, %v2633_v8 }
 0xace   :  { %v2568_v61 = vmul.f32 %v2552_v40, %v2552_v40  ;;  %v2716_v41 = vsub.f32 %v3082_v9, %v2552_v40 }
 0xad0   :  { %2732 = vst.msk [vmem:[%s5683_s5] sm:$0xff] %vm41_vm0, %v2716_v41  ;;  %v2584_v12 = vsel %vm41_vm0, %v2568_v61, 0.0 }
 0xad1   :  { %2585 = vadd.xlane.f32.xlu0 %v2584_v12  ;;  %v2592_v0 = vpop.xlane.xlu2 %2591 }
 0xad2   :  { %v2598_v42 = vpop.xlane.xlu1 %2597  ;;  %v2634_v32 = vadd.f32 %v2592_v0, %v1981_v47  ;;  %v2549_v27 = vpop.f32.mrf.mxu3 }
 0xad3   :  { %v2636_v59 = vadd.f32 %v2598_v42, %v1983_v24  ;;  %v2567_v33 = vsub.f32 %v5856_v7, %v2549_v27  ;;  %v1331_v7 = vadd.f32 %v5513_v37, %v5452_v18  ;;  %v1334_v18 = vadd.f32 %v5522_v54, %v5472_v15  ;;  %v1963_v37 = vpop.xlane.xlu0 %1962 }
 0xad4   :  { %2750 = vst.msk [vmem:[%s5684_s6 + $0x10] sm:$0xff] %vm2648_vm13, %v2634_v32  ;;  %v1989_v38 = vadd.f32 %v1963_v37, %v5532_v52  ;;  %v1337_v15 = vadd.f32 %v5526_v16, %v5486_v2  ;;  %v2611_v52 = vsel %vm41_vm0, %v2577_v3, 0.0  ;;  %v2620_v16 = vsel %vm41_vm0, %v2580_v60, 0.0 }
 0xad5   :  { %2752 = vst.msk [vmem:[%s5684_s6 + $0x20] sm:$0xff] %vm2648_vm13, %v2636_v59  ;;  %v2731_v5 = vsub.f32 %v3083_v23, %v2567_v33  ;;  %v1984_v50 = vadd.f32 %v1948_v36, %v1331_v7  ;;  %v1987_v4 = vadd.f32 %v5541_v56, %v1334_v18  ;;  %v2602_v36 = vsel %vm41_vm0, %v2574_v21, 0.0 }
 0xad6   :  { %v1990_v54 = vadd.f32 %v5545_v11, %v1337_v15  ;;  %v2583_v11 = vmul.f32 %v2567_v33, %v2567_v33 }
 0xad7   :  { %2747 = vst.msk [vmem:[%s5683_s5 + $0x78] sm:$0xff] %vm41_vm0, %v2731_v5 }
 0xad8   :  { %v2629_v35 = vsel %vm41_vm0, %v2583_v11, 0.0 }
 0xad9   :  { %2594 = vadd.xlane.f32.xlu0 %v2593_v25  ;;  %v2601_v45 = vpop.xlane.xlu2 %2600 }
 0xada   :  { %v2607_v51 = vpop.xlane.xlu1 %2606  ;;  %v2637_v62 = vadd.f32 %v2601_v45, %v1984_v50 }
 0xadb   :  { %v2639_v34 = vadd.f32 %v2607_v51, %v1986_v44  ;;  %v1972_v55 = vpop.xlane.xlu0 %1971 }
 0xadc   :  { %2753 = vst.msk [vmem:[%s5684_s6 + $0x28] sm:$0xff] %vm2648_vm13, %v2637_v62  ;;  %v1992_v31 = vadd.f32 %v1972_v55, %v5535_v30 }
 0xadd   :  { %2755 = vst.msk [vmem:[%s5684_s6 + $0x38] sm:$0xff] %vm2648_vm13, %v2639_v34 }
 0xae1   :  { %2603 = vadd.xlane.f32.xlu0 %v2602_v36  ;;  %v2610_v17 = vpop.xlane.xlu2 %2609 }
 0xae2   :  { %v2616_v48 = vpop.xlane.xlu1 %2615  ;;  %v2640_v13 = vadd.f32 %v2610_v17, %v1987_v4 }
 0xae3   :  { %v2642_v6 = vadd.f32 %v2616_v48, %v1989_v38 }
 0xae4   :  { %2756 = vst.msk [vmem:[%s5684_s6 + $0x40] sm:$0xff] %vm2648_vm13, %v2640_v13 }
 0xae5   :  { %2758 = vst.msk [vmem:[%s5684_s6 + $0x50] sm:$0xff] %vm2648_vm13, %v2642_v6 }
 0xae9   :  { %2612 = vadd.xlane.f32.xlu0 %v2611_v52  ;;  %v2619_v56 = vpop.xlane.xlu2 %2618 }
 0xaea   :  { %v2643_v22 = vadd.f32 %v2619_v56, %v1990_v54 }
 0xaec   :  { %2759 = vst.msk [vmem:[%s5684_s6 + $0x58] sm:$0xff] %vm2648_vm13, %v2643_v22 }
 0xaee   :  { %v2625_v39 = vpop.xlane.xlu1 %2624 }
 0xaef   :  { %v2645_v2 = vadd.f32 %v2625_v39, %v1992_v31 }
 0xaf1   :  { %2621 = vadd.xlane.f32.xlu0 %v2620_v16  ;;  %2761 = vst.msk [vmem:[%s5684_s6 + $0x68] sm:$0xff] %vm2648_vm13, %v2645_v2 }
 0xaf9   :  { %2630 = vadd.xlane.f32.xlu0 %v2629_v35 }
 0xb3b   :  { %v2628_v58 = vpop.xlane.xlu2 %2627 }
 0xb3c   :  { %v2646_v26 = vadd.f32 %v2628_v58, %v5551_v10 }
 0xb3e   :  { %2762 = vst.msk [vmem:[%s5684_s6 + $0x70] sm:$0xff] %vm2648_vm13, %v2646_v26 }
 0xb44   :  { %v2586_v30 = vpop.xlane.xlu0 %2585 }
 0xb45   :  { %v2632_v19 = vadd.f32 %v2586_v30, %v5537_v53 }
 0xb47   :  { %2748 = vst.msk [vmem:[%s5684_s6] sm:$0xff] %vm2648_vm13, %v2632_v19 }
 0xb4c   :  { %v2595_v29 = vpop.xlane.xlu0 %2594 }
 0xb4d   :  { %v2635_v8 = vadd.f32 %v2595_v29, %v5539_v14 }
 0xb4f   :  { %2751 = vst.msk [vmem:[%s5684_s6 + $0x18] sm:$0xff] %vm2648_vm13, %v2635_v8 }
 0xb54   :  { %v2604_v10 = vpop.xlane.xlu0 %2603 }
 0xb55   :  { %v2638_v49 = vadd.f32 %v2604_v10, %v5543_v20 }
 0xb57   :  { %2754 = vst.msk [vmem:[%s5684_s6 + $0x30] sm:$0xff] %vm2648_vm13, %v2638_v49 }
 0xb5c   :  { %v2613_v53 = vpop.xlane.xlu0 %2612 }
 0xb5d   :  { %v2641_v40 = vadd.f32 %v2613_v53, %v5547_v28 }
 0xb5f   :  { %2757 = vst.msk [vmem:[%s5684_s6 + $0x48] sm:$0xff] %vm2648_vm13, %v2641_v40 }
 0xb64   :  { %v2622_v14 = vpop.xlane.xlu0 %2621 }
 0xb65   :  { %v2644_v43 = vadd.f32 %v2622_v14, %v5549_v46 }
 0xb67   :  { %2760 = vst.msk [vmem:[%s5684_s6 + $0x60] sm:$0xff] %vm2648_vm13, %v2644_v43 }
 0xb6c   :  { %v2631_v20 = vpop.xlane.xlu0 %2630 }
 0xb6d   :  { %v2647_v61 = vadd.f32 %v2631_v20, %v5562_v63 }
 0xb6f   :  { %2763 = vst.msk [vmem:[%s5684_s6 + $0x78] sm:$0xff] %vm2648_vm13, %v2647_v61 }

</bundles_post_ra>
